<compile_context>
chip_gen: v5e
topology: v5e:2x2
jax: 0.10.0
libtpu: 0.0.40
codegen_flags: <defaults>
</compile_context>

<pallas_src>
import numpy as np
import jax
import jax.numpy as jnp
from jax.experimental import pallas as pl
from jax.experimental.pallas import tpu as pltpu


# ------------------------------------------------------------------ constants
def _vmem_limit_bytes():
    """Generation-aware VMEM request: 75% of physical, fallback 48 MiB."""
    try:
        cap = int(pltpu.get_tpu_info().vmem_capacity_bytes)
    except Exception:
        cap = 64 * 1024 * 1024
    return (cap * 3) // 4


_VMEM_LIMIT = _vmem_limit_bytes()
_CDT = jnp.bfloat16                                  # MXU operand / activation dtype
_DIL1 = ((1, 1),)                                    # plain 3x3 (dilation, padding)
_ASPP = ((3, 3), (6, 6), (12, 12), (18, 18))         # Classifier_Module branches
_PW = ((1, 0),)                                      # 1x1 conv, no padding


def _row_block(H, W, target=256):
    """Largest divisor TH of H with TH*W ~ target rows for the MXU M dim."""
    want = max(1, -(-target // W))
    th = 1
    for t in range(1, min(H, want) + 1):
        if H % t == 0:
            th = t
    return th


# ---------------------------------------------------------------------- convs
def _conv_branch_sum(x, w, b, dil_pad, *, relu_in=False, relu_out=False,
                     residual=None, out_dtype=_CDT):
    """Sum over branches of KxK dilated convs (stride 1), fused bias/ReLU/residual.

    x: (N, H, W, Cin);  w: (B, K, K, Cin, Cout);  b: (B, Cout)
    dil_pad: tuple of (dilation, padding) per branch (padding keeps output HxW).
    residual: optional (N, H, W, Cout) added to the result.
    """
    N, H, W, Cin = x.shape
    Bn, K, _, _, Cout = w.shape
    P = max(p for _, p in dil_pad)
    xp = jnp.pad(x.astype(_CDT), ((0, 0), (P, P), (P, P), (0, 0)))
    Hp, Wp = H + 2 * P, W + 2 * P
    w_flat = w.reshape(Bn * K * K, Cin, Cout).astype(_CDT)
    b_sum = jnp.sum(b.astype(jnp.float32), axis=0, keepdims=True)  # branch biases add
    has_res = residual is not None

    TH = _row_block(H, W)

    # Static tap list; prune ASPP taps whose window is entirely zero padding
    # (dilation >= feature-map extent) -- they contribute exactly zero.
    taps = []
    for bi, (d, p) in enumerate(dil_pad):
        prunable = (K == 3 and p == d)
        for kh in range(K):
            if prunable and kh != 1 and d >= H:
                continue
            kws = tuple(kw for kw in range(K)
                        if not (prunable and kw != 1 and d >= W))
            if kws:
                taps.append((bi, d, p, kh, kws))

    def kernel(x_ref, w_ref, b_ref, *rest):
        if has_res:
            r_ref, o_ref = rest
        else:
            (o_ref,) = rest
        hb = pl.program_id(1)
        h0 = pl.multiple_of(hb * TH, TH)
        acc = jnp.zeros((TH * W, Cout), jnp.float32)
        for bi, d, p, kh, kws in taps:
            r0 = h0 + (P - p) + kh * d
            rows = x_ref[pl.ds(r0, TH), :, :]          # (TH, Wp, Cin) bf16, loaded once
            if relu_in:
                rows = jnp.maximum(rows, 0)            # ReLU once per (branch, kh)
            for kw in kws:
                c0 = (P - p) + kw * d                  # static column offset
                patch = rows[:, c0:c0 + W, :].reshape(TH * W, Cin)
                ti = (bi * K + kh) * K + kw
                acc = acc + jnp.dot(patch, w_ref[ti],
                                    preferred_element_type=jnp.float32)
        acc = acc + b_ref[...]
        if relu_out:
            acc = jnp.maximum(acc, 0.0)
        acc = acc.reshape(TH, W, Cout)
        if has_res:
            acc = acc + r_ref[...].astype(jnp.float32)
        o_ref[...] = acc.astype(o_ref.dtype)

    in_specs = [
        # TODO(synk): at high resolutions replace the whole-image-resident input
        # with a halo'd H-band (manual DMA double buffer) to bound VMEM on v7x.
        pl.BlockSpec((None, Hp, Wp, Cin), lambda n, hb: (n, 0, 0, 0)),
        pl.BlockSpec((Bn * K * K, Cin, Cout), lambda n, hb: (0, 0, 0)),
        pl.BlockSpec((1, Cout), lambda n, hb: (0, 0)),
    ]
    inputs = [xp, w_flat, b_sum]
    if has_res:
        in_specs.append(pl.BlockSpec((None, TH, W, Cout),
                                     lambda n, hb: (n, hb, 0, 0)))
        inputs.append(residual.astype(_CDT))

    return pl.pallas_call(
        kernel,
        out_shape=jax.ShapeDtypeStruct((N, H, W, Cout), out_dtype),
        grid=(N, H // TH),
        in_specs=in_specs,
        out_specs=pl.BlockSpec((None, TH, W, Cout), lambda n, hb: (n, hb, 0, 0)),
        compiler_params=pltpu.CompilerParams(
            dimension_semantics=("parallel", "parallel"),
            vmem_limit_bytes=_VMEM_LIMIT),
    )(*inputs)


# -------------------------------------------------------------------- maxpool
def _maxpool2x2(x):
    """2x2 max-pool, stride 2.  H striding done in-kernel (2 rows per out row)."""
    N, H, W, C = x.shape
    Ho, Wo = H // 2, W // 2
    xe = x[:, :, 0::2, :]          # even columns (N, H, Wo, C)
    xo = x[:, :, 1::2, :]          # odd  columns
    THp = _row_block(Ho, Wo)

    def kernel(e_ref, o_ref, out_ref):
        e = e_ref[...].reshape(THp, 2, Wo, C)
        o = o_ref[...].reshape(THp, 2, Wo, C)
        out_ref[...] = jnp.maximum(jnp.maximum(e[:, 0], e[:, 1]),
                                   jnp.maximum(o[:, 0], o[:, 1]))

    in_spec = pl.BlockSpec((None, 2 * THp, Wo, C), lambda n, hb: (n, hb, 0, 0))
    return pl.pallas_call(
        kernel,
        out_shape=jax.ShapeDtypeStruct((N, Ho, Wo, C), x.dtype),
        grid=(N, Ho // THp),
        in_specs=[in_spec, in_spec],
        out_specs=pl.BlockSpec((None, THp, Wo, C), lambda n, hb: (n, hb, 0, 0)),
        compiler_params=pltpu.CompilerParams(
            dimension_semantics=("parallel", "parallel"),
            vmem_limit_bytes=_VMEM_LIMIT),
    )(xe, xo)


# ------------------------------------------------------------------- upsample
def _interp_matrix_np(n_out, n_in):
    """1-D bilinear interpolation matrix, align_corners=True (PyTorch semantics)."""
    A = np.zeros((n_out, n_in), dtype=np.float32)
    if n_in == 1:
        A[:, 0] = 1.0
        return A
    scale = (n_in - 1) / (n_out - 1)
    for i in range(n_out):
        src = i * scale
        i0 = min(int(np.floor(src)), n_in - 1)
        i1 = min(i0 + 1, n_in - 1)
        f = src - i0
        A[i, i0] += 1.0 - f
        A[i, i1] += f
    return A


def _upsample1d(x, A):
    """out[n] = A @ x[n]   (x: (N, Li, M), A: (Lo, Li))."""
    N, Li, M = x.shape
    Lo = A.shape[0]

    def kernel(a_ref, x_ref, o_ref):
        o_ref[...] = jnp.dot(a_ref[...], x_ref[...],
                             preferred_element_type=jnp.float32).astype(o_ref.dtype)

    return pl.pallas_call(
        kernel,
        out_shape=jax.ShapeDtypeStruct((N, Lo, M), _CDT),
        grid=(N,),
        in_specs=[pl.BlockSpec((Lo, Li), lambda n: (0, 0)),
                  pl.BlockSpec((None, Li, M), lambda n: (n, 0, 0))],
        out_specs=pl.BlockSpec((None, Lo, M), lambda n: (n, 0, 0)),
        compiler_params=pltpu.CompilerParams(
            dimension_semantics=("parallel",),
            vmem_limit_bytes=_VMEM_LIMIT),
    )(A.astype(_CDT), x.astype(_CDT))


def _upsample2x_bilinear(x):
    """Separable bilinear scale_factor=2, align_corners=True: H pass then W pass."""
    N, Hi, Wi, C = x.shape
    Ho, Wo = 2 * Hi, 2 * Wi
    Ah = jnp.asarray(_interp_matrix_np(Ho, Hi))
    Aw = jnp.asarray(_interp_matrix_np(Wo, Wi))
    t = _upsample1d(x.reshape(N, Hi, Wi * C), Ah).reshape(N, Ho, Wi, C)
    t = jnp.transpose(t, (0, 2, 1, 3)).reshape(N, Wi, Ho * C)
    t = _upsample1d(t, Aw).reshape(N, Wo, Ho, C)
    return jnp.transpose(t, (0, 2, 1, 3))


# ----------------------------------------------------------------- parameters
class _KeyGen:
    def __init__(self, key):
        self._key = key

    def __call__(self):
        self._key, k = jax.random.split(self._key)
        return k


def _make_conv_params(kg, cin, cout, k, n_branch=1, scale=None):
    ws, bs = [], []
    s = scale if scale is not None else (2.0 / (k * k * cin)) ** 0.5
    for _ in range(n_branch):
        ws.append(jax.random.normal(kg(), (k, k, cin, cout), jnp.float32) * s)
        bs.append(jax.random.normal(kg(), (cout,), jnp.float32) * 0.01)
    return jnp.stack(ws), jnp.stack(bs)


def init_params(seed=0, channel=32):
    kg = _KeyGen(jax.random.PRNGKey(seed))
    p = {}
    # B2_VGG backbone (VGG16-style)
    p["vgg1_1"] = _make_conv_params(kg, 3, 64, 3)
    p["vgg1_2"] = _make_conv_params(kg, 64, 64, 3)
    p["vgg2_1"] = _make_conv_params(kg, 64, 128, 3)
    p["vgg2_2"] = _make_conv_params(kg, 128, 128, 3)
    p["vgg3_1"] = _make_conv_params(kg, 128, 256, 3)
    p["vgg3_2"] = _make_conv_params(kg, 256, 256, 3)
    p["vgg3_3"] = _make_conv_params(kg, 256, 256, 3)
    p["vgg4_1"] = _make_conv_params(kg, 256, 512, 3)
    p["vgg4_2"] = _make_conv_params(kg, 512, 512, 3)
    p["vgg4_3"] = _make_conv_params(kg, 512, 512, 3)
    p["vgg5_1"] = _make_conv_params(kg, 512, 512, 3)
    p["vgg5_2"] = _make_conv_params(kg, 512, 512, 3)
    p["vgg5_3"] = _make_conv_params(kg, 512, 512, 3)
    # Classifier_Modules (4 dilated branches each; weights ~ N(0, 0.01))
    p["cls1"] = _make_conv_params(kg, 128, channel, 3, n_branch=4, scale=0.01)
    p["cls2"] = _make_conv_params(kg, 256, channel, 3, n_branch=4, scale=0.01)
    p["cls3"] = _make_conv_params(kg, 512, channel, 3, n_branch=4, scale=0.01)
    p["cls4"] = _make_conv_params(kg, 512, channel, 3, n_branch=4, scale=0.01)
    # FeatureFusionBlocks (path4's rcu1 exists but is unused, as in PyTorch)
    for name in ("path4", "path3", "path2", "path1"):
        for rcu in ("rcu1", "rcu2"):
            for c in ("c1", "c2"):
                p[f"{name}_{rcu}_{c}"] = _make_conv_params(kg, channel, channel, 3)
    # output conv: Conv3x3(ch->128), Conv3x3(128->32), ReLU, Conv1x1(32->1)
    p["out1"] = _make_conv_params(kg, channel, 128, 3)
    p["out2"] = _make_conv_params(kg, 128, 32, 3)
    p["out3"] = _make_conv_params(kg, 32, 1, 1)
    return p


# -------------------------------------------------------------------- forward
def _conv_relu(x, params):
    w, b = params
    return _conv_branch_sum(x, w, b, _DIL1, relu_out=True)


def _rcu(x, p1, p2):
    # ResidualConvUnit: conv2(relu(conv1(relu(x)))) + x   (residual fused)
    h = _conv_branch_sum(x, p1[0], p1[1], _DIL1, relu_in=True)
    return _conv_branch_sum(h, p2[0], p2[1], _DIL1, relu_in=True, residual=x)


def _feature_fusion(p, name, x0, x1=None):
    out = x0
    if x1 is not None:
        out = out + _rcu(x1, p[f"{name}_rcu1_c1"], p[f"{name}_rcu1_c2"])
    out = _rcu(out, p[f"{name}_rcu2_c1"], p[f"{name}_rcu2_c2"])
    return _upsample2x_bilinear(out)


def pred_endecoder_forward(p, x_nchw):
    x = jnp.transpose(x_nchw, (0, 2, 3, 1)).astype(_CDT)          # NCHW -> NHWC
    # B2_VGG
    x = _conv_relu(x, p["vgg1_1"]);  x = _conv_relu(x, p["vgg1_2"])            # H
    x1 = _maxpool2x2(x)
    x1 = _conv_relu(x1, p["vgg2_1"]); x1 = _conv_relu(x1, p["vgg2_2"])         # H/2
    x2 = _maxpool2x2(x1)
    x2 = _conv_relu(x2, p["vgg3_1"]); x2 = _conv_relu(x2, p["vgg3_2"])
    x2 = _conv_relu(x2, p["vgg3_3"])                                           # H/4
    x3 = _maxpool2x2(x2)
    x3 = _conv_relu(x3, p["vgg4_1"]); x3 = _conv_relu(x3, p["vgg4_2"])
    x3 = _conv_relu(x3, p["vgg4_3"])                                           # H/8
    x4 = _maxpool2x2(x3)
    x4 = _conv_relu(x4, p["vgg5_1"]); x4 = _conv_relu(x4, p["vgg5_2"])
    x4 = _conv_relu(x4, p["vgg5_3"])                                           # H/16
    # ASPP-style classifiers
    c1 = _conv_branch_sum(x1, p["cls1"][0], p["cls1"][1], _ASPP)
    c2 = _conv_branch_sum(x2, p["cls2"][0], p["cls2"][1], _ASPP)
    c3 = _conv_branch_sum(x3, p["cls3"][0], p["cls3"][1], _ASPP)
    c4 = _conv_branch_sum(x4, p["cls4"][0], p["cls4"][1], _ASPP)
    # decoder
    f4 = _feature_fusion(p, "path4", c4)            # H/16 -> H/8
    f3 = _feature_fusion(p, "path3", f4, c3)        # H/8  -> H/4
    f2 = _feature_fusion(p, "path2", f3, c2)        # H/4  -> H/2
    f1 = _feature_fusion(p, "path1", f2, c1)        # H/2  -> H
    # output conv
    y = _conv_branch_sum(f1, p["out1"][0], p["out1"][1], _DIL1)
    y = _conv_branch_sum(y, p["out2"][0], p["out2"][1], _DIL1, relu_out=True)
    y = _conv_branch_sum(y, p["out3"][0], p["out3"][1], _PW, out_dtype=jnp.float32)
    return jnp.transpose(y, (0, 3, 1, 2))           # NHWC -> NCHW, (N, 1, H, W)


# ------------------------------------------------------------------------ main
if __name__ == "__main__":
    channel = 32
    params = init_params(seed=0, channel=channel)
    key = jax.random.PRNGKey(0)
    x = jax.random.normal(key, (2, 3, 32, 32), jnp.float32)   # NCHW like PyTorch
    pred = pred_endecoder_forward(params, x)
    pred = jax.block_until_ready(pred)
    assert pred.shape == (2, 1, 32, 32), pred.shape
    assert bool(jnp.all(jnp.isfinite(pred))), "non-finite output"
    print("KERNEL_OK")
</pallas_src>

<mosaic_0001>
module attributes {stable_mosaic.version = 11 : i64} {
  func.func @kernel(%arg0: i32, %arg1: i32, %arg2: memref<1x34x34x3xbf16, #tpu.memory_space<vmem>>, %arg3: memref<9x3x64xbf16, #tpu.memory_space<vmem>>, %arg4: memref<1x64xf32, #tpu.memory_space<vmem>>, %arg5: memref<1x8x32x64xbf16, #tpu.memory_space<vmem>>) attributes {dimension_semantics = [#tpu.dimension_semantics<parallel>, #tpu.dimension_semantics<parallel>], iteration_bounds = array<i64: 2, 4>, scalar_prefetch = 0 : i64, scratch_operands = 0 : i64, tpu.core_type = #tpu.core_type<tc>, window_params = [{transform_indices = @transform_0, window_bounds = array<i64: 1, 34, 34, 3>}, {pipeline_mode = #tpu.pipeline_mode<synchronous>, transform_indices = @transform_1, window_bounds = array<i64: 9, 3, 64>}, {pipeline_mode = #tpu.pipeline_mode<synchronous>, transform_indices = @transform_2, window_bounds = array<i64: 1, 64>}, {transform_indices = @transform_3, window_bounds = array<i64: 1, 8, 32, 64>}]} {
    %c8_i32 = arith.constant 8 : i32
    %0 = arith.muli %arg1, %c8_i32 : i32
    %1 = tpu.assume_multiple %0, 8 : i32
    %cst = arith.constant 0.000000e+00 : f32
    %2 = vector.broadcast %cst : f32 to vector<256x64xf32>
    %c0_i32 = arith.constant 0 : i32
    %3 = arith.addi %1, %c0_i32 : i32
    %c0_i32_0 = arith.constant 0 : i32
    %4 = arith.addi %3, %c0_i32_0 : i32
    %c0 = arith.constant 0 : index
    %5 = arith.index_cast %4 : i32 to index
    %c0_1 = arith.constant 0 : index
    %c0_2 = arith.constant 0 : index
    %6 = vector.load %arg2[%c0, %5, %c0_1, %c0_2] : memref<1x34x34x3xbf16, #tpu.memory_space<vmem>>, vector<1x8x34x3xbf16>
    %7 = vector.shape_cast %6 : vector<1x8x34x3xbf16> to vector<8x34x3xbf16>
    %8 = vector.extract_strided_slice %7 {offsets = [0, 0, 0], sizes = [8, 32, 3], strides = [1, 1, 1]} : vector<8x34x3xbf16> to vector<8x32x3xbf16>
    %9 = vector.shape_cast %8 : vector<8x32x3xbf16> to vector<256x3xbf16>
    %c0_3 = arith.constant 0 : index
    %c0_4 = arith.constant 0 : index
    %c0_5 = arith.constant 0 : index
    %10 = vector.load %arg3[%c0_3, %c0_4, %c0_5] : memref<9x3x64xbf16, #tpu.memory_space<vmem>>, vector<1x3x64xbf16>
    %11 = vector.shape_cast %10 : vector<1x3x64xbf16> to vector<3x64xbf16>
    %cst_6 = arith.constant dense<0.000000e+00> : vector<256x64xf32>
    %12 = tpu.matmul %9, %11, %cst_6 {dimension_numbers = #tpu.dot_dimension_numbers<[1], [0], [0], [1], [0, 0, 1, 1], [], []>} : vector<256x3xbf16>, vector<3x64xbf16>, vector<256x64xf32> -> vector<256x64xf32>
    %13 = arith.addf %2, %12 : vector<256x64xf32>
    %14 = vector.extract_strided_slice %7 {offsets = [0, 1, 0], sizes = [8, 32, 3], strides = [1, 1, 1]} : vector<8x34x3xbf16> to vector<8x32x3xbf16>
    %15 = vector.shape_cast %14 : vector<8x32x3xbf16> to vector<256x3xbf16>
    %c1 = arith.constant 1 : index
    %c0_7 = arith.constant 0 : index
    %c0_8 = arith.constant 0 : index
    %16 = vector.load %arg3[%c1, %c0_7, %c0_8] : memref<9x3x64xbf16, #tpu.memory_space<vmem>>, vector<1x3x64xbf16>
    %17 = vector.shape_cast %16 : vector<1x3x64xbf16> to vector<3x64xbf16>
    %cst_9 = arith.constant dense<0.000000e+00> : vector<256x64xf32>
    %18 = tpu.matmul %15, %17, %cst_9 {dimension_numbers = #tpu.dot_dimension_numbers<[1], [0], [0], [1], [0, 0, 1, 1], [], []>} : vector<256x3xbf16>, vector<3x64xbf16>, vector<256x64xf32> -> vector<256x64xf32>
    %19 = arith.addf %13, %18 : vector<256x64xf32>
    %20 = vector.extract_strided_slice %7 {offsets = [0, 2, 0], sizes = [8, 32, 3], strides = [1, 1, 1]} : vector<8x34x3xbf16> to vector<8x32x3xbf16>
    %21 = vector.shape_cast %20 : vector<8x32x3xbf16> to vector<256x3xbf16>
    %c2 = arith.constant 2 : index
    %c0_10 = arith.constant 0 : index
    %c0_11 = arith.constant 0 : index
    %22 = vector.load %arg3[%c2, %c0_10, %c0_11] : memref<9x3x64xbf16, #tpu.memory_space<vmem>>, vector<1x3x64xbf16>
    %23 = vector.shape_cast %22 : vector<1x3x64xbf16> to vector<3x64xbf16>
    %cst_12 = arith.constant dense<0.000000e+00> : vector<256x64xf32>
    %24 = tpu.matmul %21, %23, %cst_12 {dimension_numbers = #tpu.dot_dimension_numbers<[1], [0], [0], [1], [0, 0, 1, 1], [], []>} : vector<256x3xbf16>, vector<3x64xbf16>, vector<256x64xf32> -> vector<256x64xf32>
    %25 = arith.addf %19, %24 : vector<256x64xf32>
    %c0_i32_13 = arith.constant 0 : i32
    %26 = arith.addi %1, %c0_i32_13 : i32
    %c1_i32 = arith.constant 1 : i32
    %27 = arith.addi %26, %c1_i32 : i32
    %c0_14 = arith.constant 0 : index
    %28 = arith.index_cast %27 : i32 to index
    %c0_15 = arith.constant 0 : index
    %c0_16 = arith.constant 0 : index
    %29 = vector.load %arg2[%c0_14, %28, %c0_15, %c0_16] : memref<1x34x34x3xbf16, #tpu.memory_space<vmem>>, vector<1x8x34x3xbf16>
    %30 = vector.shape_cast %29 : vector<1x8x34x3xbf16> to vector<8x34x3xbf16>
    %31 = vector.extract_strided_slice %30 {offsets = [0, 0, 0], sizes = [8, 32, 3], strides = [1, 1, 1]} : vector<8x34x3xbf16> to vector<8x32x3xbf16>
    %32 = vector.shape_cast %31 : vector<8x32x3xbf16> to vector<256x3xbf16>
    %c3 = arith.constant 3 : index
    %c0_17 = arith.constant 0 : index
    %c0_18 = arith.constant 0 : index
    %33 = vector.load %arg3[%c3, %c0_17, %c0_18] : memref<9x3x64xbf16, #tpu.memory_space<vmem>>, vector<1x3x64xbf16>
    %34 = vector.shape_cast %33 : vector<1x3x64xbf16> to vector<3x64xbf16>
    %cst_19 = arith.constant dense<0.000000e+00> : vector<256x64xf32>
    %35 = tpu.matmul %32, %34, %cst_19 {dimension_numbers = #tpu.dot_dimension_numbers<[1], [0], [0], [1], [0, 0, 1, 1], [], []>} : vector<256x3xbf16>, vector<3x64xbf16>, vector<256x64xf32> -> vector<256x64xf32>
    %36 = arith.addf %25, %35 : vector<256x64xf32>
    %37 = vector.extract_strided_slice %30 {offsets = [0, 1, 0], sizes = [8, 32, 3], strides = [1, 1, 1]} : vector<8x34x3xbf16> to vector<8x32x3xbf16>
    %38 = vector.shape_cast %37 : vector<8x32x3xbf16> to vector<256x3xbf16>
    %c4 = arith.constant 4 : index
    %c0_20 = arith.constant 0 : index
    %c0_21 = arith.constant 0 : index
    %39 = vector.load %arg3[%c4, %c0_20, %c0_21] : memref<9x3x64xbf16, #tpu.memory_space<vmem>>, vector<1x3x64xbf16>
    %40 = vector.shape_cast %39 : vector<1x3x64xbf16> to vector<3x64xbf16>
    %cst_22 = arith.constant dense<0.000000e+00> : vector<256x64xf32>
    %41 = tpu.matmul %38, %40, %cst_22 {dimension_numbers = #tpu.dot_dimension_numbers<[1], [0], [0], [1], [0, 0, 1, 1], [], []>} : vector<256x3xbf16>, vector<3x64xbf16>, vector<256x64xf32> -> vector<256x64xf32>
    %42 = arith.addf %36, %41 : vector<256x64xf32>
    %43 = vector.extract_strided_slice %30 {offsets = [0, 2, 0], sizes = [8, 32, 3], strides = [1, 1, 1]} : vector<8x34x3xbf16> to vector<8x32x3xbf16>
    %44 = vector.shape_cast %43 : vector<8x32x3xbf16> to vector<256x3xbf16>
    %c5 = arith.constant 5 : index
    %c0_23 = arith.constant 0 : index
    %c0_24 = arith.constant 0 : index
    %45 = vector.load %arg3[%c5, %c0_23, %c0_24] : memref<9x3x64xbf16, #tpu.memory_space<vmem>>, vector<1x3x64xbf16>
    %46 = vector.shape_cast %45 : vector<1x3x64xbf16> to vector<3x64xbf16>
    %cst_25 = arith.constant dense<0.000000e+00> : vector<256x64xf32>
    %47 = tpu.matmul %44, %46, %cst_25 {dimension_numbers = #tpu.dot_dimension_numbers<[1], [0], [0], [1], [0, 0, 1, 1], [], []>} : vector<256x3xbf16>, vector<3x64xbf16>, vector<256x64xf32> -> vector<256x64xf32>
    %48 = arith.addf %42, %47 : vector<256x64xf32>
    %c0_i32_26 = arith.constant 0 : i32
    %49 = arith.addi %1, %c0_i32_26 : i32
    %c2_i32 = arith.constant 2 : i32
    %50 = arith.addi %49, %c2_i32 : i32
    %c0_27 = arith.constant 0 : index
    %51 = arith.index_cast %50 : i32 to index
    %c0_28 = arith.constant 0 : index
    %c0_29 = arith.constant 0 : index
    %52 = vector.load %arg2[%c0_27, %51, %c0_28, %c0_29] : memref<1x34x34x3xbf16, #tpu.memory_space<vmem>>, vector<1x8x34x3xbf16>
    %53 = vector.shape_cast %52 : vector<1x8x34x3xbf16> to vector<8x34x3xbf16>
    %54 = vector.extract_strided_slice %53 {offsets = [0, 0, 0], sizes = [8, 32, 3], strides = [1, 1, 1]} : vector<8x34x3xbf16> to vector<8x32x3xbf16>
    %55 = vector.shape_cast %54 : vector<8x32x3xbf16> to vector<256x3xbf16>
    %c6 = arith.constant 6 : index
    %c0_30 = arith.constant 0 : index
    %c0_31 = arith.constant 0 : index
    %56 = vector.load %arg3[%c6, %c0_30, %c0_31] : memref<9x3x64xbf16, #tpu.memory_space<vmem>>, vector<1x3x64xbf16>
    %57 = vector.shape_cast %56 : vector<1x3x64xbf16> to vector<3x64xbf16>
    %cst_32 = arith.constant dense<0.000000e+00> : vector<256x64xf32>
    %58 = tpu.matmul %55, %57, %cst_32 {dimension_numbers = #tpu.dot_dimension_numbers<[1], [0], [0], [1], [0, 0, 1, 1], [], []>} : vector<256x3xbf16>, vector<3x64xbf16>, vector<256x64xf32> -> vector<256x64xf32>
    %59 = arith.addf %48, %58 : vector<256x64xf32>
    %60 = vector.extract_strided_slice %53 {offsets = [0, 1, 0], sizes = [8, 32, 3], strides = [1, 1, 1]} : vector<8x34x3xbf16> to vector<8x32x3xbf16>
    %61 = vector.shape_cast %60 : vector<8x32x3xbf16> to vector<256x3xbf16>
    %c7 = arith.constant 7 : index
    %c0_33 = arith.constant 0 : index
    %c0_34 = arith.constant 0 : index
    %62 = vector.load %arg3[%c7, %c0_33, %c0_34] : memref<9x3x64xbf16, #tpu.memory_space<vmem>>, vector<1x3x64xbf16>
    %63 = vector.shape_cast %62 : vector<1x3x64xbf16> to vector<3x64xbf16>
    %cst_35 = arith.constant dense<0.000000e+00> : vector<256x64xf32>
    %64 = tpu.matmul %61, %63, %cst_35 {dimension_numbers = #tpu.dot_dimension_numbers<[1], [0], [0], [1], [0, 0, 1, 1], [], []>} : vector<256x3xbf16>, vector<3x64xbf16>, vector<256x64xf32> -> vector<256x64xf32>
    %65 = arith.addf %59, %64 : vector<256x64xf32>
    %66 = vector.extract_strided_slice %53 {offsets = [0, 2, 0], sizes = [8, 32, 3], strides = [1, 1, 1]} : vector<8x34x3xbf16> to vector<8x32x3xbf16>
    %67 = vector.shape_cast %66 : vector<8x32x3xbf16> to vector<256x3xbf16>
    %c8 = arith.constant 8 : index
    %c0_36 = arith.constant 0 : index
    %c0_37 = arith.constant 0 : index
    %68 = vector.load %arg3[%c8, %c0_36, %c0_37] : memref<9x3x64xbf16, #tpu.memory_space<vmem>>, vector<1x3x64xbf16>
    %69 = vector.shape_cast %68 : vector<1x3x64xbf16> to vector<3x64xbf16>
    %cst_38 = arith.constant dense<0.000000e+00> : vector<256x64xf32>
    %70 = tpu.matmul %67, %69, %cst_38 {dimension_numbers = #tpu.dot_dimension_numbers<[1], [0], [0], [1], [0, 0, 1, 1], [], []>} : vector<256x3xbf16>, vector<3x64xbf16>, vector<256x64xf32> -> vector<256x64xf32>
    %71 = arith.addf %65, %70 : vector<256x64xf32>
    %c0_39 = arith.constant 0 : index
    %c0_40 = arith.constant 0 : index
    %72 = vector.load %arg4[%c0_39, %c0_40] : memref<1x64xf32, #tpu.memory_space<vmem>>, vector<1x64xf32>
    %73 = vector.broadcast %72 : vector<1x64xf32> to vector<256x64xf32>
    %74 = arith.addf %71, %73 : vector<256x64xf32>
    %cst_41 = arith.constant 0.000000e+00 : f32
    %75 = vector.broadcast %cst_41 : f32 to vector<256x64xf32>
    %76 = arith.maximumf %74, %75 : vector<256x64xf32>
    %77 = vector.shape_cast %76 : vector<256x64xf32> to vector<8x32x64xf32>
    %78 = arith.truncf %77 : vector<8x32x64xf32> to vector<8x32x64xbf16>
    %c0_42 = arith.constant 0 : index
    %c0_43 = arith.constant 0 : index
    %c0_44 = arith.constant 0 : index
    %c0_45 = arith.constant 0 : index
    %79 = vector.load %arg5[%c0_42, %c0_43, %c0_44, %c0_45] : memref<1x8x32x64xbf16, #tpu.memory_space<vmem>>, vector<1x8x32x64xbf16>
    %80 = vector.shape_cast %79 : vector<1x8x32x64xbf16> to vector<8x32x64xbf16>
    %81 = vector.shape_cast %78 : vector<8x32x64xbf16> to vector<1x8x32x64xbf16>
    tpu.vector_store %arg5[%c0_42, %c0_43, %c0_44, %c0_45], %81 {strides = array<i32>} : memref<1x8x32x64xbf16, #tpu.memory_space<vmem>>, vector<1x8x32x64xbf16>,
    return
  }
  func.func @transform_0(%arg0: i32, %arg1: i32) -> (i32, i32, i32, i32) {
    %c0_i32 = arith.constant 0 : i32
    %c0_i32_0 = arith.constant 0 : i32
    %c0_i32_1 = arith.constant 0 : i32
    %c0_i32_2 = arith.constant 0 : i32
    return %arg0, %c0_i32, %c0_i32_0, %c0_i32_1 : i32, i32, i32, i32
  }
  func.func @transform_1(%arg0: i32, %arg1: i32) -> (i32, i32, i32) {
    %c0_i32 = arith.constant 0 : i32
    %c0_i32_0 = arith.constant 0 : i32
    %c0_i32_1 = arith.constant 0 : i32
    %c0_i32_2 = arith.constant 0 : i32
    return %c0_i32, %c0_i32_0, %c0_i32_1 : i32, i32, i32
  }
  func.func @transform_2(%arg0: i32, %arg1: i32) -> (i32, i32) {
    %c0_i32 = arith.constant 0 : i32
    %c0_i32_0 = arith.constant 0 : i32
    %c0_i32_1 = arith.constant 0 : i32
    return %c0_i32, %c0_i32_0 : i32, i32
  }
  func.func @transform_3(%arg0: i32, %arg1: i32) -> (i32, i32, i32, i32) {
    %c0_i32 = arith.constant 0 : i32
    %c0_i32_0 = arith.constant 0 : i32
    %c0_i32_1 = arith.constant 0 : i32
    return %arg0, %arg1, %c0_i32, %c0_i32_0 : i32, i32, i32, i32
  }
}

</mosaic_0001>

<bundles_post_ra>
// kernel: tpu_custom_call.1
= control target key start
LH: loop header
LB: loop body
LE: loop exit
PB: predicated region body
PF: predicated region fallthrough
CT: control target
= control target key end

     0   :  { %8 = vsyncpa [#allocation3], 0  ;;  %s6406_s0 = inlined_call_operand.vmem [shape: bf16[2,34,34,3], index: 0, kind: input, shape index: {}]   ;;  %s6407_s1 = inlined_call_operand.vmem [shape: bf16[9,3,64], index: 1, kind: input, shape index: {}]   ;;  %s6408_s2 = inlined_call_operand.vmem [shape: f32[1,64], index: 2, kind: input, shape index: {}]   ;;  %s6409_s3 = inlined_call_operand.hbm [shape: bf16[2,32,32,64], index: 3, kind: output, shape index: {}]  }
   0x1   :  { %10 = vsyncpa [#allocation3 + $0x1], 0  ;;  %s4767_s12 = smov 0   ;;  %s4769_s13 = smov 0  }
   0x2   :  { %s4771_s14 = smov 0   ;;  %s4773_s15 = smov 0  }
   0x3   :  { %s4775_s16 = smov 0   ;;  %s4777_s17 = smov 0  }
   0x4   :  { %s4779_s18 = smov 0   ;;  %s4781_s19 = smov 0  }
   0x5 LB: > { %s3987_s20 = sadd.s32 4294967295, %s4742_s19   ;;  %s3988_s21 = sadd.s32 4294967294, %s4742_s19   ;;  %s4742_s19 = sphi %s4781_s19, %s16_s19   ;;  %s4738_s18 = sphi %s4779_s18, %s6428_s18   ;;  %s4734_s17 = sphi %s4777_s17, %s6427_s17   ;;  %s4730_s16 = sphi %s4775_s16, %s6426_s16   ;;  %s4726_s15 = sphi %s4773_s15, %s6425_s15   ;;  %s4722_s14 = sphi %s4771_s14, %s6424_s14   ;;  %s4718_s13 = sphi %s4769_s13, %s6423_s13   ;;  %s4714_s12 = sphi %s4767_s12, %s6422_s12  }
   0x6   : > { %s25_s22 = sadd.s32 1, %s4734_s17  ;;  %s28_s23 = sadd.s32 1, %s4738_s18 }
   0x7   : > { %p26_p0 = scmp.ge.s32.totalorder %s25_s22, 4  ;;  %p115_p1 = scmp.ne.s32.totalorder %s4722_s14, %s4718_s13 }
   0x8   : > { %p116_p2 = scmp.eq.s32.totalorder %s3987_s20, 7  ;;  %p121_p5 = scmp.ne.s32.totalorder %s4718_s13, %s4714_s12 }
   0x9   : > { %s6430_s22 = smov (%p26_p0, %s25_s22), 0  ;;  %s6432_s23 = smov (!%p26_p0, %s28_s23), %s4738_s18 }
   0xa   : > { %s101_s24 = ssub.s32 %s4734_s17, %s6430_s22  ;;  %p4818_p3 = por %p116_p2, %p115_p1 }
   0xb   : > { %p30_p4 = scmp.ge.s32.totalorder %s6432_s23, 2  ;;  %p122_p6 = scmp.eq.s32.totalorder %s3988_s21, 7 }
   0xc   : > { %p3991_p7 = scmp.ge.s32.totalorder %s4742_s19, 1  ;;  %p154_p9 = scmp.lt.s32.totalorder %s4742_s19, 9 }
   0xd   : > { %s6434_s23 = smov (%p30_p4, %s6432_s23), 0  ;;  %p4827_p8 = por %p122_p6, %p121_p5 }
   0xe   : > { %s100_s27 = ssub.s32 %s4738_s18, %s6434_s23  ;;  %s105_s28 = sadd.s32 1, %s4722_s14 }
   0xf   : > { %s102_s29 = sor.u32 %s101_s24, %s100_s27  ;;  %p155_p10 = pnand %p3991_p7, %p154_p9 }
  0x10   : > { %p103_p11 = scmp.eq.s32.totalorder %s102_s29, 0 }
  0x11   : > { %158 = sbr.rel (%p155_p10) target bundleno = 772 (0x304), region = 32 }
  0x12   : > { %s4836_s30 = scalar_select %p103_p11, %s4722_s14, %s105_s28  }
  0x16   : > { %v3997_v0 = vld [vmem:[%s6407_s1 + $0x2] sm:$0x3]  ;;  %vm684_vm0 = vcmask 1040384   ;;  %vm685_vm1 = vcmask 1041408   ;;  %p178_p12 = scmp.lt.s32.totalorder %s4730_s16, 1  ;;  %v4744_v1 = vmov 65535  }
  0x17   : > { %v686_v2 = vsel %vm684_vm0, 4294967295, %v4744_v1  ;;  %v4102_v4 = vld [vmem:[%s6407_s1 + $0x4] sm:$0x3]  ;;  %s4456_s9 = smul.u32 160, %s4726_s15  ;;  %v4161_v7 = vld [vmem:[%s6407_s1 + $0x6] sm:$0x3] }
  0x18   : > { %v4842_v3 = vsel %vm685_vm1, %v686_v2, 0  ;;  %s179_s6 = scalar_select %p178_p12, %s4730_s16, 1  ;;  %v229_v8 = vld [vmem:[%s6407_s1] sm:$0x3]  ;;  %v4242_v11 = vld [vmem:[%s6407_s1 + $0x8] sm:$0x3] }
  0x19   : > { %v689_v5 = vand.u32 %v3997_v0, %v4842_v3  ;;  %v1214_v6 = vand.u32 %v4102_v4, %v4842_v3  ;;  %v1512_v9 = vand.u32 %v4161_v7, %v4842_v3  ;;  %v909_v10 = vand.u32 %v4842_v3, %v229_v8  ;;  %s175_s29 = sand.u32 1, %s4718_s13   ;;  %s4505_s8 = sshll.u32 %s4726_s15, 5 }
  0x1a   : > { %s4509_s10 = smul.u32 680, %s179_s6  ;;  %v2086_v12 = vand.u32 %v4242_v11, %v4842_v3  ;;  %vm230_vm2 = vsmask.f32 3328  ;;  %vm231_vm3 = vsmask.f32 7440  ;;  %vm635_vm4 = vcmask 23552  }
  0x1b   : > { %4506 = vmatpush.bf16.msra.mxu1 %v689_v5  ;;  %4507 = vmatpush.bf16.msra.mxu2 %v689_v5  ;;  %vm4890_vm5 = vmor %vm230_vm2, %vm231_vm3  ;;  %vm1008_vm6 = vcmask 1042432   ;;  %vm1009_vm7 = vcmask 1046532   ;;  %s3992_s4 = sshll.u32 %s175_s29, 7  ;;  %vm3849_vm9 = vcmask 519168   ;;  %s3883_s27 = scalar_lea.sflag [#allocation3], %s175_s29 }
  0x1c   : > { %4508 = vmatpush.bf16.msra.mxu3 %v689_v5  ;;  %698 = vmatpush.bf16.msra.mxu0 %v689_v5  ;;  %s182_s5 = scalar_lea.vmem %s6406_s0, %s4509_s10  ;;  %vm5111_vm8 = vmor %vm1008_vm6, %vm1009_vm7 }
  0x1d   : > { %s4866_s6 = scalar_lea.vmem %s182_s5, %s4456_s9  ;;  %s5999_s5 = scalar_lea.vmem [#allocation2], %s3992_s4 }
  0x1e   : > { %v199_v13 = vld [vmem:[%s4866_s6 + $0x28] sm:$0xf]  ;;  %v4870_v14 = vld [vmem:[%s4866_s6 + $0x2c] sm:$0xf]  ;;  %v4873_v15 = vld [vmem:[%s4866_s6 + $0x30] sm:$0xf] }
  0x1f   : > { %1223 = vmatpush.bf16.msrb.mxu2 %v1214_v6  ;;  %918 = vmatpush.bf16.msrb.mxu1 %v909_v10  ;;  %v322_v16 = vshrl.u32 %v199_v13, 16  ;;  %v325_v17 = vshll.u32 %v199_v13, 16  ;;  %v331_v18 = vshll.u32 %v4870_v14, 16  ;;  %v335_v19 = vshrl.u32 %v4870_v14, 16  ;;  %v209_v20 = vld [vmem:[%s4866_s6 + $0x50] sm:$0xf] }
  0x20   : > { %1521 = vmatpush.bf16.msrb.mxu3 %v1512_v9  ;;  %2095 = vmatpush.bf16.msrb.mxu0 %v2086_v12  ;;  %v341_v21 = vshll.u32 %v4873_v15, 16  ;;  %v210_v22 = vld [vmem:[%s4866_s6 + $0x54] sm:$0xf]  ;;  %v4881_v23 = vld [vmem:[%s4866_s6 + $0x58] sm:$0xf]  ;;  %v410_v24 = vshrl.u32 %v209_v20, 16 }
  0x21   : > { %v324_v25 = vrot.slane %v322_v16, 4  ;;  %v327_v26 = vrot.slane %v325_v17, 5  ;;  %v333_v27 = vrot.slane %v331_v18, 5  ;;  %v337_v28 = vrot.slane %v335_v19, 4  ;;  %v219_v29 = vld [vmem:[%s4866_s6 + $0x78] sm:$0xf] }
  0x22   : > { %v4884_v30 = vrot.slane %v341_v21, 5  ;;  %v412_v31 = vrot.slane %v410_v24, 4  ;;  %v413_v32 = vshll.u32 %v209_v20, 16  ;;  %v419_v33 = vshll.u32 %v210_v22, 16  ;;  %v220_v38 = vld [vmem:[%s4866_s6 + $0x7c] sm:$0xf] }
  0x23   : > { %v328_v34 = vor.u32 %v327_v26, %v324_v25  ;;  %v338_v35 = vor.u32 %v337_v28, %v333_v27  ;;  %v423_v36 = vshrl.u32 %v210_v22, 16  ;;  %v429_v37 = vshll.u32 %v4881_v23, 16  ;;  %v4897_v49 = vld [vmem:[%s4866_s6 + $0x80] sm:$0xf]  ;;  %v4911_v6 = vld [vmem:[%s4866_s6 + $0x4] sm:$0xf] }
  0x24   : > { %v415_v40 = vrot.slane %v413_v32, 5  ;;  %v421_v41 = vrot.slane %v419_v33, 5  ;;  %v498_v42 = vshrl.u32 %v219_v29, 16  ;;  %v501_v43 = vshll.u32 %v219_v29, 16  ;;  %v4905_v57 = vld [vmem:[%s4866_s6] sm:$0xf] }
  0x25   : > { %v329_v44 = vrot.slane %v328_v34, 4  ;;  %v339_v45 = vrot.slane %v338_v35, 4  ;;  %v425_v46 = vrot.slane %v423_v36, 4  ;;  %v4894_v47 = vrot.slane %v429_v37, 5  ;;  %v4920_v12 = vld [vmem:[%s4866_s6 + $0x8] sm:$0xf] }
  0x26   : > { %v416_v48 = vor.u32 %v415_v40, %v412_v31  ;;  %v500_v50 = vrot.slane %v498_v42, 4  ;;  %v503_v51 = vrot.slane %v501_v43, 5  ;;  %v507_v52 = vshll.u32 %v220_v38, 16  ;;  %v4927_v19 = vld [vmem:[%s4866_s6 + $0x34] sm:$0xf]  ;;  %s4452_s9 = sshll.u32 %s4730_s16, 7 }
  0x27   : > { %v334_v53 = vsel %vm4890_vm5, %v329_v44, %v333_v27  ;;  %v344_v54 = vsel %vm4890_vm5, %v339_v45, %v4884_v30  ;;  %v426_v55 = vor.u32 %v425_v46, %v421_v41  ;;  %v511_v56 = vshrl.u32 %v220_v38, 16  ;;  %v4933_v28 = vld [vmem:[%s4866_s6 + $0x38] sm:$0x1]  ;;  %v212_v40 = vld [vmem:[%s4866_s6 + $0x5c] sm:$0xf]  ;;  %s3895_s10 = sadd.s32 %s4505_s8, %s4452_s9  ;;  %s3898_s21 = sshll.u32 %s5999_s5, 4  ;;  %s3899_s21 = int_to_ptr.vmem [resolvable:$true] %s3898_s21 }
  0x28   : > { %v595_v58 = vunpack.c.l.b16 %v334_v53  ;;  %v596_v59 = vunpack.c.l.b16 %v344_v54  ;;  %v417_v60 = vrot.slane %v416_v48, 4  ;;  %v504_v61 = vor.u32 %v503_v51, %v500_v50  ;;  %s4453_s11 = sshll.u32 %s3895_s10, 2  ;;  %s4668_s8 = scalar_lea.hbm %s6409_s3, 1024 }
  0x29   : > { %v427_v62 = vrot.slane %v426_v55, 4  ;;  %v509_v63 = vrot.slane %v507_v52, 5  ;;  %v513_v0 = vrot.slane %v511_v56, 4  ;;  %v517_v1 = vshll.u32 %v4897_v49, 16  ;;  %v213_v56 = vld [vmem:[%s4866_s6 + $0x60] sm:$0x1]  ;;  %s3897_s20 = scalar_lea.hbm %s6409_s3, %s4453_s11 }
  0x2a   : > { %v623_v2 = vpack.c.b16 %v596_v59, %v595_v58  ;;  %v422_v4 = vsel %vm4890_vm5, %v417_v60, %v421_v41  ;;  %v505_v5 = vrot.slane %v504_v61, 4  ;;  %v234_v7 = vshrl.u32 %v4905_v57, 16  ;;  %s3900_s24 = sshll.u32 %s3897_s20, 4  ;;  %s3901_s24 = int_to_ptr.hbm [resolvable:$true] %s3900_s24 }
  0x2b   : > { %v432_v8 = vsel %vm4890_vm5, %v427_v62, %v4894_v47  ;;  %v603_v9 = vunpack.c.l.b16 %v422_v4  ;;  %v514_v10 = vor.u32 %v513_v0, %v509_v63  ;;  %v4917_v11 = vrot.slane %v517_v1, 5  ;;  %s4662_s28 = sshra.s32 %s3901_s24, 4  ;;  %s4663_s28 = int_to_ptr.hbm [resolvable:$true] %s4662_s28 }
  0x2c   : > { %4002 = vmatmul.msk.bf16.vlgmr.msra.gmra.mxu1 %vm635_vm4, %v623_v2  ;;  %v604_v13 = vunpack.c.l.b16 %v432_v8  ;;  %v510_v16 = vsel %vm4890_vm5, %v505_v5, %v509_v63  ;;  %v236_v17 = vrot.slane %v234_v7, 4  ;;  %v237_v18 = vshll.u32 %v4905_v57, 16  ;;  %v222_v2 = vld [vmem:[%s4866_s6 + $0x84] sm:$0xf]  ;;  %s4664_s4 = scalar_lea.hbm %s4663_s28, 128  ;;  %p4669_p2 = scmp.lt.s32.totalorder %s4663_s28, %s6409_s3 }
  0x2d   : > { %v515_v20 = vrot.slane %v514_v10, 4  ;;  %v611_v21 = vunpack.c.l.b16 %v510_v16  ;;  %v243_v22 = vshll.u32 %v4911_v6, 16  ;;  %v247_v24 = vshrl.u32 %v4911_v6, 16  ;;  %p4665_p13 = scmp.ne.s32.totalorder %s4663_s28, %s4664_s4  ;;  %p4670_p4 = scmp.lt.s32.totalorder %s4668_s8, %s4664_s4 }
  0x2e   : > { %v627_v25 = vpack.c.b16 %v604_v13, %v603_v9  ;;  %v239_v26 = vrot.slane %v237_v18, 5  ;;  %v253_v27 = vshll.u32 %v4920_v12, 16  ;;  %v345_v29 = vshrl.u32 %v4873_v15, 16  ;;  %v223_v13 = vld [vmem:[%s4866_s6 + $0x88] sm:$0x1] }
  0x2f   : > { %v520_v31 = vsel %vm4890_vm5, %v515_v20, %v4917_v11  ;;  %v245_v32 = vrot.slane %v243_v22, 5  ;;  %v249_v33 = vrot.slane %v247_v24, 4  ;;  %v351_v34 = vshll.u32 %v4927_v19, 16  ;;  %p4666_p0 = pnand %p4665_p13, %p4818_p3  ;;  %p4671_p5 = por %p4670_p4, %p4669_p2 }
  0x30   : > { %4006 = vmatmul.msk.bf16.vlgmr.msra.gmra.mxu2 %vm635_vm4, %v627_v25  ;;  %v612_v35 = vunpack.c.l.b16 %v520_v31  ;;  %v240_v36 = vor.u32 %v239_v26, %v236_v17  ;;  %v4941_v37 = vrot.slane %v253_v27, 5  ;;  %v347_v38 = vrot.slane %v345_v29, 4  ;;  %v4967_v26 = vld [vmem:[%s4866_s6 + $0xc] sm:$0xf] }
  0x31   : > { %v250_v41 = vor.u32 %v249_v33, %v245_v32  ;;  %v353_v42 = vrot.slane %v351_v34, 5  ;;  %v355_v15 = vshrl.u32 %v4927_v19, 16  ;;  %v361_v43 = vshll.u32 %v4933_v28, 16  ;;  %p4667_p1 = pneg %p4666_p0 }
  0x32   : > { %v631_v44 = vpack.c.b16 %v612_v35, %v611_v21  ;;  %v241_v45 = vrot.slane %v240_v36, 4  ;;  %v348_v46 = vor.u32 %v347_v38, %v4884_v30  ;;  %v433_v48 = vshrl.u32 %v4881_v23, 16  ;;  %v4976_v36 = vld [vmem:[%s4866_s6 + $0x3c] sm:$0xf] }
  0x33   : > { %v251_v50 = vrot.slane %v250_v41, 4  ;;  %v357_v51 = vrot.slane %v355_v15, 4  ;;  %v363_v52 = vrot.slane %v361_v43, 5  ;;  %v439_v53 = vshll.u32 %v212_v40, 16  ;;  %p4672_p6 = pnand %p4671_p5, %p4667_p1 }
  0x34   : > { %4010 = vmatmul.msk.bf16.vlgmr.msra.gmra.mxu3 %vm635_vm4, %v631_v44  ;;  %v246_v54 = vsel %vm4890_vm5, %v241_v45, %v245_v32  ;;  %v349_v55 = vrot.slane %v348_v46, 4  ;;  %v435_v58 = vrot.slane %v433_v48, 4  ;;  %v443_v59 = vshrl.u32 %v212_v40, 16  ;;  %v4970_v32 = vld [vmem:[%s4866_s6 + $0x10] sm:$0x1] }
  0x35   : > { %v256_v30 = vsel %vm4890_vm5, %v251_v50, %v4941_v37  ;;  %v587_v23 = vunpack.c.l.b16 %v246_v54  ;;  %v358_v60 = vor.u32 %v357_v51, %v353_v42  ;;  %v441_v61 = vrot.slane %v439_v53, 5  ;;  %v4984_v46 = vld [vmem:[%s4866_s6 + $0x40] sm:$0xf]  ;;  %v4987_v51 = vld [vmem:[%s4866_s6 + $0x44] sm:$0xf] }
  0x36   : > { %v588_v62 = vunpack.c.l.b16 %v256_v30  ;;  %v354_v63 = vsel %vm4890_vm5, %v349_v55, %v353_v42  ;;  %v436_v0 = vor.u32 %v435_v58, %v4894_v47  ;;  %v445_v1 = vrot.slane %v443_v59, 4  ;;  %v214_v58 = vld [vmem:[%s4866_s6 + $0x64] sm:$0xf] }
  0x37   : > { %v359_v4 = vrot.slane %v358_v60, 4  ;;  %v597_v5 = vunpack.c.l.b16 %v354_v63  ;;  %v449_v7 = vshll.u32 %v213_v56, 16  ;;  %v521_v16 = vshrl.u32 %v4897_v49, 16 }
  0x38   : > { %v619_v8 = vpack.c.b16 %v588_v62, %v587_v23  ;;  %v437_v9 = vrot.slane %v436_v0, 4  ;;  %v446_v10 = vor.u32 %v445_v1, %v441_v61  ;;  %v527_v20 = vshll.u32 %v222_v2, 16 }
  0x39   : > { %v364_v17 = vsel %vm4890_vm5, %v359_v4, %v363_v52  ;;  %v451_v18 = vrot.slane %v449_v7, 5  ;;  %v531_v47 = vshrl.u32 %v222_v2, 16  ;;  %v523_v25 = vrot.slane %v521_v16, 4 }
  0x3a   : > { %3998 = vmatmul.msk.bf16.vlgmr.msra.gmra.mxu0 %vm635_vm4, %v619_v8  ;;  %v598_v21 = vunpack.c.l.b16 %v364_v17  ;;  %v442_v22 = vsel %vm4890_vm5, %v437_v9, %v441_v61  ;;  %v447_v24 = vrot.slane %v446_v10, 4  ;;  %v529_v29 = vrot.slane %v527_v20, 5  ;;  %v5008_v20 = vld [vmem:[%s4866_s6 + $0x6c] sm:$0xf] }
  0x3b   : > { %v605_v27 = vunpack.c.l.b16 %v442_v22  ;;  %v533_v49 = vrot.slane %v531_v47, 4  ;;  %v537_v31 = vshll.u32 %v223_v13, 16  ;;  %v524_v35 = vor.u32 %v523_v25, %v4917_v11 }
  0x3c   : > { %v624_v33 = vpack.c.b16 %v598_v21, %v597_v5  ;;  %v452_v34 = vsel %vm4890_vm5, %v447_v24, %v451_v18  ;;  %v257_v42 = vshrl.u32 %v4920_v12, 16  ;;  %v263_v43 = vshll.u32 %v4967_v26, 16  ;;  %v215_v5 = vld [vmem:[%s4866_s6 + $0x68] sm:$0xf] }
  0x3d   : > { %v606_v38 = vunpack.c.l.b16 %v452_v34  ;;  %v534_v40 = vor.u32 %v533_v49, %v529_v29  ;;  %v539_v41 = vrot.slane %v537_v31, 5  ;;  %v525_v15 = vrot.slane %v524_v35, 4 }
  0x3e   : > { %4003 = vmatmul.msk.bf16.gmra.mxu1 %vm635_vm4, %v624_v33  ;;  %v267_v44 = vshrl.u32 %v4967_v26, 16  ;;  %v273_v45 = vshll.u32 %v4970_v32, 16  ;;  %v259_v50 = vrot.slane %v257_v42, 4  ;;  %v366_v52 = vshrl.u32 %v4976_v36, 16 }
  0x3f   : > { %v628_v11 = vpack.c.b16 %v606_v38, %v605_v27  ;;  %v535_v48 = vrot.slane %v534_v40, 4  ;;  %v530_v53 = vsel %vm4890_vm5, %v525_v15, %v529_v29  ;;  %v265_v54 = vrot.slane %v263_v43, 5  ;;  %v225_v43 = vld [vmem:[%s4866_s6 + $0x90] sm:$0xf] }
  0x40   : > { %v269_v55 = vrot.slane %v267_v44, 4  ;;  %v275_v56 = vrot.slane %v273_v45, 5  ;;  %v613_v30 = vunpack.c.l.b16 %v530_v53  ;;  %v260_v23 = vor.u32 %v259_v50, %v4941_v37  ;;  %v224_v37 = vld [vmem:[%s4866_s6 + $0x8c] sm:$0xf] }
  0x41   : > { %4007 = vmatmul.msk.bf16.gmra.mxu2 %vm635_vm4, %v628_v11  ;;  %v540_v59 = vsel %vm4890_vm5, %v535_v48, %v539_v41  ;;  %v368_v60 = vrot.slane %v366_v52, 4  ;;  %v369_v63 = vshll.u32 %v4976_v36, 16  ;;  %v375_v0 = vshll.u32 %v4984_v46, 16  ;;  %v5020_v48 = vld [vmem:[%s4866_s6 + $0x94] sm:$0xf] }
  0x42   : > { %v614_v61 = vunpack.c.l.b16 %v540_v59  ;;  %v270_v62 = vor.u32 %v269_v55, %v265_v54  ;;  %v261_v1 = vrot.slane %v260_v23, 4  ;;  %v379_v2 = vshrl.u32 %v4984_v46, 16  ;;  %v5023_v52 = vld [vmem:[%s4866_s6 + $0x14] sm:$0xf] }
  0x43   : > { %v385_v4 = vshll.u32 %v4987_v51, 16  ;;  %v454_v7 = vshrl.u32 %v214_v58, 16  ;;  %v371_v10 = vrot.slane %v369_v63, 5  ;;  %v377_v13 = vrot.slane %v375_v0, 5 }
  0x44   : > { %v632_v8 = vpack.c.b16 %v614_v61, %v613_v30  ;;  %v271_v9 = vrot.slane %v270_v62, 4  ;;  %v266_v16 = vsel %vm4890_vm5, %v261_v1, %v265_v54  ;;  %v381_v17 = vrot.slane %v379_v2, 4 }
  0x45   : > { %v5005_v18 = vrot.slane %v385_v4, 5  ;;  %v456_v47 = vrot.slane %v454_v7, 4  ;;  %v589_v22 = vunpack.c.l.b16 %v266_v16  ;;  %v372_v24 = vor.u32 %v371_v10, %v368_v60  ;;  %v5037_v7 = vld [vmem:[%s4866_s6 + $0x1c] sm:$0xf] }
  0x46   : > { %4011 = vmatmul.msk.bf16.gmra.mxu3 %vm635_vm4, %v632_v8  ;;  %v276_v21 = vsel %vm4890_vm5, %v271_v9, %v275_v56  ;;  %v457_v25 = vshll.u32 %v214_v58, 16  ;;  %v382_v29 = vor.u32 %v381_v17, %v377_v13  ;;  %v463_v49 = vshll.u32 %v215_v5, 16 }
  0x47   : > { %v590_v27 = vunpack.c.l.b16 %v276_v21  ;;  %v467_v31 = vshrl.u32 %v215_v5, 16  ;;  %v373_v33 = vrot.slane %v372_v24, 4  ;;  %v473_v35 = vshll.u32 %v5008_v20, 16  ;;  %v5034_v5 = vld [vmem:[%s4866_s6 + $0x18] sm:$0xf] }
  0x48   : > { %v459_v34 = vrot.slane %v457_v25, 5  ;;  %v542_v38 = vshrl.u32 %v224_v37, 16  ;;  %v383_v41 = vrot.slane %v382_v29, 4  ;;  %v465_v42 = vrot.slane %v463_v49, 5 }
  0x49   : > { %v620_v40 = vpack.c.b16 %v590_v27, %v589_v22  ;;  %v469_v15 = vrot.slane %v467_v31, 4  ;;  %v378_v44 = vsel %vm4890_vm5, %v373_v33, %v377_v13  ;;  %v5017_v11 = vrot.slane %v473_v35, 5  ;;  %v5050_v31 = vld [vmem:[%s4866_s6 + $0x48] sm:$0xf] }
  0x4a   : > { %v460_v45 = vor.u32 %v459_v34, %v456_v47  ;;  %v544_v50 = vrot.slane %v542_v38, 4  ;;  %v388_v53 = vsel %vm4890_vm5, %v383_v41, %v5005_v18  ;;  %v599_v54 = vunpack.c.l.b16 %v378_v44  ;;  %v5058_v41 = vld [vmem:[%s4866_s6 + $0x4c] sm:$0x1] }
  0x4b   : > { %3999 = vmatmul.msk.bf16.gmra.mxu0 %vm635_vm4, %v620_v40  ;;  %v470_v55 = vor.u32 %v469_v15, %v465_v42  ;;  %v545_v56 = vshll.u32 %v224_v37, 16  ;;  %v600_v58 = vunpack.c.l.b16 %v388_v53  ;;  %v551_v30 = vshll.u32 %v225_v43, 16 }
  0x4c   : > { %v461_v59 = vrot.slane %v460_v45, 4  ;;  %v555_v23 = vshrl.u32 %v225_v43, 16  ;;  %v561_v62 = vshll.u32 %v5020_v48, 16  ;;  %v278_v63 = vshrl.u32 %v5023_v52, 16 }
  0x4d   : > { %v471_v60 = vrot.slane %v470_v55, 4  ;;  %v547_v61 = vrot.slane %v545_v56, 5  ;;  %v625_v0 = vpack.c.b16 %v600_v58, %v599_v54  ;;  %v553_v2 = vrot.slane %v551_v30, 5 }
  0x4e   : > { %v466_v1 = vsel %vm4890_vm5, %v461_v59, %v465_v42  ;;  %v557_v4 = vrot.slane %v555_v23, 4  ;;  %v5042_v13 = vrot.slane %v561_v62, 5  ;;  %v280_v17 = vrot.slane %v278_v63, 4  ;;  %v217_v59 = vld [vmem:[%s4866_s6 + $0x70] sm:$0xf] }
  0x4f   : > { %v476_v8 = vsel %vm4890_vm5, %v471_v60, %v5017_v11  ;;  %v607_v9 = vunpack.c.l.b16 %v466_v1  ;;  %v548_v10 = vor.u32 %v547_v61, %v544_v50  ;;  %4004 = vmatmul.msk.bf16.gmra.mxu1 %vm635_vm4, %v625_v0  ;;  %v281_v47 = vshll.u32 %v5023_v52, 16 }
  0x50   : > { %v608_v37 = vunpack.c.l.b16 %v476_v8  ;;  %v558_v16 = vor.u32 %v557_v4, %v553_v2  ;;  %v287_v22 = vshll.u32 %v5034_v5, 16  ;;  %v291_v24 = vshrl.u32 %v5034_v5, 16 }
  0x51   : > { %v549_v21 = vrot.slane %v548_v10, 4  ;;  %v297_v25 = vshll.u32 %v5037_v7, 16  ;;  %v283_v49 = vrot.slane %v281_v47, 5  ;;  %v389_v33 = vshrl.u32 %v4987_v51, 16  ;;  %v227_v47 = vld [vmem:[%s4866_s6 + $0x98] sm:$0xf] }
  0x52   : > { %v629_v27 = vpack.c.b16 %v608_v37, %v607_v9  ;;  %v559_v29 = vrot.slane %v558_v16, 4  ;;  %v289_v35 = vrot.slane %v287_v22, 5  ;;  %v293_v38 = vrot.slane %v291_v24, 4 }
  0x53   : > { %v554_v34 = vsel %vm4890_vm5, %v549_v21, %v553_v2  ;;  %v5055_v40 = vrot.slane %v297_v25, 5  ;;  %v284_v43 = vor.u32 %v283_v49, %v280_v17  ;;  %v391_v44 = vrot.slane %v389_v33, 4  ;;  %v218_v2 = vld [vmem:[%s4866_s6 + $0x74] sm:$0x1]  ;;  %v228_v33 = vld [vmem:[%s4866_s6 + $0x9c] sm:$0x1] }
  0x54   : > { %4008 = vmatmul.msk.bf16.gmra.mxu2 %vm635_vm4, %v629_v27  ;;  %v564_v42 = vsel %vm4890_vm5, %v559_v29, %v5042_v13  ;;  %v615_v15 = vunpack.c.l.b16 %v554_v34  ;;  %v294_v50 = vor.u32 %v293_v38, %v289_v35  ;;  %v395_v53 = vshll.u32 %v5050_v31, 16 }
  0x55   : > { %v616_v45 = vunpack.c.l.b16 %v564_v42  ;;  %v399_v54 = vshrl.u32 %v5050_v31, 16  ;;  %v285_v55 = vrot.slane %v284_v43, 4  ;;  %v392_v56 = vor.u32 %v391_v44, %v5005_v18 }
  0x56   : > { %v405_v58 = vshll.u32 %v5058_v41, 16  ;;  %v477_v30 = vshrl.u32 %v5008_v20, 16  ;;  %v295_v60 = vrot.slane %v294_v50, 4  ;;  %v397_v61 = vrot.slane %v395_v53, 5 }
  0x57   : > { %v633_v23 = vpack.c.b16 %v616_v45, %v615_v15  ;;  %v401_v62 = vrot.slane %v399_v54, 4  ;;  %v290_v63 = vsel %vm4890_vm5, %v285_v55, %v289_v35  ;;  %v393_v0 = vrot.slane %v392_v56, 4  ;;  %v5089_v45 = vld [vmem:[%s4866_s6 + $0x20] sm:$0xf]  ;;  %v5092_v55 = vld [vmem:[%s4866_s6 + $0x24] sm:$0x1] }
  0x58   : > { %v407_v1 = vrot.slane %v405_v58, 5  ;;  %v479_v4 = vrot.slane %v477_v30, 4  ;;  %v300_v18 = vsel %vm4890_vm5, %v295_v60, %v5055_v40  ;;  %v591_v20 = vunpack.c.l.b16 %v290_v63 }
  0x59   : > { %4012 = vmatmul.msk.bf16.gmra.mxu3 %vm635_vm4, %v633_v23  ;;  %v402_v8 = vor.u32 %v401_v62, %v397_v61  ;;  %v483_v9 = vshll.u32 %v217_v59, 16  ;;  %v592_v10 = vunpack.c.l.b16 %v300_v18  ;;  %v398_v37 = vsel %vm4890_vm5, %v393_v0, %v397_v61 }
  0x5a   : > { %v480_v16 = vor.u32 %v479_v4, %v5017_v11  ;;  %v487_v17 = vshrl.u32 %v217_v59, 16  ;;  %v493_v24 = vshll.u32 %v218_v2, 16  ;;  %v601_v27 = vunpack.c.l.b16 %v398_v37 }
  0x5b   : > { %v403_v21 = vrot.slane %v402_v8, 4  ;;  %v485_v22 = vrot.slane %v483_v9, 5  ;;  %v621_v25 = vpack.c.b16 %v592_v10, %v591_v20  ;;  %v565_v38 = vshrl.u32 %v5020_v48, 16 }
  0x5c   : > { %v481_v29 = vrot.slane %v480_v16, 4  ;;  %v489_v49 = vrot.slane %v487_v17, 4  ;;  %v495_v35 = vrot.slane %v493_v24, 5  ;;  %v571_v42 = vshll.u32 %v227_v47, 16  ;;  %v4326_v17 = vld [vmem:[%s6407_s1 + $0xc] sm:$0x3] }
  0x5d   : > { %v408_v34 = vsel %vm4890_vm5, %v403_v21, %v407_v1  ;;  %4000 = vmatmul.msk.bf16.gmra.mxu0 %vm635_vm4, %v621_v25  ;;  %v575_v44 = vshrl.u32 %v227_v47, 16  ;;  %v567_v50 = vrot.slane %v565_v38, 4  ;;  %v581_v54 = vshll.u32 %v228_v33, 16  ;;  %v4121_v47 = vld [vmem:[%s4866_s6 + $0x14] sm:$0xf] }
  0x5e   : > { %v602_v11 = vunpack.c.l.b16 %v408_v34  ;;  %v486_v15 = vsel %vm4890_vm5, %v481_v29, %v485_v22  ;;  %v490_v43 = vor.u32 %v489_v49, %v485_v22  ;;  %v573_v53 = vrot.slane %v571_v42, 5  ;;  %v4122_v38 = vld [vmem:[%s4866_s6 + $0x18] sm:$0xf] }
  0x5f   : > { %v609_v59 = vunpack.c.l.b16 %v486_v15  ;;  %v577_v48 = vrot.slane %v575_v44, 4  ;;  %v568_v30 = vor.u32 %v567_v50, %v5042_v13  ;;  %v583_v23 = vrot.slane %v581_v54, 5  ;;  %v4123_v50 = vld [vmem:[%s4866_s6 + $0x1c] sm:$0xf] }
  0x60   : > { %v626_v56 = vpack.c.b16 %v602_v11, %v601_v27  ;;  %v491_v58 = vrot.slane %v490_v43, 4  ;;  %v301_v60 = vshrl.u32 %v5037_v7, 16  ;;  %v307_v61 = vshll.u32 %v5089_v45, 16 }
  0x61   : > { %v578_v63 = vor.u32 %v577_v48, %v573_v53  ;;  %v311_v0 = vshrl.u32 %v5089_v45, 16  ;;  %v317_v1 = vshll.u32 %v5092_v55, 16  ;;  %v569_v4 = vrot.slane %v568_v30, 4 }
  0x62   : > { %4005 = vmatmul.msk.bf16.gmra.mxu1 %vm635_vm4, %v626_v56  ;;  %v496_v62 = vsel %vm4890_vm5, %v491_v58, %v495_v35  ;;  %v303_v18 = vrot.slane %v301_v60, 4  ;;  %v309_v13 = vrot.slane %v307_v61, 5  ;;  %v4094_v27 = vrot.slane %v4905_v57, 9  ;;  %v4407_v61 = vld [vmem:[%s6407_s1 + $0xe] sm:$0x3] }
  0x63   : > { %v610_v2 = vunpack.c.l.b16 %v496_v62  ;;  %v579_v20 = vrot.slane %v578_v63, 4  ;;  %v313_v8 = vrot.slane %v311_v0, 4  ;;  %v319_v9 = vrot.slane %v317_v1, 5  ;;  %v4267_v62 = vld [vmem:[%s6407_s1 + $0xa] sm:$0x3] }
  0x64   : > { %v574_v37 = vsel %vm4890_vm5, %v569_v4, %v573_v53  ;;  %v304_v16 = vor.u32 %v303_v18, %v5055_v40  ;;  %v1013_v49 = vrot.slane %v4911_v6, 5  ;;  %v1016_v33 = vrot.slane %v4920_v12, 5  ;;  %v4457_v4 = vld [vmem:[%s4866_s6] sm:$0xff] }
  0x65   : > { %v630_v10 = vpack.c.b16 %v610_v2, %v609_v59  ;;  %v584_v21 = vsel %vm4890_vm5, %v579_v20, %v583_v23  ;;  %v617_v22 = vunpack.c.l.b16 %v574_v37  ;;  %v314_v24 = vor.u32 %v313_v8, %v309_v13  ;;  %v4432_v2 = vld [vmem:[%s6407_s1 + $0x10] sm:$0x3] }
  0x66   : > { %v618_v40 = vunpack.c.l.b16 %v584_v21  ;;  %v305_v29 = vrot.slane %v304_v16, 4  ;;  %v2718_v35 = vand.u32 %v4326_v17, %v4842_v3  ;;  %v1636_v42 = vshrl.u32 %v4121_v47, 16  ;;  %v4124_v17 = vld [vmem:[%s4866_s6 + $0x20] sm:$0xf] }
  0x67   : > { %4009 = vmatmul.msk.bf16.gmra.mxu2 %vm635_vm4, %v630_v10  ;;  %v315_v34 = vrot.slane %v314_v24, 4  ;;  %v1639_v11 = vshll.u32 %v4121_v47, 16  ;;  %v1014_v57 = vsel %vm5111_vm8, %v4094_v27, %v1013_v49  ;;  %v1015_v44 = vrot.slane %v1013_v49, 4 }
  0x68   : > { %v634_v15 = vpack.c.b16 %v618_v40, %v617_v22  ;;  %v310_v43 = vsel %vm4890_vm5, %v305_v29, %v309_v13  ;;  %v1117_v12 = vunpack.c.l.b16 %v1014_v57  ;;  %2727 = vmatpush.bf16.msra.mxu2 %v2718_v35  ;;  %v1638_v54 = vrot.slane %v1636_v42, 4 }
  0x69   : > { %v320_v6 = vsel %vm4890_vm5, %v315_v34, %v319_v9  ;;  %v593_v53 = vunpack.c.l.b16 %v310_v43  ;;  %v1017_v58 = vsel %vm5111_vm8, %v1015_v44, %v1016_v33  ;;  %v1641_v59 = vrot.slane %v1639_v11, 5 }
  0x6a   : > { %4013 = vmatmul.msk.bf16.gmra.mxu3 %vm635_vm4, %v634_v15  ;;  %v594_v56 = vunpack.c.l.b16 %v320_v6  ;;  %v1645_v48 = vshll.u32 %v4122_v38, 16  ;;  %v1118_v30 = vunpack.c.l.b16 %v1017_v58  ;;  %v1649_v23 = vshrl.u32 %v4122_v38, 16 }
  0x6b   : > { %v1655_v60 = vshll.u32 %v4123_v50, 16  ;;  %v1642_v0 = vor.u32 %v1641_v59, %v1638_v54  ;;  %v3292_v8 = vand.u32 %v4407_v61, %v4842_v3  ;;  %v2420_v9 = vand.u32 %v4267_v62, %v4842_v3 }
  0x6c   : > { %v622_v63 = vpack.c.b16 %v594_v56, %v593_v53  ;;  %v1647_v1 = vrot.slane %v1645_v48, 5  ;;  %v1149_v18 = vpack.c.b16 %v1118_v30, %v1117_v12  ;;  %v1651_v13 = vrot.slane %v1649_v23, 4  ;;  %v4126_v48 = vld [vmem:[%s4866_s6 + $0x28] sm:$0xf]  ;;  %v4127_v30 = vld [vmem:[%s4866_s6 + $0x2c] sm:$0xf] }
  0x6d   : > { %v1643_v20 = vrot.slane %v1642_v0, 4  ;;  %v1657_v37 = vrot.slane %v1655_v60, 5  ;;  %v3626_v16 = vand.u32 %v4432_v2, %v4842_v3  ;;  %3301 = vmatpush.bf16.msra.mxu3 %v3292_v8  ;;  %2429 = vmatpush.bf16.msra.mxu1 %v2420_v9  ;;  %v1019_v22 = vrot.slane %v4967_v26, 5  ;;  %v4473_v3 = vld [vmem:[%s4866_s6 + $0x14] sm:$0xff]  ;;  %v4125_v26 = vld [vmem:[%s4866_s6 + $0x24] sm:$0x1] }
  0x6e   : > { %4001 = vmatmul.msk.bf16.gmra.mxu0 %vm635_vm4, %v622_v63  ;;  %v1652_v10 = vor.u32 %v1651_v13, %v1647_v1  ;;  %v1659_v27 = vshrl.u32 %v4123_v50, 16  ;;  %v1665_v40 = vshll.u32 %v4124_v17, 16  ;;  %v1669_v29 = vshrl.u32 %v4124_v17, 16  ;;  %v4128_v17 = vld [vmem:[%s4866_s6 + $0x30] sm:$0xf] }
  0x6f   : > { %3635 = vmatpush.bf16.msra.mxu0 %v3626_v16  ;;  %v1648_v21 = vsel %vm4890_vm5, %v1643_v20, %v1647_v1  ;;  %v1018_v35 = vrot.slane %v1016_v33, 4  ;;  %v1022_v38 = vrot.slane %v4970_v32, 5  ;;  %v1021_v42 = vrot.slane %v1019_v22, 4  ;;  %v4458_v32 = vld [vmem:[%s4866_s6 + $0x8] sm:$0xff] }
  0x70   : > { %v1653_v47 = vrot.slane %v1652_v10, 4  ;;  %v1989_v49 = vunpack.c.l.b16 %v1648_v21  ;;  %v1661_v11 = vrot.slane %v1659_v27, 4  ;;  %v1667_v15 = vrot.slane %v1665_v40, 5  ;;  %v4459_v40 = vld [vmem:[%s4866_s6 + $0x14] sm:$0xff] }
  0x71   : > { %v1671_v43 = vrot.slane %v1669_v29, 4  ;;  %v1020_v44 = vsel %vm5111_vm8, %v1018_v35, %v1019_v22  ;;  %v1023_v50 = vsel %vm5111_vm8, %v1021_v42, %v1022_v38  ;;  %v1675_v53 = vshll.u32 %v4125_v26, 16  ;;  %v4129_v35 = vld [vmem:[%s4866_s6 + $0x34] sm:$0xf] }
  0x72   : > { %4078 = vmatmul.msk.bf16.vlgmr.msrb.gmra.mxu1 %vm635_vm4, %v4457_v4  ;;  %v1658_v24 = vsel %vm4890_vm5, %v1653_v47, %v1657_v37  ;;  %v1662_v6 = vor.u32 %v1661_v11, %v1657_v37  ;;  %v1119_v12 = vunpack.c.l.b16 %v1020_v44  ;;  %v1120_v54 = vunpack.c.l.b16 %v1023_v50 }
  0x73   : > { %v1990_v34 = vunpack.c.l.b16 %v1658_v24  ;;  %v1672_v33 = vor.u32 %v1671_v43, %v1667_v15  ;;  %v1677_v59 = vrot.slane %v1675_v53, 5  ;;  %v1026_v60 = vrot.slane %v5034_v5, 5 }
  0x74   : > { %v1663_v56 = vrot.slane %v1662_v6, 4  ;;  %v1150_v23 = vpack.c.b16 %v1120_v54, %v1119_v12  ;;  %v1680_v61 = vshrl.u32 %v4126_v48, 16  ;;  %v1683_v62 = vshll.u32 %v4126_v48, 16  ;;  %v4475_v6 = vld [vmem:[%s4866_s6 + $0x28] sm:$0xff] }
  0x75   : > { %v2021_v57 = vpack.c.b16 %v1990_v34, %v1989_v49  ;;  %v1673_v58 = vrot.slane %v1672_v33, 4  ;;  %v1689_v1 = vshll.u32 %v4127_v30, 16  ;;  %v1693_v2 = vshrl.u32 %v4127_v30, 16 }
  0x76   : > { %v1668_v63 = vsel %vm4890_vm5, %v1663_v56, %v1667_v15  ;;  %v4095_v4 = vrot.slane %v5023_v52, 9  ;;  %v1682_v5 = vrot.slane %v1680_v61, 4  ;;  %v1685_v8 = vrot.slane %v1683_v62, 5  ;;  %v4460_v61 = vld [vmem:[%s4866_s6 + $0x1c] sm:$0xff] }
  0x77   : > { %4103 = vmatmul.msk.bf16.vlgmr.msrb.gmra.mxu2 %vm635_vm4, %v1149_v18  ;;  %v1678_v0 = vsel %vm4890_vm5, %v1673_v58, %v1677_v59  ;;  %v4474_v18 = vld [vmem:[%s4866_s6 + $0x1c] sm:$0xff]  ;;  %v1991_v13 = vunpack.c.l.b16 %v1668_v63  ;;  %v1028_v9 = vrot.slane %v1026_v60, 4  ;;  %v1029_v10 = vrot.slane %v5037_v7, 5 }
  0x78   : > { %v1992_v20 = vunpack.c.l.b16 %v1678_v0  ;;  %v1691_v37 = vrot.slane %v1689_v1, 5  ;;  %v1695_v16 = vrot.slane %v1693_v2, 4  ;;  %v1686_v21 = vor.u32 %v1685_v8, %v1682_v5  ;;  %v4131_v2 = vld [vmem:[%s4866_s6 + $0x3c] sm:$0xf] }
  0x79   : > { %v1027_v52 = vsel %vm5111_vm8, %v4095_v4, %v1026_v60  ;;  %v1030_v22 = vsel %vm5111_vm8, %v1028_v9, %v1029_v10  ;;  %v1699_v27 = vshll.u32 %v4128_v17, 16  ;;  %v1032_v11 = vrot.slane %v5089_v45, 5  ;;  %v4130_v45 = vld [vmem:[%s4866_s6 + $0x38] sm:$0x1]  ;;  %v4132_v4 = vld [vmem:[%s4866_s6 + $0x40] sm:$0xf] }
  0x7a   : > { %4226 = vmatmul.msk.bf16.vlgmr.msrb.gmra.mxu3 %vm635_vm4, %v4473_v3  ;;  %v2022_v47 = vpack.c.b16 %v1992_v20, %v1991_v13  ;;  %v1696_v24 = vor.u32 %v1695_v16, %v1691_v37  ;;  %v1121_v7 = vunpack.c.l.b16 %v1027_v52  ;;  %v1122_v29 = vunpack.c.l.b16 %v1030_v22 }
  0x7b   : > { %v1687_v3 = vrot.slane %v1686_v21, 4  ;;  %v1701_v34 = vrot.slane %v1699_v27, 5  ;;  %v1703_v15 = vshrl.u32 %v4128_v17, 16  ;;  %v1709_v26 = vshll.u32 %v4129_v35, 16  ;;  %v4476_v17 = vld [vmem:[%s4866_s6 + $0x30] sm:$0xff] }
  0x7c   : > { %v1697_v49 = vrot.slane %v1696_v24, 4  ;;  %v1151_v38 = vpack.c.b16 %v1122_v29, %v1121_v7  ;;  %v1031_v50 = vrot.slane %v1029_v10, 4  ;;  %v1034_v53 = vrot.slane %v1032_v11, 4  ;;  %v4585_v24 = vld [vmem:[%s4866_s6 + $0x28] sm:$0xf] }
  0x7d   : > { %v1692_v42 = vsel %vm4890_vm5, %v1687_v3, %v1691_v37  ;;  %v1705_v12 = vrot.slane %v1703_v15, 4  ;;  %v1711_v54 = vrot.slane %v1709_v26, 5  ;;  %v1719_v60 = vshll.u32 %v4130_v45, 16  ;;  %v4586_v7 = vld [vmem:[%s4866_s6 + $0x30] sm:$0xf] }
  0x7e   : > { %4243 = vmatmul.msk.bf16.vlgmr.msrb.gmra.mxu0 %vm635_vm4, %v2021_v57  ;;  %v1702_v43 = vsel %vm4890_vm5, %v1697_v49, %v1701_v34  ;;  %v1713_v57 = vshrl.u32 %v4129_v35, 16  ;;  %v1993_v44 = vunpack.c.l.b16 %v1692_v42  ;;  %v1033_v59 = vsel %vm5111_vm8, %v1031_v50, %v1032_v11 }
  0x7f   : > { %v1994_v33 = vunpack.c.l.b16 %v1702_v43  ;;  %v1706_v30 = vor.u32 %v1705_v12, %v1701_v34  ;;  %v1721_v1 = vrot.slane %v1719_v60, 5  ;;  %v1724_v20 = vshrl.u32 %v4131_v2, 16  ;;  %v4461_v43 = vld [vmem:[%s4866_s6 + $0x28] sm:$0xff]  ;;  %v4477_v60 = vld [vmem:[%s4866_s6 + $0x3c] sm:$0xff] }
  0x80   : > { %v1715_v56 = vrot.slane %v1713_v57, 4  ;;  %v1727_v5 = vshll.u32 %v4131_v2, 16  ;;  %v1733_v8 = vshll.u32 %v4132_v4, 16  ;;  %v1039_v10 = vrot.slane %v4870_v14, 5  ;;  %v4133_v14 = vld [vmem:[%s4866_s6 + $0x44] sm:$0xf] }
  0x81   : > { %v2023_v58 = vpack.c.b16 %v1994_v33, %v1993_v44  ;;  %v1707_v63 = vrot.slane %v1706_v30, 4  ;;  %v1737_v37 = vshrl.u32 %v4132_v4, 16  ;;  %v1726_v21 = vrot.slane %v1724_v20, 4  ;;  %v4134_v33 = vld [vmem:[%s4866_s6 + $0x48] sm:$0xf] }
  0x82   : > { %4079 = vmatmul.msk.bf16.gmra.mxu1 %vm635_vm4, %v4458_v32  ;;  %v1035_v32 = vrot.slane %v5092_v55, 5  ;;  %v1123_v55 = vunpack.c.l.b16 %v1033_v59  ;;  %v1729_v52 = vrot.slane %v1727_v5, 5  ;;  %v1735_v22 = vrot.slane %v1733_v8, 5 }
  0x83   : > { %v1712_v13 = vsel %vm4890_vm5, %v1707_v63, %v1711_v54  ;;  %v4096_v27 = vrot.slane %v4585_v24, 9  ;;  %v1042_v29 = vrot.slane %v4586_v7, 5  ;;  %v1739_v3 = vrot.slane %v1737_v37, 4  ;;  %v4462_v37 = vld [vmem:[%s4866_s6 + $0x30] sm:$0xff] }
  0x84   : > { %v1036_v48 = vsel %vm5111_vm8, %v1034_v53, %v1035_v32  ;;  %v1995_v16 = vunpack.c.l.b16 %v1712_v13  ;;  %v1730_v35 = vor.u32 %v1729_v52, %v1726_v21  ;;  %v1743_v15 = vshll.u32 %v4133_v14, 16 }
  0x85   : > { %v1124_v62 = vunpack.c.l.b16 %v1036_v48  ;;  %v1740_v11 = vor.u32 %v1739_v3, %v1735_v22  ;;  %v1747_v32 = vshrl.u32 %v4133_v14, 16  ;;  %v1045_v59 = vrot.slane %v4927_v19, 5 }
  0x86   : > { %v1731_v44 = vrot.slane %v1730_v35, 4  ;;  %v1757_v48 = vshrl.u32 %v4134_v33, 16  ;;  %v1048_v2 = vrot.slane %v4933_v28, 5 }
  0x87   : > { %4104 = vmatmul.msk.bf16.gmra.mxu2 %vm635_vm4, %v1150_v23  ;;  %v1716_v23 = vor.u32 %v1715_v56, %v1711_v54  ;;  %v1741_v50 = vrot.slane %v1740_v11, 4  ;;  %v1753_v56 = vshll.u32 %v4134_v33, 16  ;;  %v1749_v30 = vrot.slane %v1747_v32, 4 }
  0x88   : > { %v1736_v45 = vsel %vm4890_vm5, %v1731_v44, %v1735_v22  ;;  %v1759_v4 = vrot.slane %v1757_v48, 4  ;;  %v1052_v11 = vrot.slane %v4984_v46, 5  ;;  %v4097_v32 = vrot.slane %v4976_v36, 9  ;;  %v4138_v46 = vld [vmem:[%s4866_s6 + $0x58] sm:$0xf] }
  0x89   : > { %v1717_v0 = vrot.slane %v1716_v23, 4  ;;  %v1755_v63 = vrot.slane %v1753_v56, 5  ;;  %v1055_v56 = vrot.slane %v4987_v51, 5  ;;  %v1787_v36 = vshll.u32 %v4138_v46, 16 }
  0x8a   : > { %4227 = vmatmul.msk.bf16.gmra.mxu3 %vm635_vm4, %v4474_v18  ;;  %v1152_v18 = vpack.c.b16 %v1124_v62, %v1123_v55 }
  0x8b   : > { %v1722_v9 = vsel %vm4890_vm5, %v1717_v0, %v1721_v1  ;;  %v1044_v0 = vrot.slane %v1042_v29, 4  ;;  %v1047_v1 = vrot.slane %v1045_v59, 4 }
  0x8d   : > { %v1046_v8 = vsel %vm5111_vm8, %v1044_v0, %v1045_v59 }
  0x8e   : > { %4244 = vmatmul.msk.bf16.gmra.mxu0 %vm635_vm4, %v2022_v47  ;;  %v1996_v47 = vunpack.c.l.b16 %v1722_v9  ;;  %v1049_v9 = vsel %vm5111_vm8, %v1047_v1, %v1048_v2  ;;  %v1127_v21 = vunpack.c.l.b16 %v1046_v8 }
  0x8f   : > { %v1128_v52 = vunpack.c.l.b16 %v1049_v9  ;;  %v1791_v9 = vshrl.u32 %v4138_v46, 16 }
  0x90   : > { %v2024_v34 = vpack.c.b16 %v1996_v47, %v1995_v16 }
  0x92   : > { %4080 = vmatmul.msk.bf16.gmra.mxu1 %vm635_vm4, %v4459_v40  ;;  %v1041_v40 = vrot.slane %v1039_v10, 4 }
  0x94   : > { %v1043_v42 = vsel %vm5111_vm8, %v1041_v40, %v1042_v29  ;;  %v4137_v40 = vld [vmem:[%s4866_s6 + $0x54] sm:$0xf]  ;;  %v1154_v29 = vpack.c.b16 %v1128_v52, %v1127_v21  ;;  %v1058_v21 = vrot.slane %v5050_v31, 5 }
  0x95   : > { %v1126_v57 = vunpack.c.l.b16 %v1043_v42  ;;  %v1777_v35 = vshll.u32 %v4137_v40, 16 }
  0x97   : > { %4105 = vmatmul.msk.bf16.gmra.mxu2 %vm635_vm4, %v1151_v38  ;;  %v1040_v38 = vsel %vm5111_vm8, %v4096_v27, %v1039_v10  ;;  %v1760_v10 = vor.u32 %v1759_v4, %v1755_v63  ;;  %v4136_v27 = vld [vmem:[%s4866_s6 + $0x50] sm:$0xf] }
  0x98   : > { %v1125_v26 = vunpack.c.l.b16 %v1040_v38  ;;  %v1768_v14 = vshrl.u32 %v4136_v27, 16 }
  0x99   : > { %v1761_v22 = vrot.slane %v1760_v10, 4 }
  0x9a   : > { %4228 = vmatmul.msk.bf16.gmra.mxu3 %vm635_vm4, %v4475_v6  ;;  %v1745_v6 = vrot.slane %v1743_v15, 5  ;;  %v1153_v12 = vpack.c.b16 %v1126_v57, %v1125_v26  ;;  %v1781_v15 = vshrl.u32 %v4137_v40, 16  ;;  %v4478_v26 = vld [vmem:[%s4866_s6 + $0x44] sm:$0xff]  ;;  %v1770_v44 = vrot.slane %v1768_v14, 4 }
  0x9c   : > { %v1750_v19 = vor.u32 %v1749_v30, %v1745_v6  ;;  %v1053_v30 = vsel %vm5111_vm8, %v4097_v32, %v1052_v11  ;;  %v4464_v32 = vld [vmem:[%s4866_s6 + $0x44] sm:$0xff] }
  0x9d   : > { %v1129_v0 = vunpack.c.l.b16 %v1053_v30 }
  0x9e   : > { %4245 = vmatmul.msk.bf16.gmra.mxu0 %vm635_vm4, %v2023_v58  ;;  %v1746_v58 = vsel %vm4890_vm5, %v1741_v50, %v1745_v6  ;;  %v1751_v16 = vrot.slane %v1750_v19, 4  ;;  %v1779_v6 = vrot.slane %v1777_v35, 5  ;;  %v4139_v19 = vld [vmem:[%s4866_s6 + $0x5c] sm:$0xf]  ;;  %v1060_v35 = vrot.slane %v1058_v21, 4 }
  0x9f   : > { %v1998_v55 = vunpack.c.l.b16 %v1746_v58  ;;  %v1801_v52 = vshrl.u32 %v4139_v19, 16 }
  0xa0   : > { %v1756_v7 = vsel %vm4890_vm5, %v1751_v16, %v1755_v63  ;;  %v4463_v63 = vld [vmem:[%s4866_s6 + $0x3c] sm:$0xff] }
  0xa2   : > { %4081 = vmatmul.msk.bf16.gmra.mxu1 %vm635_vm4, %v4460_v61  ;;  %v1997_v61 = vunpack.c.l.b16 %v1736_v45  ;;  %v1783_v45 = vrot.slane %v1781_v15, 4  ;;  %v4140_v15 = vld [vmem:[%s4866_s6 + $0x60] sm:$0x1] }
  0xa4   : > { %v2025_v13 = vpack.c.b16 %v1998_v55, %v1997_v61  ;;  %v1784_v61 = vor.u32 %v1783_v45, %v1779_v6 }
  0xa6   : > { %v1785_v4 = vrot.slane %v1784_v61, 4  ;;  %v4142_v61 = vld [vmem:[%s4866_s6 + $0x68] sm:$0xf] }
  0xa7   : > { %4106 = vmatmul.msk.bf16.gmra.mxu2 %vm635_vm4, %v1152_v18  ;;  %v4135_v18 = vld [vmem:[%s4866_s6 + $0x4c] sm:$0x1] }
  0xa8   : > { %v1763_v28 = vshll.u32 %v4135_v18, 16  ;;  %v1789_v18 = vrot.slane %v1787_v36, 5 }
  0xa9   : > { %v5213_v49 = vpop.f32.mrf.mxu1 }
  0xaa   : > { %4229 = vmatmul.msk.bf16.gmra.mxu3 %vm635_vm4, %v4476_v17  ;;  %v1765_v24 = vrot.slane %v1763_v28, 5  ;;  %v1797_v28 = vshll.u32 %v4139_v19, 16  ;;  %v1790_v16 = vsel %vm4890_vm5, %v1785_v4, %v1789_v18  ;;  %v1821_v4 = vshll.u32 %v4142_v61, 16 }
  0xac   : > { %v1766_v38 = vsel %vm4890_vm5, %v1761_v22, %v1765_v24  ;;  %v1793_v24 = vrot.slane %v1791_v9, 4  ;;  %v1799_v14 = vrot.slane %v1797_v28, 5  ;;  %v4587_v9 = vld [vmem:[%s4866_s6 + $0x54] sm:$0xf]  ;;  %v1825_v28 = vshrl.u32 %v4142_v61, 16 }
  0xad   : > { %v2000_v57 = vunpack.c.l.b16 %v1766_v38  ;;  %v1061_v38 = vrot.slane %v5058_v41, 5  ;;  %v1807_v41 = vshll.u32 %v4140_v15, 16  ;;  %v4143_v15 = vld [vmem:[%s4866_s6 + $0x6c] sm:$0xf]  ;;  %v4144_v61 = vld [vmem:[%s4866_s6 + $0x70] sm:$0xf] }
  0xae   : > { %4246 = vmatmul.msk.bf16.gmra.mxu0 %vm635_vm4, %v2024_v34  ;;  %v1771_v34 = vshll.u32 %v4136_v27, 16  ;;  %v4479_v27 = vld [vmem:[%s4866_s6 + $0x50] sm:$0xff]  ;;  %v1794_v31 = vor.u32 %v1793_v24, %v1789_v18 }
  0xaf   : > { %v1809_v30 = vrot.slane %v1807_v41, 5 }
  0xb0   : > { %v1773_v50 = vrot.slane %v1771_v34, 5  ;;  %v1057_v34 = vrot.slane %v1055_v56, 4 }
  0xb1   : > { %v5224_v53 = vpop.f32.mrf.mxu1 }
  0xb2   : > { %4082 = vmatmul.msk.bf16.gmra.mxu1 %vm635_vm4, %v4461_v43  ;;  %v1999_v43 = vunpack.c.l.b16 %v1756_v7  ;;  %v1774_v48 = vor.u32 %v1773_v50, %v1770_v44  ;;  %v2002_v7 = vunpack.c.l.b16 %v1790_v16  ;;  %v1059_v44 = vsel %vm5111_vm8, %v1057_v34, %v1058_v21  ;;  %v4480_v16 = vld [vmem:[%s4866_s6 + $0x58] sm:$0xff] }
  0xb3   : > { %v5227_v54 = vpop.f32.mrf.mxu2  ;;  %v1062_v50 = vsel %vm5111_vm8, %v1060_v35, %v1061_v38  ;;  %v1131_v45 = vunpack.c.l.b16 %v1059_v44  ;;  %v4589_v35 = vld [vmem:[%s4866_s6 + $0x58] sm:$0xf] }
  0xb4   : > { %v2026_v59 = vpack.c.b16 %v2000_v57, %v1999_v43  ;;  %v1775_v2 = vrot.slane %v1774_v48, 4  ;;  %v1132_v46 = vunpack.c.l.b16 %v1062_v50  ;;  %v1068_v38 = vrot.slane %v4589_v35, 5 }
  0xb7   : > { %v5234_v23 = vpop.f32.mrf.mxu0  ;;  %4107 = vmatmul.msk.bf16.gmra.mxu2 %vm635_vm4, %v1153_v12  ;;  %v5238_v62 = vpop.f32.mrf.mxu3  ;;  %v1054_v12 = vrot.slane %v1052_v11, 4  ;;  %v1803_v11 = vrot.slane %v1801_v52, 4 }
  0xba   : > { %4230 = vmatmul.msk.bf16.gmra.mxu3 %vm635_vm4, %v4477_v60  ;;  %v1056_v60 = vsel %vm5111_vm8, %v1054_v12, %v1055_v56  ;;  %v1795_v12 = vrot.slane %v1794_v31, 4 }
  0xbb   : > { %v5243_v20 = vpop.f32.mrf.mxu2  ;;  %v5245_v5 = vpop.f32.mrf.mxu1  ;;  %v1130_v1 = vunpack.c.l.b16 %v1056_v60  ;;  %v4141_v60 = vld [vmem:[%s4866_s6 + $0x64] sm:$0xf] }
  0xbc   : > { %v1800_v36 = vsel %vm4890_vm5, %v1795_v12, %v1799_v14  ;;  %v1831_v12 = vshll.u32 %v4143_v15, 16 }
  0xbd   : > { %v1155_v10 = vpack.c.b16 %v1130_v1, %v1129_v0  ;;  %v1156_v0 = vpack.c.b16 %v1132_v46, %v1131_v45  ;;  %v1812_v1 = vshrl.u32 %v4141_v60, 16  ;;  %v4465_v46 = vld [vmem:[%s4866_s6 + $0x50] sm:$0xff] }
  0xbe   : > { %4247 = vmatmul.msk.bf16.gmra.mxu0 %vm635_vm4, %v2025_v13 }
  0xbf   : > { %v5253_v17 = vpop.f32.mrf.mxu0  ;;  %v5255_v47 = vpop.f32.mrf.mxu3  ;;  %v1814_v24 = vrot.slane %v1812_v1, 4 }
  0xc2   : > { %4083 = vmatmul.msk.bf16.gmra.mxu1 %vm635_vm4, %v4462_v37  ;;  %v1780_v37 = vsel %vm4890_vm5, %v1775_v2, %v1779_v6  ;;  %v1804_v6 = vor.u32 %v1803_v11, %v1799_v14  ;;  %v1815_v2 = vshll.u32 %v4141_v60, 16  ;;  %v1827_v11 = vrot.slane %v1825_v28, 4 }
  0xc3   : > { %v5262_v3 = vpop.f32.mrf.mxu1  ;;  %v2001_v40 = vunpack.c.l.b16 %v1780_v37  ;;  %v2003_v37 = vunpack.c.l.b16 %v1800_v36 }
  0xc4   : > { %v5266_v42 = vpop.f32.mrf.mxu2  ;;  %v1805_v48 = vrot.slane %v1804_v6, 4 }
  0xc6   : > { %v1810_v19 = vsel %vm4890_vm5, %v1805_v48, %v1809_v30 }
  0xc7   : > { %4108 = vmatmul.msk.bf16.gmra.mxu2 %vm635_vm4, %v1154_v29  ;;  %v2004_v21 = vunpack.c.l.b16 %v1810_v19 }
  0xc8   : > { %v5271_v33 = vpop.f32.mrf.mxu0 }
  0xc9   : > { %v5275_v58 = vpop.f32.mrf.mxu3 }
  0xca   : > { %4231 = vmatmul.msk.bf16.gmra.mxu3 %vm635_vm4, %v4478_v26  ;;  %v2027_v26 = vpack.c.b16 %v2002_v7, %v2001_v40  ;;  %v1823_v40 = vrot.slane %v1821_v4, 5  ;;  %v4588_v7 = vld [vmem:[%s4866_s6 + $0x50] sm:$0xf]  ;;  %v1835_v4 = vshrl.u32 %v4143_v15, 16  ;;  %v4481_v15 = vld [vmem:[%s4866_s6 + $0x64] sm:$0xff] }
  0xcb   : > { %v4098_v14 = vrot.slane %v4588_v7, 9  ;;  %v4591_v7 = vld [vmem:[%s4866_s6 + $0x60] sm:$0x1] }
  0xcc   : > { %v5283_v55 = vpop.f32.mrf.mxu2  ;;  %v5285_v51 = vpop.f32.mrf.mxu1 }
  0xce   : > { %4248 = vmatmul.msk.bf16.gmra.mxu0 %vm635_vm4, %v2026_v59 }
  0xd0   : > { %v5290_v13 = vpop.f32.mrf.mxu0 }
  0xd1   : > { %v5292_v8 = vpop.f32.mrf.mxu3 }
  0xd2   : > { %4084 = vmatmul.msk.bf16.gmra.mxu1 %vm635_vm4, %v4463_v63 }
  0xd4   : > { %v5300_v22 = vpop.f32.mrf.mxu1 }
  0xd7   : > { %4109 = vmatmul.msk.bf16.gmra.mxu2 %vm635_vm4, %v1155_v10  ;;  %v5304_v29 = vpop.f32.mrf.mxu2  ;;  %v1065_v10 = vrot.slane %v4587_v9, 5  ;;  %v1841_v9 = vshll.u32 %v4144_v61, 16 }
  0xd9   : > { %v1067_v34 = vrot.slane %v1065_v10, 4  ;;  %v1066_v6 = vsel %vm5111_vm8, %v4098_v14, %v1065_v10  ;;  %v1845_v10 = vshrl.u32 %v4144_v61, 16  ;;  %v1074_v14 = vrot.slane %v4591_v7, 5 }
  0xda   : > { %v5308_v43 = vpop.f32.mrf.mxu0  ;;  %4232 = vmatmul.msk.bf16.gmra.mxu3 %vm635_vm4, %v4479_v27  ;;  %v1817_v27 = vrot.slane %v1815_v2, 5  ;;  %v1133_v30 = vunpack.c.l.b16 %v1066_v6  ;;  %v1833_v2 = vrot.slane %v1831_v12, 5  ;;  %v1843_v35 = vrot.slane %v1841_v9, 5 }
  0xdb   : > { %v1069_v41 = vsel %vm5111_vm8, %v1067_v34, %v1068_v38 }
  0xdc   : > { %v5311_v57 = vpop.f32.mrf.mxu3  ;;  %v1818_v44 = vor.u32 %v1817_v27, %v1814_v24  ;;  %v1134_v60 = vunpack.c.l.b16 %v1069_v41  ;;  %v1837_v27 = vrot.slane %v1835_v4, 4  ;;  %v1070_v41 = vrot.slane %v1068_v38, 4 }
  0xde   : > { %4249 = vmatmul.msk.bf16.gmra.mxu0 %vm635_vm4, %v2027_v26  ;;  %v2028_v26 = vpack.c.b16 %v2004_v21, %v2003_v37  ;;  %v1157_v28 = vpack.c.b16 %v1134_v60, %v1133_v30  ;;  %v4590_v37 = vld [vmem:[%s4866_s6 + $0x5c] sm:$0xf] }
  0xdf   : > { %v5319_v56 = vpop.f32.mrf.mxu1  ;;  %v5321_v59 = vpop.f32.mrf.mxu2 }
  0xe2   : > { %4085 = vmatmul.msk.bf16.gmra.mxu1 %vm635_vm4, %v4464_v32  ;;  %v5328_v63 = vpop.f32.mrf.mxu0  ;;  %v1828_v32 = vor.u32 %v1827_v11, %v1823_v40  ;;  %v1847_v11 = vrot.slane %v1845_v10, 4 }
  0xe4   : > { %v5330_v18 = vpop.f32.mrf.mxu3  ;;  %v1829_v1 = vrot.slane %v1828_v32, 4  ;;  %v1848_v30 = vor.u32 %v1847_v11, %v1843_v35 }
  0xe6   : > { %v1834_v24 = vsel %vm4890_vm5, %v1829_v1, %v1833_v2 }
  0xe7   : > { %4110 = vmatmul.msk.bf16.gmra.mxu2 %vm635_vm4, %v1156_v0  ;;  %v5337_v52 = vpop.f32.mrf.mxu1  ;;  %v1819_v0 = vrot.slane %v1818_v44, 4  ;;  %v2006_v44 = vunpack.c.l.b16 %v1834_v24 }
  0xea   : > { %v5342_v31 = vpop.f32.mrf.mxu2  ;;  %4233 = vmatmul.msk.bf16.gmra.mxu3 %vm635_vm4, %v4480_v16  ;;  %v1071_v16 = vrot.slane %v4590_v37, 5  ;;  %v1849_v37 = vrot.slane %v1848_v30, 4 }
  0xeb   : > { %v5345_v50 = vpop.f32.mrf.mxu0 }
  0xec   : > { %v1073_v32 = vrot.slane %v1071_v16, 4  ;;  %v1072_v1 = vsel %vm5111_vm8, %v1070_v41, %v1071_v16  ;;  %v4147_v16 = vld [vmem:[%s4866_s6 + $0x7c] sm:$0xf] }
  0xed   : > { %v5351_v45 = vpop.f32.mrf.mxu3 }
  0xee   : > { %4250 = vmatmul.msk.bf16.gmra.mxu0 %vm635_vm4, %v2028_v26  ;;  %v1075_v38 = vsel %vm5111_vm8, %v1073_v32, %v1074_v14 }
  0xef   : > { %v920_v48 = vpop.f32.mrf.mxu1 }
  0xf0   : > { %v921_v36 = vadd.f32 %v920_v48, %v5234_v23  ;;  %v1824_v23 = vsel %vm4890_vm5, %v1819_v0, %v1823_v40  ;;  %v4145_v40 = vld [vmem:[%s4866_s6 + $0x74] sm:$0x1] }
  0xf1   : > { %v2005_v26 = vunpack.c.l.b16 %v1824_v23  ;;  %v1851_v60 = vshll.u32 %v4145_v40, 16  ;;  %v1865_v40 = vshll.u32 %v4147_v16, 16 }
  0xf2   : > { %v5357_v19 = vpop.f32.mrf.mxu2  ;;  %4086 = vmatmul.msk.bf16.gmra.mxu1 %vm635_vm4, %v4465_v46  ;;  %v1838_v46 = vor.u32 %v1837_v27, %v1833_v2  ;;  %v1135_v2 = vunpack.c.l.b16 %v1072_v1 }
  0xf3   : > { %v5361_v21 = vpop.f32.mrf.mxu0  ;;  %v2029_v61 = vpack.c.b16 %v2006_v44, %v2005_v26  ;;  %v1853_v23 = vrot.slane %v1851_v60, 5 }
  0xf4   : > { %v1839_v9 = vrot.slane %v1838_v46, 4  ;;  %v1869_v46 = vshrl.u32 %v4147_v16, 16 }
  0xf5   : > { %v5368_v34 = vpop.f32.mrf.mxu3  ;;  %v1854_v44 = vsel %vm4890_vm5, %v1849_v37, %v1853_v23  ;;  %v4594_v23 = vld [vmem:[%s4866_s6 + $0x6c] sm:$0xf] }
  0xf6   : > { %v1844_v26 = vsel %vm4890_vm5, %v1839_v9, %v1843_v35 }
  0xf7   : > { %4111 = vmatmul.msk.bf16.gmra.mxu2 %vm635_vm4, %v1157_v28  ;;  %v922_v6 = vpop.f32.mrf.mxu1  ;;  %v1136_v28 = vunpack.c.l.b16 %v1075_v38  ;;  %v4482_v38 = vld [vmem:[%s4866_s6 + $0x6c] sm:$0xff] }
  0xf8   : > { %v923_v12 = vadd.f32 %v922_v6, %v5253_v17  ;;  %v4466_v17 = vld [vmem:[%s4866_s6 + $0x58] sm:$0xff] }
  0xfa   : > { %v1225_v48 = vpop.f32.mrf.mxu2  ;;  %4234 = vmatmul.msk.bf16.gmra.mxu3 %vm635_vm4, %v4481_v15  ;;  %v1158_v15 = vpack.c.b16 %v1136_v28, %v1135_v2  ;;  %v4593_v2 = vld [vmem:[%s4866_s6 + $0x64] sm:$0xf] }
  0xfb   : > { %v1305_v0 = vadd.f32 %v1225_v48, %v921_v36  ;;  %v2097_v4 = vpop.f32.mrf.mxu0  ;;  %v4146_v36 = vld [vmem:[%s4866_s6 + $0x78] sm:$0xf]  ;;  %v4592_v48 = vld [vmem:[%s4866_s6 + $0x68] sm:$0xf]  ;;  %v4099_v28 = vrot.slane %v4593_v2, 9 }
  0xfc   : > { %v1856_v6 = vshrl.u32 %v4146_v36, 16  ;;  %v1859_v32 = vshll.u32 %v4146_v36, 16  ;;  %v1078_v30 = vrot.slane %v4592_v48, 5  ;;  %v4149_v48 = vld [vmem:[%s4866_s6 + $0x84] sm:$0xf] }
  0xfd   : > { %v1523_v10 = vpop.f32.mrf.mxu3 }
  0xfe   : > { %4251 = vmatmul.msk.bf16.gmra.mxu0 %vm635_vm4, %v2029_v61  ;;  %v1603_v24 = vadd.f32 %v1523_v10, %v1305_v0  ;;  %v2007_v61 = vunpack.c.l.b16 %v1844_v26  ;;  %v2008_v0 = vunpack.c.l.b16 %v1854_v44  ;;  %v1858_v1 = vrot.slane %v1856_v6, 4 }
  0xff   : > { %v925_v27 = vpop.f32.mrf.mxu1  ;;  %v1861_v9 = vrot.slane %v1859_v32, 5  ;;  %v1871_v10 = vrot.slane %v1869_v46, 4  ;;  %v1080_v37 = vrot.slane %v1078_v30, 4  ;;  %v4467_v46 = vld [vmem:[%s4866_s6 + $0x64] sm:$0xff] }
 0x100   : > { %v926_v7 = vadd.f32 %v925_v27, %v5271_v33  ;;  %v5384_v11 = vadd.f32 %v2097_v4, %v1603_v24  ;;  %v1081_v24 = vrot.slane %v4594_v23, 5  ;;  %v4148_v27 = vld [vmem:[%s4866_s6 + $0x80] sm:$0xf] }
 0x101   : > { %v1862_v26 = vor.u32 %v1861_v9, %v1858_v1  ;;  %v1875_v32 = vshll.u32 %v4148_v27, 16  ;;  %v1889_v9 = vshrl.u32 %v4149_v48, 16 }
 0x102   : > { %v1227_v14 = vpop.f32.mrf.mxu2  ;;  %4087 = vmatmul.msk.bf16.gmra.mxu1 %vm635_vm4, %v4466_v17  ;;  %v1082_v6 = vsel %vm5111_vm8, %v1080_v37, %v1081_v24 }
 0x103   : > { %v1306_v41 = vadd.f32 %v1227_v14, %v923_v12  ;;  %v2099_v33 = vpop.f32.mrf.mxu0  ;;  %v1867_v12 = vrot.slane %v1865_v40, 5  ;;  %v2030_v14 = vpack.c.b16 %v2008_v0, %v2007_v61  ;;  %v1138_v61 = vunpack.c.l.b16 %v1082_v6  ;;  %v4150_v6 = vld [vmem:[%s4866_s6 + $0x88] sm:$0x1] }
 0x104   : > { %v1863_v0 = vrot.slane %v1862_v26, 4 }
 0x105   : > { %v1525_v60 = vpop.f32.mrf.mxu3 }
 0x106   : > { %v1604_v35 = vadd.f32 %v1525_v60, %v1306_v41  ;;  %v1872_v41 = vor.u32 %v1871_v10, %v1867_v12 }
 0x107   : > { %4112 = vmatmul.msk.bf16.gmra.mxu2 %vm635_vm4, %v1158_v15  ;;  %v927_v4 = vpop.f32.mrf.mxu1 }
 0x108   : > { %v928_v17 = vadd.f32 %v927_v4, %v5290_v13  ;;  %v5398_v16 = vadd.f32 %v2099_v33, %v1604_v35  ;;  %v1079_v13 = vsel %vm5111_vm8, %v4099_v28, %v1078_v30  ;;  %v1873_v1 = vrot.slane %v1872_v41, 4 }
 0x109   : > { %v1137_v35 = vunpack.c.l.b16 %v1079_v13  ;;  %v1877_v30 = vrot.slane %v1875_v32, 5  ;;  %v1885_v4 = vshll.u32 %v4149_v48, 16  ;;  %v4596_v48 = vld [vmem:[%s4866_s6 + $0x74] sm:$0x1] }
 0x10a   : > { %v1230_v36 = vpop.f32.mrf.mxu2  ;;  %4235 = vmatmul.msk.bf16.gmra.mxu3 %vm635_vm4, %v4482_v38  ;;  %v1879_v38 = vshrl.u32 %v4148_v27, 16  ;;  %v4595_v27 = vld [vmem:[%s4866_s6 + $0x70] sm:$0xf] }
 0x10b   : > { %v1307_v15 = vadd.f32 %v1230_v36, %v926_v7  ;;  %v2102_v44 = vpop.f32.mrf.mxu0  ;;  %v1159_v37 = vpack.c.b16 %v1138_v61, %v1137_v35  ;;  %v1878_v36 = vsel %vm4890_vm5, %v1873_v1, %v1877_v30  ;;  %v1887_v26 = vrot.slane %v1885_v4, 5 }
 0x10c   : > { %v1895_v1 = vshll.u32 %v4150_v6, 16  ;;  %v4152_v6 = vld [vmem:[%s4866_s6 + $0x90] sm:$0xf] }
 0x10d   : > { %v1528_v40 = vpop.f32.mrf.mxu3 }
 0x10e   : > { %4252 = vmatmul.msk.bf16.gmra.mxu0 %vm635_vm4, %v2030_v14  ;;  %v1605_v33 = vadd.f32 %v1528_v40, %v1307_v15  ;;  %v1084_v14 = vrot.slane %v4595_v27, 5  ;;  %v1881_v15 = vrot.slane %v1879_v38, 4  ;;  %v2010_v40 = vunpack.c.l.b16 %v1878_v36  ;;  %v4468_v27 = vld [vmem:[%s4866_s6 + $0x6c] sm:$0xff] }
 0x10f   : > { %v930_v60 = vpop.f32.mrf.mxu1 }
 0x110   : > { %v931_v7 = vadd.f32 %v930_v60, %v5308_v43  ;;  %v5409_v10 = vadd.f32 %v2102_v44, %v1605_v33  ;;  %v1868_v43 = vsel %vm4890_vm5, %v1863_v0, %v1867_v12  ;;  %v1891_v44 = vrot.slane %v1889_v9, 4 }
 0x111   : > { %v2009_v32 = vunpack.c.l.b16 %v1868_v43  ;;  %v1087_v33 = vrot.slane %v4596_v48, 5  ;;  %v1083_v60 = vrot.slane %v1081_v24, 4  ;;  %v1086_v35 = vrot.slane %v1084_v14, 4 }
 0x112   : > { %v1232_v2 = vpop.f32.mrf.mxu2  ;;  %4088 = vmatmul.msk.bf16.gmra.mxu1 %vm635_vm4, %v4467_v46  ;;  %v1882_v61 = vor.u32 %v1881_v15, %v1877_v30  ;;  %v1892_v0 = vor.u32 %v1891_v44, %v1887_v26  ;;  %v1897_v43 = vrot.slane %v1895_v1, 5 }
 0x113   : > { %v1308_v28 = vadd.f32 %v1232_v2, %v928_v17  ;;  %v2104_v23 = vpop.f32.mrf.mxu0  ;;  %v4483_v17 = vld [vmem:[%s4866_s6 + $0x78] sm:$0xff]  ;;  %v2031_v9 = vpack.c.b16 %v2010_v40, %v2009_v32 }
 0x114   : > { %v1883_v24 = vrot.slane %v1882_v61, 4  ;;  %v1893_v30 = vrot.slane %v1892_v0, 4 }
 0x115   : > { %v1530_v13 = vpop.f32.mrf.mxu3 }
 0x116   : > { %v1606_v41 = vadd.f32 %v1530_v13, %v1308_v28 }
 0x117   : > { %4113 = vmatmul.msk.bf16.gmra.mxu2 %vm635_vm4, %v1159_v37  ;;  %v932_v46 = vpop.f32.mrf.mxu1  ;;  %v1085_v37 = vsel %vm5111_vm8, %v1083_v60, %v1084_v14  ;;  %v1888_v14 = vsel %vm4890_vm5, %v1883_v24, %v1887_v26  ;;  %v1913_v60 = vshrl.u32 %v4152_v6, 16 }
 0x118   : > { %v933_v12 = vadd.f32 %v932_v46, %v5328_v63  ;;  %v5422_v4 = vadd.f32 %v2104_v23, %v1606_v41  ;;  %v1088_v63 = vsel %vm5111_vm8, %v1086_v35, %v1087_v33  ;;  %v1139_v44 = vunpack.c.l.b16 %v1085_v37 }
 0x119   : > { %v1140_v13 = vunpack.c.l.b16 %v1088_v63  ;;  %v1909_v33 = vshll.u32 %v4152_v6, 16  ;;  %v2011_v1 = vunpack.c.l.b16 %v1888_v14  ;;  %v1915_v63 = vrot.slane %v1913_v60, 4 }
 0x11a   : > { %v1235_v38 = vpop.f32.mrf.mxu2  ;;  %4236 = vmatmul.msk.bf16.gmra.mxu3 %vm635_vm4, %v4483_v17  ;;  %v1898_v17 = vsel %vm4890_vm5, %v1893_v30, %v1897_v43  ;;  %v4484_v30 = vld [vmem:[%s4866_s6 + $0x80] sm:$0xff] }
 0x11b   : > { %v1309_v2 = vadd.f32 %v1235_v38, %v931_v7  ;;  %v2107_v28 = vpop.f32.mrf.mxu0  ;;  %v4151_v7 = vld [vmem:[%s4866_s6 + $0x8c] sm:$0xf]  ;;  %v1160_v61 = vpack.c.b16 %v1140_v13, %v1139_v44  ;;  %v2012_v38 = vunpack.c.l.b16 %v1898_v17  ;;  %v1911_v37 = vrot.slane %v1909_v33, 5  ;;  %v4153_v13 = vld [vmem:[%s4866_s6 + $0x94] sm:$0xf] }
 0x11c   : > { %v1900_v46 = vshrl.u32 %v4151_v7, 16  ;;  %v1903_v48 = vshll.u32 %v4151_v7, 16  ;;  %v1919_v60 = vshll.u32 %v4153_v13, 16 }
 0x11d   : > { %v1533_v36 = vpop.f32.mrf.mxu3  ;;  %v2032_v7 = vpack.c.b16 %v2012_v38, %v2011_v1  ;;  %v1916_v17 = vor.u32 %v1915_v63, %v1911_v37 }
 0x11e   : > { %4253 = vmatmul.msk.bf16.gmra.mxu0 %vm635_vm4, %v2031_v9  ;;  %v1607_v23 = vadd.f32 %v1533_v36, %v1309_v2  ;;  %v1902_v2 = vrot.slane %v1900_v46, 4 }
 0x11f   : > { %v935_v15 = vpop.f32.mrf.mxu1 }
 0x120   : > { %v936_v41 = vadd.f32 %v935_v15, %v5345_v50  ;;  %v5438_v32 = vadd.f32 %v2107_v28, %v1607_v23  ;;  %v4597_v50 = vld [vmem:[%s4866_s6 + $0x7c] sm:$0xf]  ;;  %v1905_v28 = vrot.slane %v1903_v48, 5  ;;  %v4599_v23 = vld [vmem:[%s4866_s6 + $0x80] sm:$0xf] }
 0x121   : > { %v1091_v0 = vrot.slane %v4597_v50, 5  ;;  %v1094_v15 = vrot.slane %v4599_v23, 5 }
 0x122   : > { %v1237_v40 = vpop.f32.mrf.mxu2  ;;  %4089 = vmatmul.msk.bf16.gmra.mxu1 %vm635_vm4, %v4468_v27  ;;  %v1906_v14 = vor.u32 %v1905_v28, %v1902_v2  ;;  %v1917_v2 = vrot.slane %v1916_v17, 4  ;;  %v4154_v28 = vld [vmem:[%s4866_s6 + $0x98] sm:$0xf] }
 0x123   : > { %v1310_v35 = vadd.f32 %v1237_v40, %v933_v12  ;;  %v2109_v26 = vpop.f32.mrf.mxu0  ;;  %v4598_v12 = vld [vmem:[%s4866_s6 + $0x78] sm:$0xf]  ;;  %v1093_v27 = vrot.slane %v1091_v0, 4  ;;  %v1933_v23 = vshrl.u32 %v4154_v28, 16 }
 0x124   : > { %v4100_v36 = vrot.slane %v4598_v12, 9  ;;  %v1907_v38 = vrot.slane %v1906_v14, 4 }
 0x125   : > { %v1535_v9 = vpop.f32.mrf.mxu3  ;;  %v1095_v33 = vsel %vm5111_vm8, %v1093_v27, %v1094_v15  ;;  %v1929_v27 = vshll.u32 %v4154_v28, 16 }
 0x126   : > { %v1608_v24 = vadd.f32 %v1535_v9, %v1310_v35  ;;  %v1092_v48 = vsel %vm5111_vm8, %v4100_v36, %v1091_v0  ;;  %v1142_v1 = vunpack.c.l.b16 %v1095_v33 }
 0x127   : > { %4114 = vmatmul.msk.bf16.gmra.mxu2 %vm635_vm4, %v1160_v61  ;;  %v937_v43 = vpop.f32.mrf.mxu1  ;;  %v4469_v61 = vld [vmem:[%s4866_s6 + $0x78] sm:$0xff]  ;;  %v1141_v50 = vunpack.c.l.b16 %v1092_v48 }
 0x128   : > { %v938_v44 = vadd.f32 %v937_v43, %v5361_v21  ;;  %v5448_v40 = vadd.f32 %v2109_v26, %v1608_v24  ;;  %v1923_v43 = vshrl.u32 %v4153_v13, 16 }
 0x129   : > { %v1161_v24 = vpack.c.b16 %v1142_v1, %v1141_v50 }
 0x12a   : > { %v1240_v6 = vpop.f32.mrf.mxu2  ;;  %4237 = vmatmul.msk.bf16.gmra.mxu3 %vm635_vm4, %v4484_v30  ;;  %v1912_v30 = vsel %vm4890_vm5, %v1907_v38, %v1911_v37  ;;  %v1925_v33 = vrot.slane %v1923_v43, 4  ;;  %v4485_v37 = vld [vmem:[%s4866_s6 + $0x8c] sm:$0xff]  ;;  %v4155_v38 = vld [vmem:[%s4866_s6 + $0x9c] sm:$0x1] }
 0x12b   : > { %v1311_v46 = vadd.f32 %v1240_v6, %v936_v41  ;;  %v2112_v35 = vpop.f32.mrf.mxu0  ;;  %v1921_v41 = vrot.slane %v1919_v60, 5  ;;  %v4600_v6 = vld [vmem:[%s4866_s6 + $0x84] sm:$0xf] }
 0x12c   : > { %v1097_v14 = vrot.slane %v4600_v6, 5 }
 0x12d   : > { %v1538_v21 = vpop.f32.mrf.mxu3  ;;  %v1922_v36 = vsel %vm4890_vm5, %v1917_v2, %v1921_v41 }
 0x12e   : > { %4254 = vmatmul.msk.bf16.gmra.mxu0 %vm635_vm4, %v2032_v7  ;;  %v1609_v26 = vadd.f32 %v1538_v21, %v1311_v46  ;;  %v2013_v46 = vunpack.c.l.b16 %v1912_v30  ;;  %v2014_v48 = vunpack.c.l.b16 %v1922_v36  ;;  %v1935_v21 = vrot.slane %v1933_v23, 4 }
 0x12f   : > { %v940_v9 = vpop.f32.mrf.mxu1  ;;  %v1099_v1 = vrot.slane %v1097_v14, 4 }
 0x130   : > { %v5458_v63 = vadd.f32 %v2112_v35, %v1609_v26  ;;  %v1931_v35 = vrot.slane %v1929_v27, 5  ;;  %v941_v26 = vadd.f32 %v940_v9, %v5213_v49  ;;  %v2033_v2 = vpack.c.b16 %v2014_v48, %v2013_v46  ;;  %v4470_v9 = vld [vmem:[%s4866_s6 + $0x80] sm:$0xff] }
 0x132   : > { %v1242_v0 = vpop.f32.mrf.mxu2  ;;  %4090 = vmatmul.msk.bf16.gmra.mxu1 %vm635_vm4, %v4469_v61  ;;  %v4601_v61 = vld [vmem:[%s4866_s6 + $0x88] sm:$0x1]  ;;  %v1936_v43 = vor.u32 %v1935_v21, %v1931_v35 }
 0x133   : > { %v1312_v12 = vadd.f32 %v1242_v0, %v938_v44  ;;  %v2114_v7 = vpop.f32.mrf.mxu0  ;;  %v1096_v44 = vrot.slane %v1094_v15, 4  ;;  %v1100_v50 = vrot.slane %v4601_v61, 5  ;;  %v1926_v0 = vor.u32 %v1925_v33, %v1921_v41  ;;  %v4156_v41 = vld [vmem:[%s4866_s6 + $0xa0] sm:$0xf]  ;;  %v4157_v33 = vld [vmem:[%s4866_s6 + $0xa4] sm:$0xf] }
 0x134   : > { %v1937_v48 = vrot.slane %v1936_v43, 4 }
 0x135   : > { %v1540_v17 = vpop.f32.mrf.mxu3  ;;  %v1098_v15 = vsel %vm5111_vm8, %v1096_v44, %v1097_v14  ;;  %v1101_v27 = vsel %vm5111_vm8, %v1099_v1, %v1100_v50  ;;  %v1927_v6 = vrot.slane %v1926_v0, 4  ;;  %v1947_v44 = vshll.u32 %v4156_v41, 16 }
 0x136   : > { %v1610_v60 = vadd.f32 %v1540_v17, %v1312_v12  ;;  %v1939_v12 = vshll.u32 %v4155_v38, 16  ;;  %v1143_v23 = vunpack.c.l.b16 %v1098_v15  ;;  %v1144_v46 = vunpack.c.l.b16 %v1101_v27 }
 0x137   : > { %4115 = vmatmul.msk.bf16.gmra.mxu2 %vm635_vm4, %v1161_v24  ;;  %v942_v13 = vpop.f32.mrf.mxu1  ;;  %v1932_v50 = vsel %vm4890_vm5, %v1927_v6, %v1931_v35  ;;  %v1953_v1 = vshll.u32 %v4157_v33, 16  ;;  %v1957_v38 = vshrl.u32 %v4157_v33, 16  ;;  %v1949_v15 = vrot.slane %v1947_v44, 5  ;;  %v4603_v6 = vld [vmem:[%s4866_s6 + $0x8c] sm:$0xf] }
 0x138   : > { %v5471_v30 = vadd.f32 %v2114_v7, %v1610_v60  ;;  %v1941_v14 = vrot.slane %v1939_v12, 5  ;;  %v943_v60 = vadd.f32 %v942_v13, %v5224_v53  ;;  %v4602_v53 = vld [vmem:[%s4866_s6 + $0x90] sm:$0xf]  ;;  %v2015_v12 = vunpack.c.l.b16 %v1932_v50 }
 0x139   : > { %v1104_v13 = vrot.slane %v4602_v53, 5  ;;  %v1955_v35 = vrot.slane %v1953_v1, 5  ;;  %v1959_v27 = vrot.slane %v1957_v38, 4  ;;  %v4471_v53 = vld [vmem:[%s4866_s6 + $0x8c] sm:$0xff] }
 0x13a   : > { %v1245_v28 = vpop.f32.mrf.mxu2  ;;  %4238 = vmatmul.msk.bf16.gmra.mxu3 %vm635_vm4, %v4485_v37  ;;  %v1944_v37 = vshrl.u32 %v4156_v41, 16  ;;  %v4101_v41 = vrot.slane %v4603_v6, 9 }
 0x13b   : > { %v1313_v24 = vadd.f32 %v1245_v28, %v941_v26  ;;  %v2117_v36 = vpop.f32.mrf.mxu0  ;;  %v1942_v28 = vsel %vm4890_vm5, %v1937_v48, %v1941_v14  ;;  %v4158_v14 = vld [vmem:[%s4866_s6 + $0xa8] sm:$0xf]  ;;  %v1960_v44 = vor.u32 %v1959_v27, %v1955_v35  ;;  %v4605_v27 = vld [vmem:[%s4866_s6 + $0x18] sm:$0xf] }
 0x13d   : > { %v1543_v49 = vpop.f32.mrf.mxu3 }
 0x13e   : > { %4255 = vmatmul.msk.bf16.gmra.mxu0 %vm635_vm4, %v2033_v2  ;;  %v1611_v7 = vadd.f32 %v1543_v49, %v1313_v24  ;;  %v1162_v2 = vpack.c.b16 %v1144_v46, %v1143_v23  ;;  %v1946_v24 = vrot.slane %v1944_v37, 4  ;;  %v4604_v46 = vld [vmem:[%s4866_s6 + $0x94] sm:$0xf] }
 0x13f   : > { %v945_v17 = vpop.f32.mrf.mxu1  ;;  %v1107_v48 = vrot.slane %v4604_v46, 5 }
 0x140   : > { %v5483_v21 = vadd.f32 %v2117_v36, %v1611_v7  ;;  %v2016_v36 = vunpack.c.l.b16 %v1942_v28  ;;  %v1106_v7 = vrot.slane %v1104_v13, 4  ;;  %v946_v33 = vadd.f32 %v945_v17, %v5245_v5 }
 0x142   : > { %v1247_v61 = vpop.f32.mrf.mxu2  ;;  %4091 = vmatmul.msk.bf16.gmra.mxu1 %vm635_vm4, %v4470_v9  ;;  %v4486_v9 = vld [vmem:[%s4866_s6 + $0x94] sm:$0xff]  ;;  %v2034_v1 = vpack.c.b16 %v2016_v36, %v2015_v12 }
 0x143   : > { %v1314_v26 = vadd.f32 %v1247_v61, %v943_v60  ;;  %v2119_v0 = vpop.f32.mrf.mxu0  ;;  %v1950_v60 = vor.u32 %v1949_v15, %v1946_v24  ;;  %v1963_v61 = vshll.u32 %v4158_v14, 16 }
 0x145   : > { %v1545_v43 = vpop.f32.mrf.mxu3  ;;  %v1951_v5 = vrot.slane %v1950_v60, 4 }
 0x146   : > { %v1612_v49 = vadd.f32 %v1545_v43, %v1314_v26  ;;  %v1105_v26 = vsel %vm5111_vm8, %v4101_v41, %v1104_v13  ;;  %v5505_v43 = vrot.slane %v1963_v61, 5  ;;  %v4159_v13 = vld [vmem:[%s4866_s6 + $0xac] sm:$0xf] }
 0x147   : > { %4116 = vmatmul.msk.bf16.gmra.mxu2 %vm635_vm4, %v1162_v2  ;;  %v947_v23 = vpop.f32.mrf.mxu1  ;;  %v1108_v2 = vsel %vm5111_vm8, %v1106_v7, %v1107_v48  ;;  %v1145_v24 = vunpack.c.l.b16 %v1105_v26  ;;  %v1956_v46 = vsel %vm4890_vm5, %v1951_v5, %v1955_v35  ;;  %v1977_v61 = vshrl.u32 %v4159_v13, 16  ;;  %v4609_v35 = vld [vmem:[%s4866_s6 + $0x9c] sm:$0x1] }
 0x148   : > { %v5497_v50 = vadd.f32 %v2119_v0, %v1612_v49  ;;  %v1146_v15 = vunpack.c.l.b16 %v1108_v2  ;;  %v1961_v0 = vrot.slane %v1960_v44, 4  ;;  %v2219_v49 = vrot.slane %v4605_v27, 5 }
 0x149   : > { %v1973_v44 = vshll.u32 %v4159_v13, 16  ;;  %v1113_v5 = vrot.slane %v4609_v35, 5 }
 0x14a   : > { %v1250_v37 = vpop.f32.mrf.mxu2  ;;  %4239 = vmatmul.msk.bf16.gmra.mxu3 %vm635_vm4, %v4486_v9  ;;  %v948_v9 = vadd.f32 %v947_v23, %v5262_v3  ;;  %v1163_v7 = vpack.c.b16 %v1146_v15, %v1145_v24  ;;  %v4606_v3 = vld [vmem:[%s4866_s6 + $0x14] sm:$0xf]  ;;  %v2017_v24 = vunpack.c.l.b16 %v1956_v46 }
 0x14b   : > { %v1315_v38 = vadd.f32 %v1250_v37, %v946_v33  ;;  %v2122_v28 = vpop.f32.mrf.mxu0  ;;  %v1966_v33 = vsel %vm4890_vm5, %v1961_v0, %v5505_v43  ;;  %v1967_v37 = vshrl.u32 %v4158_v14, 16  ;;  %v4259_v23 = vrot.slane %v4606_v3, 9  ;;  %v4487_v0 = vld [vmem:[%s4866_s6 + $0xa0] sm:$0xff] }
 0x14c   : > { %v2018_v15 = vunpack.c.l.b16 %v1966_v33  ;;  %v5528_v13 = vrot.slane %v1973_v44, 5  ;;  %v4160_v33 = vld [vmem:[%s4866_s6 + $0xb0] sm:$0x1] }
 0x14d   : > { %v1548_v17 = vpop.f32.mrf.mxu3  ;;  %v1969_v27 = vrot.slane %v1967_v37, 4 }
 0x14e   : > { %4256 = vmatmul.msk.bf16.gmra.mxu0 %vm635_vm4, %v2034_v1  ;;  %v1613_v12 = vadd.f32 %v1548_v17, %v1315_v38  ;;  %v2221_v1 = vrot.slane %v2219_v49, 4  ;;  %v5521_v38 = vld [vmem:[%s4866_s6 + $0x1c] sm:$0xf]  ;;  %v2035_v37 = vpack.c.b16 %v2018_v15, %v2017_v24 }
 0x14f   : > { %v950_v36 = vpop.f32.mrf.mxu1  ;;  %v6410_v26 = vrot.slane %v5521_v38, 5 }
 0x150   : > { %v5511_v6 = vadd.f32 %v2122_v28, %v1613_v12  ;;  %v4608_v28 = vld [vmem:[%s4866_s6 + $0x98] sm:$0xf] }
 0x151   : > { %v1110_v17 = vrot.slane %v4608_v28, 5  ;;  %v2220_v28 = vsel %vm5111_vm8, %v4259_v23, %v2219_v49  ;;  %v2223_v46 = vsel %vm5111_vm8, %v2221_v1, %v6410_v26  ;;  %v1970_v49 = vor.u32 %v1969_v27, %v5505_v43 }
 0x152   : > { %6417 = vst [vmem:[#allocation5_spill] sm:$0xff] %v5511_v6  ;;  %v1252_v41 = vpop.f32.mrf.mxu2  ;;  %4092 = vmatmul.msk.bf16.gmra.mxu1 %vm635_vm4, %v4471_v53  ;;  %v2324_v35 = vunpack.c.l.b16 %v2223_v46  ;;  %v4472_v46 = vld [vmem:[%s4866_s6 + $0x94] sm:$0xff] }
 0x153   : > { %v1316_v60 = vadd.f32 %v1252_v41, %v948_v9  ;;  %v2124_v2 = vpop.f32.mrf.mxu0  ;;  %v1979_v9 = vrot.slane %v1977_v61, 4  ;;  %v1109_v41 = vrot.slane %v1107_v48, 4  ;;  %v1112_v3 = vrot.slane %v1110_v17, 4  ;;  %v5539_v61 = vld [vmem:[%s4866_s6 + $0x28] sm:$0xf] }
 0x154   : > { %v2845_v43 = vshll.u32 %v5539_v61, 16 }
 0x155   : > { %v1550_v53 = vpop.f32.mrf.mxu3  ;;  %v1114_v24 = vsel %vm5111_vm8, %v1112_v3, %v1113_v5  ;;  %v1980_v15 = vor.u32 %v1979_v9, %v5528_v13  ;;  %v1971_v9 = vrot.slane %v1970_v49, 4  ;;  %v4610_v49 = vld [vmem:[%s4866_s6 + $0x24] sm:$0x1] }
 0x156   : > { %v1614_v14 = vadd.f32 %v1550_v53, %v1316_v60  ;;  %v2323_v60 = vunpack.c.l.b16 %v2220_v28  ;;  %v5546_v53 = vld [vmem:[%s4866_s6 + $0x2c] sm:$0xf]  ;;  %v1983_v28 = vshll.u32 %v4160_v33, 16  ;;  %v1148_v5 = vunpack.c.l.b16 %v1114_v24 }
 0x157   : > { %4117 = vmatmul.msk.bf16.gmra.mxu2 %vm635_vm4, %v1163_v7  ;;  %v952_v12 = vpop.f32.mrf.mxu1  ;;  %v951_v7 = vadd.f32 %v950_v36, %v5285_v51  ;;  %v1111_v36 = vsel %vm5111_vm8, %v1109_v41, %v1110_v17  ;;  %v1981_v3 = vrot.slane %v1980_v15, 4  ;;  %v2228_v24 = vrot.slane %v4610_v49, 5 }
 0x158   : > { %v5543_v23 = vpack.c.b16 %v2324_v35, %v2323_v60  ;;  %v5548_v1 = vadd.f32 %v2124_v2, %v1614_v14  ;;  %v2855_v2 = vshrl.u32 %v5546_v53, 16  ;;  %v1147_v41 = vunpack.c.l.b16 %v1111_v36  ;;  %v5566_v36 = vld [vmem:[%s4866_s6 + $0x30] sm:$0xf] }
 0x159   : > { %v1985_v33 = vrot.slane %v1983_v28, 5  ;;  %v953_v60 = vadd.f32 %v952_v12, %v5300_v22  ;;  %v1976_v22 = vsel %vm4890_vm5, %v1971_v9, %v5528_v13 }
 0x15a   : > { %v1255_v44 = vpop.f32.mrf.mxu2  ;;  %4240 = vmatmul.msk.bf16.gmra.mxu3 %vm635_vm4, %v4487_v0  ;;  %6418 = vst [vmem:[#allocation6_spill] sm:$0xff] %v5548_v1  ;;  %v2842_v0 = vshrl.u32 %v5539_v61, 16  ;;  %v1164_v6 = vpack.c.b16 %v1148_v5, %v1147_v41  ;;  %v4488_v5 = vld [vmem:[%s4866_s6 + $0xa8] sm:$0xff] }
 0x15b   : > { %v1317_v48 = vadd.f32 %v1255_v44, %v951_v7  ;;  %v2127_v51 = vpop.f32.mrf.mxu0  ;;  %v2851_v7 = vshll.u32 %v5546_v53, 16  ;;  %v2847_v44 = vrot.slane %v2845_v43, 5  ;;  %v1986_v12 = vsel %vm4890_vm5, %v1981_v3, %v1985_v33 }
 0x15c   : > { %v2844_v35 = vrot.slane %v2842_v0, 4  ;;  %v2020_v13 = vunpack.c.l.b16 %v1986_v12 }
 0x15d   : > { %v1553_v27 = vpop.f32.mrf.mxu3 }
 0x15e   : > { %4257 = vmatmul.msk.bf16.gmra.mxu0 %vm635_vm4, %v2035_v37  ;;  %v1615_v14 = vadd.f32 %v1553_v27, %v1317_v48  ;;  %v2853_v37 = vrot.slane %v2851_v7, 5  ;;  %v2857_v48 = vrot.slane %v2855_v2, 4  ;;  %v2848_v0 = vor.u32 %v2847_v44, %v2844_v35 }
 0x15f   : > { %v955_v17 = vpop.f32.mrf.mxu1  ;;  %v6419_v7 = vrot.slane %v5521_v38, 5 }
 0x160   : > { %v5562_v26 = vadd.f32 %v2127_v51, %v1615_v14  ;;  %v4611_v51 = vld [vmem:[%s4866_s6 + $0x20] sm:$0xf]  ;;  %v956_v35 = vadd.f32 %v955_v17, %v5319_v56  ;;  %v2849_v44 = vrot.slane %v2848_v0, 4 }
 0x161   : > { %v2225_v28 = vrot.slane %v4611_v51, 5  ;;  %v2224_v2 = vrot.slane %v6419_v7, 4 }
 0x162   : > { %v1257_v1 = vpop.f32.mrf.mxu2  ;;  %4093 = vmatmul.msk.bf16.gmra.mxu1 %vm635_vm4, %v4472_v46  ;;  %v2858_v46 = vor.u32 %v2857_v48, %v2853_v37  ;;  %v2854_v56 = vsel %vm4890_vm5, %v2849_v44, %v2853_v37  ;;  %v4489_v44 = vld [vmem:[%s4866_s6 + $0x28] sm:$0xff] }
 0x163   : > { %v1318_v27 = vadd.f32 %v1257_v1, %v953_v60  ;;  %v2129_v15 = vpop.f32.mrf.mxu0  ;;  %v2861_v1 = vshll.u32 %v5566_v36, 16  ;;  %v2227_v14 = vrot.slane %v2225_v28, 4  ;;  %v2019_v60 = vunpack.c.l.b16 %v1976_v22 }
 0x164   : > { %v2226_v3 = vsel %vm5111_vm8, %v2224_v2, %v2225_v28 }
 0x165   : > { %v1555_v43 = vpop.f32.mrf.mxu3  ;;  %v2229_v33 = vsel %vm5111_vm8, %v2227_v14, %v2228_v24  ;;  %v2325_v38 = vunpack.c.l.b16 %v2226_v3  ;;  %v2863_v51 = vrot.slane %v2861_v1, 5  ;;  %v2036_v22 = vpack.c.b16 %v2020_v13, %v2019_v60  ;;  %v5592_v24 = vld [vmem:[%s4866_s6 + $0x34] sm:$0xf] }
 0x166   : > { %v1616_v41 = vadd.f32 %v1555_v43, %v1318_v27  ;;  %v2326_v48 = vunpack.c.l.b16 %v2229_v33  ;;  %v2859_v27 = vrot.slane %v2858_v46, 4  ;;  %v2865_v1 = vshrl.u32 %v5566_v36, 16 }
 0x167   : > { %4118 = vmatmul.msk.bf16.gmra.mxu2 %vm635_vm4, %v1164_v6  ;;  %v957_v9 = vpop.f32.mrf.mxu1  ;;  %v3425_v6 = vrot.slane %v5546_v53, 5  ;;  %v4424_v53 = vrot.slane %v5539_v61, 9  ;;  %v3428_v14 = vrot.slane %v5566_v36, 5  ;;  %v2875_v37 = vshrl.u32 %v5592_v24, 16 }
 0x168   : > { %v5587_v43 = vpack.c.b16 %v2326_v48, %v2325_v38  ;;  %v5589_v28 = vadd.f32 %v2129_v15, %v1616_v41  ;;  %v2864_v0 = vsel %vm4890_vm5, %v2859_v27, %v2863_v51  ;;  %v2871_v41 = vshll.u32 %v5592_v24, 16 }
 0x169   : > { %v3427_v46 = vrot.slane %v3425_v6, 4  ;;  %v3195_v13 = vunpack.c.l.b16 %v2854_v56  ;;  %v3196_v3 = vunpack.c.l.b16 %v2864_v0  ;;  %v3426_v33 = vsel %vm5111_vm8, %v4424_v53, %v3425_v6 }
 0x16a   : > { %v1260_v49 = vpop.f32.mrf.mxu2  ;;  %4241 = vmatmul.msk.bf16.gmra.mxu3 %vm635_vm4, %v4488_v5  ;;  %v958_v5 = vadd.f32 %v957_v9, %v5337_v52  ;;  %v2873_v48 = vrot.slane %v2871_v41, 5  ;;  %v2877_v52 = vrot.slane %v2875_v37, 4  ;;  %v5621_v37 = vld [vmem:[%s4866_s6 + $0x40] sm:$0xf] }
 0x16b   : > { %v1319_v12 = vadd.f32 %v1260_v49, %v956_v35  ;;  %v2132_v7 = vpop.f32.mrf.mxu0  ;;  %v2867_v35 = vrot.slane %v2865_v1, 4  ;;  %v3429_v38 = vsel %vm5111_vm8, %v3427_v46, %v3428_v14  ;;  %v4290_v49 = vld [vmem:[%s4866_s6 + $0x38] sm:$0x1]  ;;  %v3227_v6 = vpack.c.b16 %v3196_v3, %v3195_v13  ;;  %v5618_v46 = vld [vmem:[%s4866_s6 + $0x3c] sm:$0xf] }
 0x16c   : > { %v2881_v0 = vshll.u32 %v4290_v49, 16  ;;  %v3431_v3 = vrot.slane %v5592_v24, 5 }
 0x16d   : > { %v1558_v17 = vpop.f32.mrf.mxu3 }
 0x16e   : > { %4258 = vmatmul.msk.bf16.gmra.mxu0 %vm635_vm4, %v2036_v22  ;;  %v1617_v15 = vadd.f32 %v1558_v17, %v1319_v12  ;;  %v3529_v22 = vunpack.c.l.b16 %v3426_v33  ;;  %v2868_v12 = vor.u32 %v2867_v35, %v2863_v51  ;;  %v2878_v17 = vor.u32 %v2877_v52, %v2873_v48 }
 0x16f   : > { %v960_v2 = vpop.f32.mrf.mxu1  ;;  %v2895_v35 = vshll.u32 %v5621_v37, 16 }
 0x170   : > { %v5605_v60 = vadd.f32 %v2132_v7, %v1617_v15  ;;  %v961_v53 = vadd.f32 %v960_v2, %v5227_v54  ;;  %v2869_v41 = vrot.slane %v2868_v12, 4  ;;  %v2879_v51 = vrot.slane %v2878_v17, 4 }
 0x171   : > { %v2886_v54 = vshrl.u32 %v5618_v46, 16  ;;  %v2889_v2 = vshll.u32 %v5618_v46, 16  ;;  %v3433_v12 = vrot.slane %v3431_v3, 4 }
 0x172   : > { %v1262_v61 = vpop.f32.mrf.mxu2  ;;  %4268 = vmatmul.msk.bf16.vlgmr.msra.gmra.mxu1 %vm635_vm4, %v5543_v23  ;;  %v3530_v23 = vunpack.c.l.b16 %v3429_v38  ;;  %v3430_v38 = vrot.slane %v3428_v14, 4 }
 0x173   : > { %v1320_v36 = vadd.f32 %v1262_v61, %v958_v5  ;;  %v2134_v9 = vpop.f32.mrf.mxu0  ;;  %v2883_v61 = vrot.slane %v2881_v0, 5  ;;  %v2891_v17 = vrot.slane %v2889_v2, 5  ;;  %v2897_v0 = vrot.slane %v2895_v35, 5 }
 0x174   : > { %v3561_v1 = vpack.c.b16 %v3530_v23, %v3529_v22  ;;  %v4612_v22 = vld [vmem:[%s4866_s6 + $0x2c] sm:$0xf] }
 0x175   : > { %v1560_v27 = vpop.f32.mrf.mxu3  ;;  %v2884_v24 = vsel %vm4890_vm5, %v2879_v51, %v2883_v61  ;;  %v2232_v23 = vrot.slane %v4612_v22, 5  ;;  %v5645_v51 = vld [vmem:[%s4866_s6 + $0x44] sm:$0xf]  ;;  %v4490_v61 = vld [vmem:[%s4866_s6 + $0x30] sm:$0xff] }
 0x176   : > { %v1618_v7 = vadd.f32 %v1560_v27, %v1320_v36  ;;  %v2899_v36 = vshrl.u32 %v5621_v37, 16 }
 0x177   : > { %4391 = vmatmul.msk.bf16.vlgmr.msra.gmra.mxu2 %vm635_vm4, %v4489_v44  ;;  %v962_v56 = vpop.f32.mrf.mxu1 }
 0x178   : > { %v5624_v33 = vadd.f32 %v2134_v9, %v1618_v7  ;;  %v2874_v9 = vsel %vm4890_vm5, %v2869_v41, %v2873_v48  ;;  %v3434_v7 = vrot.slane %v4290_v49, 5  ;;  %v963_v14 = vadd.f32 %v962_v56, %v5243_v20  ;;  %v4614_v56 = vld [vmem:[%s4866_s6 + $0x30] sm:$0xf] }
 0x179   : > { %v3198_v41 = vunpack.c.l.b16 %v2884_v24  ;;  %v2234_v20 = vrot.slane %v2232_v23, 4  ;;  %v2235_v35 = vrot.slane %v4614_v56, 5  ;;  %v5664_v56 = vld [vmem:[%s4866_s6 + $0x48] sm:$0xf] }
 0x17a   : > { %v1265_v15 = vpop.f32.mrf.mxu2  ;;  %4408 = vmatmul.msk.bf16.vlgmr.msra.gmra.mxu3 %vm635_vm4, %v3227_v6  ;;  %v2888_v6 = vrot.slane %v2886_v54, 4  ;;  %v4613_v54 = vld [vmem:[%s4866_s6 + $0x28] sm:$0xf] }
 0x17b   : > { %v1321_v5 = vadd.f32 %v1265_v15, %v961_v53  ;;  %v2137_v13 = vpop.f32.mrf.mxu0  ;;  %v2901_v53 = vrot.slane %v2899_v36, 4  ;;  %v3197_v15 = vunpack.c.l.b16 %v2874_v9  ;;  %v4260_v2 = vrot.slane %v4613_v54, 9 }
 0x17c   : > { %v3435_v36 = vsel %vm5111_vm8, %v3433_v12, %v3434_v7  ;;  %v2236_v54 = vsel %vm5111_vm8, %v2234_v20, %v2235_v35  ;;  %v4425_v20 = vrot.slane %v5618_v46, 9 }
 0x17d   : > { %v1563_v44 = vpop.f32.mrf.mxu3  ;;  %v3228_v24 = vpack.c.b16 %v3198_v41, %v3197_v15  ;;  %v3532_v22 = vunpack.c.l.b16 %v3435_v36  ;;  %v2328_v41 = vunpack.c.l.b16 %v2236_v54 }
 0x17e   : > { %4433 = vmatmul.msk.bf16.vlgmr.msra.gmra.mxu0 %vm635_vm4, %v3561_v1  ;;  %v1619_v52 = vadd.f32 %v1563_v44, %v1321_v5  ;;  %v3432_v5 = vsel %vm5111_vm8, %v3430_v38, %v3431_v3  ;;  %v2892_v44 = vor.u32 %v2891_v17, %v2888_v6 }
 0x17f   : > { %v965_v27 = vpop.f32.mrf.mxu1  ;;  %v3531_v3 = vunpack.c.l.b16 %v3432_v5 }
 0x180   : > { %v5638_v1 = vadd.f32 %v2137_v13, %v1619_v52  ;;  %v2905_v52 = vshll.u32 %v5645_v51, 16  ;;  %v966_v12 = vadd.f32 %v965_v27, %v5266_v42  ;;  %v2893_v7 = vrot.slane %v2892_v44, 4 }
 0x181   : > { %v3562_v5 = vpack.c.b16 %v3532_v22, %v3531_v3  ;;  %v4615_v3 = vld [vmem:[%s4866_s6 + $0x34] sm:$0xf]  ;;  %v4616_v22 = vld [vmem:[%s4866_s6 + $0x38] sm:$0x1] }
 0x182   : > { %v1267_v48 = vpop.f32.mrf.mxu2  ;;  %4269 = vmatmul.msk.bf16.gmra.mxu1 %vm635_vm4, %v5587_v43  ;;  %v2902_v43 = vor.u32 %v2901_v53, %v2897_v0  ;;  %v5659_v17 = vrot.slane %v2905_v52, 5  ;;  %v2898_v42 = vsel %vm4890_vm5, %v2893_v7, %v2897_v0  ;;  %v3441_v0 = vrot.slane %v5645_v51, 5 }
 0x183   : > { %v1322_v49 = vadd.f32 %v1267_v48, %v963_v14  ;;  %v2139_v13 = vpop.f32.mrf.mxu0  ;;  %v2233_v48 = vsel %vm5111_vm8, %v4260_v2, %v2232_v23  ;;  %v2241_v46 = vrot.slane %v4616_v22, 5  ;;  %v3199_v54 = vunpack.c.l.b16 %v2898_v42 }
 0x184   : > { %v2903_v6 = vrot.slane %v2902_v43, 4  ;;  %v2327_v15 = vunpack.c.l.b16 %v2233_v48  ;;  %v2915_v43 = vshll.u32 %v5664_v56, 16 }
 0x185   : > { %v1565_v9 = vpop.f32.mrf.mxu3 }
 0x186   : > { %v1620_v38 = vadd.f32 %v1565_v9, %v1322_v49  ;;  %v2908_v27 = vsel %vm4890_vm5, %v2903_v6, %v5659_v17  ;;  %v2357_v44 = vpack.c.b16 %v2328_v41, %v2327_v15 }
 0x187   : > { %4392 = vmatmul.msk.bf16.gmra.mxu2 %vm635_vm4, %v4490_v61  ;;  %v967_v14 = vpop.f32.mrf.mxu1  ;;  %v3438_v61 = vrot.slane %v5621_v37, 5  ;;  %v2909_v37 = vshrl.u32 %v5645_v51, 16  ;;  %v2917_v51 = vrot.slane %v2915_v43, 5 }
 0x188   : > { %v5666_v23 = vadd.f32 %v2139_v13, %v1620_v38  ;;  %v2919_v13 = vshrl.u32 %v5664_v56, 16  ;;  %v2238_v38 = vrot.slane %v4615_v3, 5  ;;  %v968_v48 = vadd.f32 %v967_v14, %v5283_v55 }
 0x189   : > { %v2911_v15 = vrot.slane %v2909_v37, 4  ;;  %v2237_v55 = vrot.slane %v2235_v35, 4 }
 0x18a   : > { %v1270_v53 = vpop.f32.mrf.mxu2  ;;  %4409 = vmatmul.msk.bf16.gmra.mxu3 %vm635_vm4, %v3228_v24  ;;  %v3440_v24 = vrot.slane %v3438_v61, 4  ;;  %v2921_v41 = vrot.slane %v2919_v13, 4  ;;  %v2240_v14 = vrot.slane %v2238_v38, 4 }
 0x18b   : > { %v1323_v49 = vadd.f32 %v1270_v53, %v966_v12  ;;  %v2142_v2 = vpop.f32.mrf.mxu0  ;;  %v3200_v12 = vunpack.c.l.b16 %v2908_v27  ;;  %v3439_v53 = vsel %vm5111_vm8, %v4425_v20, %v3438_v61  ;;  %v2912_v61 = vor.u32 %v2911_v15, %v5659_v17  ;;  %v5705_v15 = vld [vmem:[%s4866_s6 + $0x54] sm:$0xf] }
 0x18c   : > { %v2922_v20 = vor.u32 %v2921_v41, %v2917_v51  ;;  %v2239_v35 = vsel %vm5111_vm8, %v2237_v55, %v2238_v38  ;;  %v2242_v13 = vsel %vm5111_vm8, %v2240_v14, %v2241_v46  ;;  %v2939_v55 = vshll.u32 %v5705_v15, 16 }
 0x18d   : > { %v1568_v36 = vpop.f32.mrf.mxu3  ;;  %v3229_v27 = vpack.c.b16 %v3200_v12, %v3199_v54  ;;  %v2329_v17 = vunpack.c.l.b16 %v2239_v35  ;;  %v2943_v14 = vshrl.u32 %v5705_v15, 16 }
 0x18e   : > { %4434 = vmatmul.msk.bf16.gmra.mxu0 %vm635_vm4, %v3562_v5  ;;  %v1621_v52 = vadd.f32 %v1568_v36, %v1323_v49  ;;  %v4491_v49 = vld [vmem:[%s4866_s6 + $0x3c] sm:$0xff]  ;;  %v3442_v36 = vsel %vm5111_vm8, %v3440_v24, %v3441_v0  ;;  %v2923_v38 = vrot.slane %v2922_v20, 4 }
 0x18f   : > { %v970_v9 = vpop.f32.mrf.mxu1  ;;  %v3534_v3 = vunpack.c.l.b16 %v3442_v36  ;;  %v4617_v20 = vld [vmem:[%s4866_s6 + $0x40] sm:$0xf] }
 0x190   : > { %v5682_v7 = vadd.f32 %v2142_v2, %v1621_v52  ;;  %v5691_v2 = vld [vmem:[%s4866_s6 + $0x4c] sm:$0x1]  ;;  %v971_v22 = vadd.f32 %v970_v9, %v5304_v29  ;;  %v3444_v29 = vrot.slane %v5664_v56, 5 }
 0x191   : > { %v2925_v24 = vshll.u32 %v5691_v2, 16 }
 0x192   : > { %v1272_v6 = vpop.f32.mrf.mxu2  ;;  %4270 = vmatmul.msk.bf16.gmra.mxu1 %vm635_vm4, %v2357_v44  ;;  %v3533_v44 = vunpack.c.l.b16 %v3439_v53  ;;  %v2913_v53 = vrot.slane %v2912_v61, 4  ;;  %v3446_v35 = vrot.slane %v3444_v29, 4 }
 0x193   : > { %v1324_v5 = vadd.f32 %v1272_v6, %v968_v48  ;;  %v2144_v42 = vpop.f32.mrf.mxu0  ;;  %v5702_v48 = vld [vmem:[%s4866_s6 + $0x50] sm:$0xf]  ;;  %v2330_v6 = vunpack.c.l.b16 %v2242_v13  ;;  %v3447_v13 = vrot.slane %v5691_v2, 5 }
 0x194   : > { %v3563_v54 = vpack.c.b16 %v3534_v3, %v3533_v44  ;;  %v2930_v9 = vshrl.u32 %v5702_v48, 16  ;;  %v2933_v36 = vshll.u32 %v5702_v48, 16 }
 0x195   : > { %v1570_v52 = vpop.f32.mrf.mxu3  ;;  %v2358_v44 = vpack.c.b16 %v2330_v6, %v2329_v17 }
 0x196   : > { %v1622_v37 = vadd.f32 %v1570_v52, %v1324_v5  ;;  %v2927_v5 = vrot.slane %v2925_v24, 5  ;;  %v2932_v24 = vrot.slane %v2930_v9, 4  ;;  %v4618_v9 = vld [vmem:[%s4866_s6 + $0x3c] sm:$0xf] }
 0x197   : > { %4393 = vmatmul.msk.bf16.gmra.mxu2 %vm635_vm4, %v4491_v49  ;;  %v972_v43 = vpop.f32.mrf.mxu1 }
 0x198   : > { %v5708_v46 = vadd.f32 %v2144_v42, %v1622_v37  ;;  %v2918_v42 = vsel %vm4890_vm5, %v2913_v53, %v2917_v51  ;;  %v2928_v56 = vsel %vm4890_vm5, %v2923_v38, %v2927_v5  ;;  %v2245_v37 = vrot.slane %v4617_v20, 5  ;;  %v5729_v38 = vld [vmem:[%s4866_s6 + $0x58] sm:$0xf]  ;;  %v4492_v5 = vld [vmem:[%s4866_s6 + $0x44] sm:$0xff] }
 0x199   : > { %v3201_v6 = vunpack.c.l.b16 %v2918_v42  ;;  %v3202_v53 = vunpack.c.l.b16 %v2928_v56 }
 0x19a   : > { %v1275_v12 = vpop.f32.mrf.mxu2  ;;  %4410 = vmatmul.msk.bf16.gmra.mxu3 %vm635_vm4, %v3229_v27  ;;  %v3443_v27 = vrot.slane %v3441_v0, 4  ;;  %v2935_v0 = vrot.slane %v2933_v36, 5  ;;  %v4261_v36 = vrot.slane %v4618_v9, 9 }
 0x19b   : > { %v1325_v41 = vadd.f32 %v1275_v12, %v971_v22  ;;  %v2147_v49 = vpop.f32.mrf.mxu0  ;;  %v973_v22 = vadd.f32 %v972_v43, %v5321_v59  ;;  %v2945_v12 = vrot.slane %v2943_v14, 4  ;;  %v4619_v59 = vld [vmem:[%s4866_s6 + $0x44] sm:$0xf]  ;;  %v3230_v56 = vpack.c.b16 %v3202_v53, %v3201_v6 }
 0x19c   : > { %v2248_v43 = vrot.slane %v4619_v59, 5  ;;  %v2936_v14 = vor.u32 %v2935_v0, %v2932_v24  ;;  %v5748_v59 = vld [vmem:[%s4866_s6 + $0x5c] sm:$0xf] }
 0x19d   : > { %v1573_v52 = vpop.f32.mrf.mxu3 }
 0x19e   : > { %4435 = vmatmul.msk.bf16.gmra.mxu0 %vm635_vm4, %v3563_v54  ;;  %v1623_v3 = vadd.f32 %v1573_v52, %v1325_v41  ;;  %v2941_v54 = vrot.slane %v2939_v55, 5  ;;  %v3445_v41 = vsel %vm5111_vm8, %v3443_v27, %v3444_v29  ;;  %v2247_v52 = vrot.slane %v2245_v37, 4 }
 0x19f   : > { %v975_v61 = vpop.f32.mrf.mxu1  ;;  %v3535_v29 = vunpack.c.l.b16 %v3445_v41 }
 0x1a0   : > { %v5723_v17 = vadd.f32 %v2147_v49, %v1623_v3  ;;  %v3448_v49 = vsel %vm5111_vm8, %v3446_v35, %v3447_v13  ;;  %v2949_v3 = vshll.u32 %v5729_v38, 16  ;;  %v2249_v9 = vsel %vm5111_vm8, %v2247_v52, %v2248_v43 }
 0x1a1   : > { %v3536_v20 = vunpack.c.l.b16 %v3448_v49  ;;  %v976_v35 = vadd.f32 %v975_v61, %v5342_v31  ;;  %v2937_v13 = vrot.slane %v2936_v14, 4  ;;  %v2332_v53 = vunpack.c.l.b16 %v2249_v9 }
 0x1a2   : > { %v1277_v51 = vpop.f32.mrf.mxu2  ;;  %4271 = vmatmul.msk.bf16.gmra.mxu1 %vm635_vm4, %v2358_v44  ;;  %v2946_v44 = vor.u32 %v2945_v12, %v2941_v54  ;;  %v5743_v0 = vrot.slane %v2949_v3, 5  ;;  %v4426_v52 = vrot.slane %v5702_v48, 9 }
 0x1a3   : > { %v1326_v2 = vadd.f32 %v1277_v51, %v973_v22  ;;  %v2149_v55 = vpop.f32.mrf.mxu0  ;;  %v2246_v51 = vsel %vm5111_vm8, %v4261_v36, %v2245_v37  ;;  %v3564_v41 = vpack.c.b16 %v3536_v20, %v3535_v29  ;;  %v2942_v31 = vsel %vm4890_vm5, %v2937_v13, %v2941_v54  ;;  %v4620_v29 = vld [vmem:[%s4866_s6 + $0x48] sm:$0xf]  ;;  %v4621_v20 = vld [vmem:[%s4866_s6 + $0x4c] sm:$0x1] }
 0x1a4   : > { %v2947_v24 = vrot.slane %v2946_v44, 4  ;;  %v2331_v6 = vunpack.c.l.b16 %v2246_v51  ;;  %v2959_v44 = vshll.u32 %v5748_v59, 16  ;;  %v3454_v54 = vrot.slane %v5729_v38, 5 }
 0x1a5   : > { %v1575_v42 = vpop.f32.mrf.mxu3  ;;  %v2254_v48 = vrot.slane %v4621_v20, 5  ;;  %v3203_v9 = vunpack.c.l.b16 %v2942_v31 }
 0x1a6   : > { %v1624_v27 = vadd.f32 %v1575_v42, %v1326_v2  ;;  %v2952_v61 = vsel %vm4890_vm5, %v2947_v24, %v5743_v0  ;;  %v2359_v14 = vpack.c.b16 %v2332_v53, %v2331_v6 }
 0x1a7   : > { %4394 = vmatmul.msk.bf16.gmra.mxu2 %vm635_vm4, %v4492_v5  ;;  %v977_v22 = vpop.f32.mrf.mxu1  ;;  %v3451_v5 = vrot.slane %v5705_v15, 5  ;;  %v2953_v15 = vshrl.u32 %v5729_v38, 16  ;;  %v2961_v38 = vrot.slane %v2959_v44, 5 }
 0x1a8   : > { %v5750_v37 = vadd.f32 %v2149_v55, %v1624_v27  ;;  %v2963_v55 = vshrl.u32 %v5748_v59, 16  ;;  %v2251_v27 = vrot.slane %v4620_v29, 5  ;;  %v978_v51 = vadd.f32 %v977_v22, %v5357_v19 }
 0x1a9   : > { %v2955_v6 = vrot.slane %v2953_v15, 4  ;;  %v2250_v19 = vrot.slane %v2248_v43, 4 }
 0x1aa   : > { %v1280_v12 = vpop.f32.mrf.mxu2  ;;  %4411 = vmatmul.msk.bf16.gmra.mxu3 %vm635_vm4, %v3230_v56  ;;  %v3453_v56 = vrot.slane %v3451_v5, 4  ;;  %v2965_v53 = vrot.slane %v2963_v55, 4  ;;  %v2253_v22 = vrot.slane %v2251_v27, 4 }
 0x1ab   : > { %v1327_v2 = vadd.f32 %v1280_v12, %v976_v35  ;;  %v2152_v36 = vpop.f32.mrf.mxu0  ;;  %v3204_v35 = vunpack.c.l.b16 %v2952_v61  ;;  %v3452_v12 = vsel %vm5111_vm8, %v4426_v52, %v3451_v5  ;;  %v2956_v5 = vor.u32 %v2955_v6, %v5743_v0  ;;  %v5789_v6 = vld [vmem:[%s4866_s6 + $0x68] sm:$0xf] }
 0x1ac   : > { %v2966_v52 = vor.u32 %v2965_v53, %v2961_v38  ;;  %v2252_v43 = vsel %vm5111_vm8, %v2250_v19, %v2251_v27  ;;  %v2255_v55 = vsel %vm5111_vm8, %v2253_v22, %v2254_v48  ;;  %v2983_v19 = vshll.u32 %v5789_v6, 16 }
 0x1ad   : > { %v1578_v49 = vpop.f32.mrf.mxu3  ;;  %v3231_v61 = vpack.c.b16 %v3204_v35, %v3203_v9  ;;  %v2333_v0 = vunpack.c.l.b16 %v2252_v43  ;;  %v2987_v22 = vshrl.u32 %v5789_v6, 16 }
 0x1ae   : > { %4436 = vmatmul.msk.bf16.gmra.mxu0 %vm635_vm4, %v3564_v41  ;;  %v1625_v3 = vadd.f32 %v1578_v49, %v1327_v2  ;;  %v4493_v2 = vld [vmem:[%s4866_s6 + $0x50] sm:$0xff]  ;;  %v3455_v49 = vsel %vm5111_vm8, %v3453_v56, %v3454_v54  ;;  %v2967_v27 = vrot.slane %v2966_v52, 4 }
 0x1af   : > { %v980_v42 = vpop.f32.mrf.mxu1  ;;  %v3538_v29 = vunpack.c.l.b16 %v3455_v49  ;;  %v4622_v52 = vld [vmem:[%s4866_s6 + $0x54] sm:$0xf] }
 0x1b0   : > { %v5766_v13 = vadd.f32 %v2152_v36, %v1625_v3  ;;  %v5775_v36 = vld [vmem:[%s4866_s6 + $0x60] sm:$0x1]  ;;  %v981_v20 = vadd.f32 %v980_v42, %v5238_v62  ;;  %v3457_v62 = vrot.slane %v5748_v59, 5 }
 0x1b1   : > { %v2969_v56 = vshll.u32 %v5775_v36, 16 }
 0x1b2   : > { %v1282_v24 = vpop.f32.mrf.mxu2  ;;  %4272 = vmatmul.msk.bf16.gmra.mxu1 %vm635_vm4, %v2359_v14  ;;  %v3537_v14 = vunpack.c.l.b16 %v3452_v12  ;;  %v2957_v12 = vrot.slane %v2956_v5, 4  ;;  %v3459_v43 = vrot.slane %v3457_v62, 4 }
 0x1b3   : > { %v1328_v41 = vadd.f32 %v1282_v24, %v978_v51  ;;  %v2154_v31 = vpop.f32.mrf.mxu0  ;;  %v5786_v51 = vld [vmem:[%s4866_s6 + $0x64] sm:$0xf]  ;;  %v2334_v24 = vunpack.c.l.b16 %v2255_v55  ;;  %v3460_v55 = vrot.slane %v5775_v36, 5 }
 0x1b4   : > { %v3565_v9 = vpack.c.b16 %v3538_v29, %v3537_v14  ;;  %v2974_v42 = vshrl.u32 %v5786_v51, 16  ;;  %v2977_v49 = vshll.u32 %v5786_v51, 16 }
 0x1b5   : > { %v1580_v3 = vpop.f32.mrf.mxu3  ;;  %v2360_v14 = vpack.c.b16 %v2334_v24, %v2333_v0 }
 0x1b6   : > { %v1626_v15 = vadd.f32 %v1580_v3, %v1328_v41  ;;  %v2971_v41 = vrot.slane %v2969_v56, 5  ;;  %v2976_v56 = vrot.slane %v2974_v42, 4  ;;  %v4623_v42 = vld [vmem:[%s4866_s6 + $0x50] sm:$0xf] }
 0x1b7   : > { %4395 = vmatmul.msk.bf16.gmra.mxu2 %vm635_vm4, %v4493_v2  ;;  %v982_v44 = vpop.f32.mrf.mxu1 }
 0x1b8   : > { %v5792_v48 = vadd.f32 %v2154_v31, %v1626_v15  ;;  %v2962_v31 = vsel %vm4890_vm5, %v2957_v12, %v2961_v38  ;;  %v2972_v59 = vsel %vm4890_vm5, %v2967_v27, %v2971_v41  ;;  %v2258_v15 = vrot.slane %v4622_v52, 5  ;;  %v5813_v27 = vld [vmem:[%s4866_s6 + $0x6c] sm:$0xf]  ;;  %v4494_v41 = vld [vmem:[%s4866_s6 + $0x58] sm:$0xff] }
 0x1b9   : > { %v3205_v24 = vunpack.c.l.b16 %v2962_v31  ;;  %v3206_v12 = vunpack.c.l.b16 %v2972_v59 }
 0x1ba   : > { %v1285_v35 = vpop.f32.mrf.mxu2  ;;  %4412 = vmatmul.msk.bf16.gmra.mxu3 %vm635_vm4, %v3231_v61  ;;  %v3456_v61 = vrot.slane %v3454_v54, 4  ;;  %v2979_v54 = vrot.slane %v2977_v49, 5  ;;  %v4262_v49 = vrot.slane %v4623_v42, 9 }
 0x1bb   : > { %v1329_v53 = vadd.f32 %v1285_v35, %v981_v20  ;;  %v2157_v2 = vpop.f32.mrf.mxu0  ;;  %v983_v20 = vadd.f32 %v982_v44, %v5255_v47  ;;  %v2989_v35 = vrot.slane %v2987_v22, 4  ;;  %v4624_v47 = vld [vmem:[%s4866_s6 + $0x58] sm:$0xf]  ;;  %v3232_v59 = vpack.c.b16 %v3206_v12, %v3205_v24 }
 0x1bc   : > { %v2261_v44 = vrot.slane %v4624_v47, 5  ;;  %v2980_v22 = vor.u32 %v2979_v54, %v2976_v56  ;;  %v5832_v47 = vld [vmem:[%s4866_s6 + $0x70] sm:$0xf] }
 0x1bd   : > { %v1583_v3 = vpop.f32.mrf.mxu3 }
 0x1be   : > { %4437 = vmatmul.msk.bf16.gmra.mxu0 %vm635_vm4, %v3565_v9  ;;  %v1627_v29 = vadd.f32 %v1583_v3, %v1329_v53  ;;  %v2985_v9 = vrot.slane %v2983_v19, 5  ;;  %v3458_v53 = vsel %vm5111_vm8, %v3456_v61, %v3457_v62  ;;  %v2260_v3 = vrot.slane %v2258_v15, 4 }
 0x1bf   : > { %v985_v5 = vpop.f32.mrf.mxu1  ;;  %v3539_v62 = vunpack.c.l.b16 %v3458_v53 }
 0x1c0   : > { %v5807_v0 = vadd.f32 %v2157_v2, %v1627_v29  ;;  %v3461_v2 = vsel %vm5111_vm8, %v3459_v43, %v3460_v55  ;;  %v2993_v29 = vshll.u32 %v5813_v27, 16  ;;  %v2262_v42 = vsel %vm5111_vm8, %v2260_v3, %v2261_v44 }
 0x1c1   : > { %v3540_v52 = vunpack.c.l.b16 %v3461_v2  ;;  %v986_v43 = vadd.f32 %v985_v5, %v5275_v58  ;;  %v2981_v55 = vrot.slane %v2980_v22, 4  ;;  %v2336_v12 = vunpack.c.l.b16 %v2262_v42 }
 0x1c2   : > { %v1287_v38 = vpop.f32.mrf.mxu2  ;;  %4273 = vmatmul.msk.bf16.gmra.mxu1 %vm635_vm4, %v2360_v14  ;;  %v2990_v14 = vor.u32 %v2989_v35, %v2985_v9  ;;  %v5827_v54 = vrot.slane %v2993_v29, 5  ;;  %v4427_v3 = vrot.slane %v5786_v51, 9 }
 0x1c3   : > { %v1330_v36 = vadd.f32 %v1287_v38, %v983_v20  ;;  %v2159_v19 = vpop.f32.mrf.mxu0  ;;  %v2259_v38 = vsel %vm5111_vm8, %v4262_v49, %v2258_v15  ;;  %v3566_v53 = vpack.c.b16 %v3540_v52, %v3539_v62  ;;  %v2986_v58 = vsel %vm4890_vm5, %v2981_v55, %v2985_v9  ;;  %v4625_v62 = vld [vmem:[%s4866_s6 + $0x5c] sm:$0xf]  ;;  %v4626_v52 = vld [vmem:[%s4866_s6 + $0x60] sm:$0x1] }
 0x1c4   : > { %v2991_v56 = vrot.slane %v2990_v14, 4  ;;  %v2335_v24 = vunpack.c.l.b16 %v2259_v38  ;;  %v3003_v14 = vshll.u32 %v5832_v47, 16  ;;  %v3467_v9 = vrot.slane %v5813_v27, 5 }
 0x1c5   : > { %v1585_v31 = vpop.f32.mrf.mxu3  ;;  %v2267_v51 = vrot.slane %v4626_v52, 5  ;;  %v3207_v42 = vunpack.c.l.b16 %v2986_v58 }
 0x1c6   : > { %v1628_v61 = vadd.f32 %v1585_v31, %v1330_v36  ;;  %v2996_v5 = vsel %vm4890_vm5, %v2991_v56, %v5827_v54  ;;  %v2361_v22 = vpack.c.b16 %v2336_v12, %v2335_v24 }
 0x1c7   : > { %4396 = vmatmul.msk.bf16.gmra.mxu2 %vm635_vm4, %v4494_v41  ;;  %v987_v20 = vpop.f32.mrf.mxu1  ;;  %v3464_v41 = vrot.slane %v5789_v6, 5  ;;  %v2997_v6 = vshrl.u32 %v5813_v27, 16  ;;  %v3005_v27 = vrot.slane %v3003_v14, 5 }
 0x1c8   : > { %v5834_v15 = vadd.f32 %v2159_v19, %v1628_v61  ;;  %v3007_v19 = vshrl.u32 %v5832_v47, 16  ;;  %v2264_v61 = vrot.slane %v4625_v62, 5  ;;  %v988_v38 = vadd.f32 %v987_v20, %v5292_v8 }
 0x1c9   : > { %v2999_v24 = vrot.slane %v2997_v6, 4  ;;  %v2263_v8 = vrot.slane %v2261_v44, 4 }
 0x1ca   : > { %v1290_v35 = vpop.f32.mrf.mxu2  ;;  %4413 = vmatmul.msk.bf16.gmra.mxu3 %vm635_vm4, %v3232_v59  ;;  %v3466_v59 = vrot.slane %v3464_v41, 4  ;;  %v3009_v12 = vrot.slane %v3007_v19, 4  ;;  %v2266_v20 = vrot.slane %v2264_v61, 4 }
 0x1cb   : > { %v1331_v36 = vadd.f32 %v1290_v35, %v986_v43  ;;  %v2162_v49 = vpop.f32.mrf.mxu0  ;;  %v3208_v43 = vunpack.c.l.b16 %v2996_v5  ;;  %v3465_v35 = vsel %vm5111_vm8, %v4427_v3, %v3464_v41  ;;  %v3000_v41 = vor.u32 %v2999_v24, %v5827_v54  ;;  %v5873_v24 = vld [vmem:[%s4866_s6 + $0x7c] sm:$0xf] }
 0x1cc   : > { %v3010_v3 = vor.u32 %v3009_v12, %v3005_v27  ;;  %v2265_v44 = vsel %vm5111_vm8, %v2263_v8, %v2264_v61  ;;  %v2268_v19 = vsel %vm5111_vm8, %v2266_v20, %v2267_v51  ;;  %v3027_v8 = vshll.u32 %v5873_v24, 16 }
 0x1cd   : > { %v1588_v2 = vpop.f32.mrf.mxu3  ;;  %v3233_v5 = vpack.c.b16 %v3208_v43, %v3207_v42  ;;  %v2337_v54 = vunpack.c.l.b16 %v2265_v44  ;;  %v3031_v20 = vshrl.u32 %v5873_v24, 16 }
 0x1ce   : > { %4438 = vmatmul.msk.bf16.gmra.mxu0 %vm635_vm4, %v3566_v53  ;;  %v1629_v29 = vadd.f32 %v1588_v2, %v1331_v36  ;;  %v4495_v36 = vld [vmem:[%s4866_s6 + $0x64] sm:$0xff]  ;;  %v3468_v2 = vsel %vm5111_vm8, %v3466_v59, %v3467_v9  ;;  %v3011_v61 = vrot.slane %v3010_v3, 4 }
 0x1cf   : > { %v990_v31 = vpop.f32.mrf.mxu1  ;;  %v3542_v62 = vunpack.c.l.b16 %v3468_v2  ;;  %v4627_v3 = vld [vmem:[%s4866_s6 + $0x68] sm:$0xf] }
 0x1d0   : > { %v5850_v55 = vadd.f32 %v2162_v49, %v1629_v29  ;;  %v5859_v49 = vld [vmem:[%s4866_s6 + $0x74] sm:$0x1]  ;;  %v991_v52 = vadd.f32 %v990_v31, %v5311_v57  ;;  %v3470_v57 = vrot.slane %v5832_v47, 5 }
 0x1d1   : > { %v3013_v59 = vshll.u32 %v5859_v49, 16 }
 0x1d2   : > { %v1292_v56 = vpop.f32.mrf.mxu2  ;;  %4274 = vmatmul.msk.bf16.gmra.mxu1 %vm635_vm4, %v2361_v22  ;;  %v3541_v22 = vunpack.c.l.b16 %v3465_v35  ;;  %v3001_v35 = vrot.slane %v3000_v41, 4  ;;  %v3472_v44 = vrot.slane %v3470_v57, 4 }
 0x1d3   : > { %v1332_v53 = vadd.f32 %v1292_v56, %v988_v38  ;;  %v2164_v58 = vpop.f32.mrf.mxu0  ;;  %v5870_v38 = vld [vmem:[%s4866_s6 + $0x78] sm:$0xf]  ;;  %v2338_v56 = vunpack.c.l.b16 %v2268_v19  ;;  %v3473_v19 = vrot.slane %v5859_v49, 5 }
 0x1d4   : > { %v3567_v42 = vpack.c.b16 %v3542_v62, %v3541_v22  ;;  %v3018_v31 = vshrl.u32 %v5870_v38, 16  ;;  %v3021_v2 = vshll.u32 %v5870_v38, 16 }
 0x1d5   : > { %v1590_v29 = vpop.f32.mrf.mxu3  ;;  %v2362_v22 = vpack.c.b16 %v2338_v56, %v2337_v54 }
 0x1d6   : > { %v1630_v6 = vadd.f32 %v1590_v29, %v1332_v53  ;;  %v3015_v53 = vrot.slane %v3013_v59, 5  ;;  %v3020_v59 = vrot.slane %v3018_v31, 4  ;;  %v4628_v31 = vld [vmem:[%s4866_s6 + $0x64] sm:$0xf] }
 0x1d7   : > { %4397 = vmatmul.msk.bf16.gmra.mxu2 %vm635_vm4, %v4495_v36  ;;  %v992_v14 = vpop.f32.mrf.mxu1 }
 0x1d8   : > { %v5876_v51 = vadd.f32 %v2164_v58, %v1630_v6  ;;  %v3006_v58 = vsel %vm4890_vm5, %v3001_v35, %v3005_v27  ;;  %v3016_v47 = vsel %vm4890_vm5, %v3011_v61, %v3015_v53  ;;  %v2271_v6 = vrot.slane %v4627_v3, 5  ;;  %v5897_v61 = vld [vmem:[%s4866_s6 + $0x80] sm:$0xf]  ;;  %v4496_v53 = vld [vmem:[%s4866_s6 + $0x6c] sm:$0xff] }
 0x1d9   : > { %v3209_v56 = vunpack.c.l.b16 %v3006_v58  ;;  %v3210_v35 = vunpack.c.l.b16 %v3016_v47 }
 0x1da   : > { %v1295_v43 = vpop.f32.mrf.mxu2  ;;  %4414 = vmatmul.msk.bf16.gmra.mxu3 %vm635_vm4, %v3233_v5  ;;  %v3469_v5 = vrot.slane %v3467_v9, 4  ;;  %v3023_v9 = vrot.slane %v3021_v2, 5  ;;  %v4263_v2 = vrot.slane %v4628_v31, 9 }
 0x1db   : > { %v1333_v12 = vadd.f32 %v1295_v43, %v991_v52  ;;  %v2167_v36 = vpop.f32.mrf.mxu0  ;;  %v993_v52 = vadd.f32 %v992_v14, %v5330_v18  ;;  %v3033_v43 = vrot.slane %v3031_v20, 4  ;;  %v4629_v18 = vld [vmem:[%s4866_s6 + $0x6c] sm:$0xf]  ;;  %v3234_v47 = vpack.c.b16 %v3210_v35, %v3209_v56 }
 0x1dc   : > { %v2274_v14 = vrot.slane %v4629_v18, 5  ;;  %v3024_v20 = vor.u32 %v3023_v9, %v3020_v59  ;;  %v5914_v18 = vld [vmem:[%s4866_s6 + $0x84] sm:$0xf] }
 0x1dd   : > { %v1593_v29 = vpop.f32.mrf.mxu3 }
 0x1de   : > { %4439 = vmatmul.msk.bf16.gmra.mxu0 %vm635_vm4, %v3567_v42  ;;  %v1631_v62 = vadd.f32 %v1593_v29, %v1333_v12  ;;  %v3029_v42 = vrot.slane %v3027_v8, 5  ;;  %v3471_v12 = vsel %vm5111_vm8, %v3469_v5, %v3470_v57  ;;  %v2273_v29 = vrot.slane %v2271_v6, 4 }
 0x1df   : > { %v995_v41 = vpop.f32.mrf.mxu1  ;;  %v3543_v57 = vunpack.c.l.b16 %v3471_v12 }
 0x1e0   : > { %v5891_v54 = vadd.f32 %v2167_v36, %v1631_v62  ;;  %v3474_v36 = vsel %vm5111_vm8, %v3472_v44, %v3473_v19  ;;  %v3037_v62 = vshll.u32 %v5897_v61, 16  ;;  %v2275_v31 = vsel %vm5111_vm8, %v2273_v29, %v2274_v14 }
 0x1e1   : > { %v3544_v3 = vunpack.c.l.b16 %v3474_v36  ;;  %v3025_v44 = vrot.slane %v3024_v20, 4  ;;  %v996_v19 = vadd.f32 %v995_v41, %v5351_v45  ;;  %v2340_v12 = vunpack.c.l.b16 %v2275_v31 }
 0x1e2   : > { %v1297_v27 = vpop.f32.mrf.mxu2  ;;  %4275 = vmatmul.msk.bf16.gmra.mxu1 %vm635_vm4, %v2362_v22  ;;  %v3034_v22 = vor.u32 %v3033_v43, %v3029_v42  ;;  %v3039_v9 = vrot.slane %v3037_v62, 5  ;;  %v3477_v43 = vrot.slane %v5873_v24, 5  ;;  %v4428_v24 = vrot.slane %v5870_v38, 9 }
 0x1e3   : > { %v1334_v49 = vadd.f32 %v1297_v27, %v993_v52  ;;  %v2169_v8 = vpop.f32.mrf.mxu0  ;;  %v2272_v27 = vsel %vm5111_vm8, %v4263_v2, %v2271_v6  ;;  %v3030_v45 = vsel %vm4890_vm5, %v3025_v44, %v3029_v42  ;;  %v3041_v36 = vshrl.u32 %v5897_v61, 16 }
 0x1e4   : > { %v3035_v59 = vrot.slane %v3034_v22, 4  ;;  %v2339_v35 = vunpack.c.l.b16 %v2272_v27  ;;  %v3479_v29 = vrot.slane %v3477_v43, 4  ;;  %v3480_v62 = vrot.slane %v5897_v61, 5 }
 0x1e5   : > { %v1595_v58 = vpop.f32.mrf.mxu3  ;;  %v3211_v38 = vunpack.c.l.b16 %v3030_v45  ;;  %v3043_v31 = vrot.slane %v3041_v36, 4 }
 0x1e6   : > { %v1632_v5 = vadd.f32 %v1595_v58, %v1334_v49  ;;  %v3568_v49 = vpack.c.b16 %v3544_v3, %v3543_v57  ;;  %v3040_v41 = vsel %vm4890_vm5, %v3035_v59, %v3039_v9  ;;  %v2363_v22 = vpack.c.b16 %v2340_v12, %v2339_v35  ;;  %v4630_v57 = vld [vmem:[%s4866_s6 + $0x70] sm:$0xf] }
 0x1e7   : > { %4398 = vmatmul.msk.bf16.gmra.mxu2 %vm635_vm4, %v4496_v53  ;;  %v997_v52 = vpop.f32.mrf.mxu1  ;;  %v3047_v58 = vshll.u32 %v5914_v18, 16  ;;  %v3212_v27 = vunpack.c.l.b16 %v3040_v41  ;;  %v3481_v59 = vsel %vm5111_vm8, %v3479_v29, %v3480_v62  ;;  %v3044_v36 = vor.u32 %v3043_v31, %v3039_v9  ;;  %v5947_v9 = vld [vmem:[%s4866_s6 + $0x8c] sm:$0xf] }
 0x1e8   : > { %v5916_v6 = vadd.f32 %v2169_v8, %v1632_v5  ;;  %v3051_v8 = vshrl.u32 %v5914_v18, 16  ;;  %v2277_v5 = vrot.slane %v4630_v57, 5  ;;  %v998_v3 = vadd.f32 %v997_v52, %v5368_v34  ;;  %v4631_v52 = vld [vmem:[%s4866_s6 + $0x74] sm:$0x1] }
 0x1e9   : > { %v2280_v45 = vrot.slane %v4631_v52, 5 }
 0x1ea   : > { %v1300_v56 = vpop.f32.mrf.mxu2  ;;  %4415 = vmatmul.msk.bf16.gmra.mxu3 %vm635_vm4, %v3234_v47  ;;  %v3053_v35 = vrot.slane %v3051_v8, 4  ;;  %v2279_v34 = vrot.slane %v2277_v5, 4 }
 0x1eb   : > { %v1335_v53 = vadd.f32 %v1300_v56, %v996_v19  ;;  %v2172_v2 = vpop.f32.mrf.mxu0  ;;  %v3478_v19 = vsel %vm5111_vm8, %v4428_v24, %v3477_v43  ;;  %v3049_v56 = vrot.slane %v3047_v58, 5  ;;  %v3546_v43 = vunpack.c.l.b16 %v3481_v59 }
 0x1ec   : > { %v2281_v58 = vsel %vm5111_vm8, %v2279_v34, %v2280_v45 }
 0x1ed   : > { %v1598_v20 = vpop.f32.mrf.mxu3  ;;  %v3054_v24 = vor.u32 %v3053_v35, %v3049_v56  ;;  %v2342_v59 = vunpack.c.l.b16 %v2281_v58  ;;  %v3483_v35 = vrot.slane %v5914_v18, 5  ;;  %v4632_v58 = vld [vmem:[%s4866_s6 + $0x7c] sm:$0xf] }
 0x1ee   : > { %4440 = vmatmul.msk.bf16.gmra.mxu0 %vm635_vm4, %v3568_v49  ;;  %v1633_v47 = vadd.f32 %v1598_v20, %v1335_v53  ;;  %v4497_v49 = vld [vmem:[%s4866_s6 + $0x78] sm:$0xff]  ;;  %v2276_v53 = vrot.slane %v2274_v14, 4 }
 0x1ef   : > { %v2431_v42 = vpop.f32.mrf.mxu1 }
 0x1f0   : > { %v5930_v44 = vadd.f32 %v2172_v2, %v1633_v47  ;;  %v4310_v2 = vld [vmem:[%s4866_s6 + $0x88] sm:$0x1]  ;;  %v3545_v47 = vunpack.c.l.b16 %v3478_v19  ;;  %v2278_v14 = vsel %vm5111_vm8, %v2276_v53, %v2277_v5 }
 0x1f1   : > { %v3057_v8 = vshll.u32 %v4310_v2, 16  ;;  %v2341_v19 = vunpack.c.l.b16 %v2278_v14 }
 0x1f2   : > { %v1302_v61 = vpop.f32.mrf.mxu2  ;;  %4276 = vmatmul.msk.bf16.gmra.mxu1 %vm635_vm4, %v2363_v22  ;;  %v3235_v22 = vpack.c.b16 %v3212_v27, %v3211_v38  ;;  %v5950_v38 = vld [vmem:[%s4866_s6 + $0x90] sm:$0xf]  ;;  %v3569_v27 = vpack.c.b16 %v3546_v43, %v3545_v47  ;;  %v3485_v47 = vrot.slane %v3483_v35, 4 }
 0x1f3   : > { %v1336_v12 = vadd.f32 %v1302_v61, %v998_v3  ;;  %v2174_v41 = vpop.f32.mrf.mxu0  ;;  %v2511_v3 = vadd.f32 %v2431_v42, %v5384_v11  ;;  %v3045_v61 = vrot.slane %v3044_v36, 4  ;;  %v3062_v11 = vshrl.u32 %v5947_v9, 16 }
 0x1f4   : > { %v3065_v42 = vshll.u32 %v5947_v9, 16  ;;  %v3071_v52 = vshll.u32 %v5950_v38, 16  ;;  %v3075_v45 = vshrl.u32 %v5950_v38, 16 }
 0x1f5   : > { %v1600_v20 = vpop.f32.mrf.mxu3  ;;  %v3050_v18 = vsel %vm4890_vm5, %v3045_v61, %v3049_v56  ;;  %v2284_v56 = vrot.slane %v4632_v58, 5 }
 0x1f6   : > { %v1634_v57 = vadd.f32 %v1600_v20, %v1336_v12  ;;  %v3055_v12 = vrot.slane %v3054_v24, 4  ;;  %v2364_v20 = vpack.c.b16 %v2342_v59, %v2341_v19  ;;  %v5966_v24 = vld [vmem:[%s6408_s2] ss:$0 sm:$0xff] }
 0x1f7   : > { %4399 = vmatmul.msk.bf16.gmra.mxu2 %vm635_vm4, %v4497_v49  ;;  %v2433_v29 = vpop.f32.mrf.mxu1  ;;  %v3059_v49 = vrot.slane %v3057_v8, 5  ;;  %v5972_v8 = vrot.slane %v3071_v52, 5  ;;  %v2286_v52 = vrot.slane %v2284_v56, 4 }
 0x1f8   : > { %v5954_v53 = vadd.f32 %v2174_v41, %v1634_v57  ;;  %v3486_v41 = vrot.slane %v4310_v2, 5  ;;  %v3067_v2 = vrot.slane %v3065_v42, 5  ;;  %v5982_v42 = vld [vmem:[%s4866_s6 + $0x94] sm:$0xf] }
 0x1f9   : > { %v3060_v14 = vsel %vm4890_vm5, %v3055_v12, %v3059_v49  ;;  %v4633_v49 = vld [vmem:[%s4866_s6 + $0x78] sm:$0xf] }
 0x1fa   : > { %v2729_v31 = vpop.f32.mrf.mxu2  ;;  %4416 = vmatmul.msk.bf16.gmra.mxu3 %vm635_vm4, %v3235_v22  ;;  %v3482_v22 = vrot.slane %v3480_v62, 4  ;;  %v3064_v62 = vrot.slane %v3062_v11, 4  ;;  %v3214_v59 = vunpack.c.l.b16 %v3060_v14  ;;  %v3487_v12 = vsel %vm5111_vm8, %v3485_v47, %v3486_v41 }
 0x1fb   : > { %v2809_v5 = vadd.f32 %v2729_v31, %v2511_v3  ;;  %v3637_v34 = vpop.f32.mrf.mxu0  ;;  %v3077_v3 = vrot.slane %v3075_v45, 4  ;;  %v3213_v31 = vunpack.c.l.b16 %v3050_v18  ;;  %v4264_v11 = vrot.slane %v4633_v49, 9  ;;  %v5989_v45 = vld [vmem:[%s4866_s6 + $0x80] sm:$0xf] }
 0x1fc   : > { %v2287_v18 = vrot.slane %v5989_v45, 5  ;;  %v3081_v47 = vshll.u32 %v5982_v42, 16  ;;  %v3548_v58 = vunpack.c.l.b16 %v3487_v12  ;;  %v3490_v12 = vrot.slane %v5950_v38, 5  ;;  %v6010_v45 = vld [vmem:[%s4866_s6 + $0x98] sm:$0xf] }
 0x1fd   : > { %v3303_v36 = vpop.f32.mrf.mxu3  ;;  %v2285_v49 = vsel %vm5111_vm8, %v4264_v11, %v2284_v56 }
 0x1fe   : > { %4441 = vmatmul.msk.bf16.gmra.mxu0 %vm635_vm4, %v3569_v27  ;;  %v3383_v43 = vadd.f32 %v3303_v36, %v2809_v5  ;;  %v2512_v27 = vadd.f32 %v2433_v29, %v5398_v16  ;;  %v3484_v5 = vsel %vm5111_vm8, %v3482_v22, %v3483_v35  ;;  %v4498_v29 = vld [vmem:[%s4866_s6 + $0x80] sm:$0xff]  ;;  %v3068_v35 = vor.u32 %v3067_v2, %v3064_v62 }
 0x1ff   : > { %v2436_v57 = vpop.f32.mrf.mxu1  ;;  %v3547_v14 = vunpack.c.l.b16 %v3484_v5  ;;  %v2288_v62 = vsel %vm5111_vm8, %v2286_v52, %v2287_v18  ;;  %v6004_v5 = vrot.slane %v3081_v47, 5  ;;  %v2343_v56 = vunpack.c.l.b16 %v2285_v49  ;;  %v4635_v49 = vld [vmem:[%s4866_s6 + $0x84] sm:$0xf] }
 0x200   : > { %v3717_v61 = vadd.f32 %v3637_v34, %v3383_v43  ;;  %v3236_v43 = vpack.c.b16 %v3214_v59, %v3213_v31  ;;  %v3069_v2 = vrot.slane %v3068_v35, 4  ;;  %v2513_v59 = vadd.f32 %v2436_v57, %v5409_v10 }
 0x201   : > { %v2344_v11 = vunpack.c.l.b16 %v2288_v62  ;;  %v3085_v57 = vshrl.u32 %v5982_v42, 16  ;;  %v2290_v62 = vrot.slane %v4635_v49, 5 }
 0x202   : > { %v2731_v19 = vpop.f32.mrf.mxu2  ;;  %4277 = vmatmul.msk.bf16.gmra.mxu1 %vm635_vm4, %v2364_v20  ;;  %v3753_v34 = vadd.f32 %v5966_v24, %v3717_v61  ;;  %v3078_v20 = vor.u32 %v3077_v3, %v5972_v8  ;;  %v3074_v10 = vsel %vm4890_vm5, %v3069_v2, %v5972_v8 }
 0x203   : > { %v2810_v16 = vadd.f32 %v2731_v19, %v2512_v27  ;;  %v3639_v36 = vpop.f32.mrf.mxu0  ;;  %v3215_v2 = vunpack.c.l.b16 %v3074_v10 }
 0x204   : > { %v3785_v22 = vmax.f32 %v3753_v34, 0.0  ;;  %v3079_v3 = vrot.slane %v3078_v20, 4  ;;  %v4429_v20 = vrot.slane %v5947_v9, 9 }
 0x205   : > { %v3305_v41 = vpop.f32.mrf.mxu3 }
 0x206   : > { %v3817_v61 = vpack.c.bf16 %v3785_v22, %v3785_v22  ;;  %v3384_v27 = vadd.f32 %v3305_v41, %v2810_v16  ;;  %v3492_v22 = vrot.slane %v3490_v12, 4  ;;  %v2365_v41 = vpack.c.b16 %v2344_v11, %v2343_v56 }
 0x207   : > { %4400 = vmatmul.msk.bf16.gmra.mxu2 %vm635_vm4, %v4498_v29  ;;  %v2438_v19 = vpop.f32.mrf.mxu1  ;;  %v3570_v29 = vpack.c.b16 %v3548_v58, %v3547_v14  ;;  %v3091_v14 = vshll.u32 %v6010_v45, 16  ;;  %v3095_v58 = vshrl.u32 %v6010_v45, 16 }
 0x208   : > { %3850 = vst.msk [vmem:[%s5999_s5] sm:$0xf] %vm3849_vm9, %v3817_v61  ;;  %v3718_v31 = vadd.f32 %v3639_v36, %v3384_v27  ;;  %v3084_v36 = vsel %vm4890_vm5, %v3079_v3, %v6004_v5  ;;  %v3087_v3 = vrot.slane %v3085_v57, 4  ;;  %v4636_v57 = vld [vmem:[%s4866_s6 + $0x88] sm:$0x1] }
 0x20a   : > { %v2734_v34 = vpop.f32.mrf.mxu2  ;;  %v3754_v16 = vadd.f32 %v5966_v24, %v3718_v31  ;;  %4417 = vmatmul.msk.bf16.gmra.mxu3 %vm635_vm4, %v3236_v43  ;;  %v3493_v43 = vrot.slane %v5982_v42, 5  ;;  %v2514_v31 = vadd.f32 %v2438_v19, %v5422_v4  ;;  %v4499_v4 = vld [vmem:[%s4866_s6 + $0x8c] sm:$0xff]  ;;  %v2292_v19 = vrot.slane %v2290_v62, 4 }
 0x20b   : > { %v2811_v52 = vadd.f32 %v2734_v34, %v2513_v59  ;;  %v3642_v35 = vpop.f32.mrf.mxu0  ;;  %v3216_v59 = vunpack.c.l.b16 %v3084_v36  ;;  %v3491_v34 = vsel %vm5111_vm8, %v4429_v20, %v3490_v12  ;;  %v6041_v12 = vld [vmem:[%s4866_s6 + $0x9c] sm:$0x1]  ;;  %v3088_v20 = vor.u32 %v3087_v3, %v6004_v5 }
 0x20c   : > { %v3786_v38 = vmax.f32 %v3754_v16, 0.0  ;;  %v3494_v11 = vsel %vm5111_vm8, %v3492_v22, %v3493_v43  ;;  %v2289_v16 = vrot.slane %v2287_v18, 4  ;;  %v3549_v22 = vunpack.c.l.b16 %v3491_v34  ;;  %v6055_v34 = vld [vmem:[%s4866_s6 + $0xa0] sm:$0xf] }
 0x20d   : > { %v3308_v47 = vpop.f32.mrf.mxu3 }
 0x20e   : > { %v3818_v8 = vpack.c.bf16 %v3786_v38, %v3786_v38  ;;  %4442 = vmatmul.msk.bf16.gmra.mxu0 %vm635_vm4, %v3570_v29  ;;  %v3385_v61 = vadd.f32 %v3308_v47, %v2811_v52  ;;  %v6035_v29 = vrot.slane %v3091_v14, 5  ;;  %v3097_v52 = vrot.slane %v3095_v58, 4 }
 0x20f   : > { %v2441_v27 = vpop.f32.mrf.mxu1  ;;  %v2293_v38 = vrot.slane %v4636_v57, 5  ;;  %v3550_v14 = vunpack.c.l.b16 %v3494_v11  ;;  %v3496_v57 = vrot.slane %v6010_v45, 5 }
 0x210   : > { %3851 = vst.msk [vmem:[%s5999_s5 + $0x4] sm:$0xf] %vm3849_vm9, %v3818_v8  ;;  %v3719_v9 = vadd.f32 %v3642_v35, %v3385_v61  ;;  %v3098_v58 = vor.u32 %v3097_v52, %v6035_v29  ;;  %v3101_v8 = vshll.u32 %v6041_v12, 16 }
 0x211   : > { %v2294_v5 = vsel %vm5111_vm8, %v2292_v19, %v2293_v38 }
 0x212   : > { %v2736_v56 = vpop.f32.mrf.mxu2  ;;  %4278 = vmatmul.msk.bf16.gmra.mxu1 %vm635_vm4, %v2365_v41  ;;  %v3755_v35 = vadd.f32 %v5966_v24, %v3719_v9  ;;  %v3237_v41 = vpack.c.b16 %v3216_v59, %v3215_v2  ;;  %v3089_v2 = vrot.slane %v3088_v20, 4  ;;  %v2515_v59 = vadd.f32 %v2441_v27, %v5438_v32 }
 0x213   : > { %v2812_v10 = vadd.f32 %v2736_v56, %v2514_v31  ;;  %v3644_v36 = vpop.f32.mrf.mxu0  ;;  %v2291_v31 = vsel %vm5111_vm8, %v2289_v16, %v2290_v62  ;;  %v6058_v56 = vld [vmem:[%s4866_s6 + $0xa4] sm:$0xf]  ;;  %v3571_v16 = vpack.c.b16 %v3550_v14, %v3549_v22  ;;  %v3106_v32 = vshrl.u32 %v6055_v34, 16  ;;  %v4637_v14 = vld [vmem:[%s4866_s6 + $0x90] sm:$0xf] }
 0x214   : > { %v3787_v47 = vmax.f32 %v3755_v35, 0.0  ;;  %v2345_v52 = vunpack.c.l.b16 %v2291_v31  ;;  %v2346_v35 = vunpack.c.l.b16 %v2294_v5  ;;  %v3109_v27 = vshll.u32 %v6055_v34, 16 }
 0x215   : > { %v3310_v18 = vpop.f32.mrf.mxu3  ;;  %v3119_v20 = vshrl.u32 %v6058_v56, 16  ;;  %v3495_v22 = vrot.slane %v3493_v43, 4  ;;  %v3498_v5 = vrot.slane %v3496_v57, 4 }
 0x216   : > { %v3819_v61 = vpack.c.bf16 %v3787_v47, %v3787_v47  ;;  %v3386_v49 = vadd.f32 %v3310_v18, %v2812_v10  ;;  %v3099_v10 = vrot.slane %v3098_v58, 4  ;;  %v3094_v18 = vsel %vm4890_vm5, %v3089_v2, %v6035_v29 }
 0x217   : > { %4401 = vmatmul.msk.bf16.gmra.mxu2 %vm635_vm4, %v4499_v4  ;;  %v2443_v9 = vpop.f32.mrf.mxu1  ;;  %v3103_v4 = vrot.slane %v3101_v8, 5  ;;  %v2297_v8 = vrot.slane %v4637_v14, 5  ;;  %v3499_v29 = vrot.slane %v6041_v12, 5  ;;  %v3108_v2 = vrot.slane %v3106_v32, 4  ;;  %v4638_v12 = vld [vmem:[%s4866_s6 + $0x8c] sm:$0xf] }
 0x218   : > { %3852 = vst.msk [vmem:[%s5999_s5 + $0x8] sm:$0xf] %vm3849_vm9, %v3819_v61  ;;  %v3720_v3 = vadd.f32 %v3644_v36, %v3386_v49  ;;  %v3115_v36 = vshll.u32 %v6058_v56, 16  ;;  %v2516_v43 = vadd.f32 %v2443_v9, %v5448_v40  ;;  %v3497_v40 = vsel %vm5111_vm8, %v3495_v22, %v3496_v57 }
 0x219   : > { %v3104_v45 = vsel %vm4890_vm5, %v3099_v10, %v3103_v4 }
 0x21a   : > { %v2739_v11 = vpop.f32.mrf.mxu2  ;;  %v3756_v62 = vadd.f32 %v5966_v24, %v3720_v3  ;;  %4418 = vmatmul.msk.bf16.gmra.mxu3 %vm635_vm4, %v3237_v41  ;;  %v2366_v41 = vpack.c.b16 %v2346_v35, %v2345_v52  ;;  %v3111_v3 = vrot.slane %v3109_v27, 5  ;;  %v3217_v52 = vunpack.c.l.b16 %v3094_v18  ;;  %v6083_v35 = vld [vmem:[%s4866_s6 + $0xa8] sm:$0xf] }
 0x21b   : > { %v2813_v19 = vadd.f32 %v2739_v11, %v2515_v59  ;;  %v3647_v38 = vpop.f32.mrf.mxu0  ;;  %v6077_v59 = vrot.slane %v3115_v36, 5  ;;  %v3121_v11 = vrot.slane %v3119_v20, 4  ;;  %v3218_v4 = vunpack.c.l.b16 %v3104_v45 }
 0x21c   : > { %v3788_v47 = vmax.f32 %v3756_v62, 0.0  ;;  %v4265_v62 = vrot.slane %v4638_v12, 9  ;;  %v3500_v20 = vsel %vm5111_vm8, %v3498_v5, %v3499_v29  ;;  %v3551_v5 = vunpack.c.l.b16 %v3497_v40 }
 0x21d   : > { %v3313_v58 = vpop.f32.mrf.mxu3  ;;  %v3122_v18 = vor.u32 %v3121_v11, %v6077_v59  ;;  %v3238_v14 = vpack.c.b16 %v3218_v4, %v3217_v52  ;;  %v3552_v29 = vunpack.c.l.b16 %v3500_v20  ;;  %v3503_v12 = vrot.slane %v6058_v56, 5 }
 0x21e   : > { %v3820_v61 = vpack.c.bf16 %v3788_v47, %v3788_v47  ;;  %4443 = vmatmul.msk.bf16.gmra.mxu0 %vm635_vm4, %v3571_v16  ;;  %v3387_v49 = vadd.f32 %v3313_v58, %v2813_v19  ;;  %v2299_v16 = vrot.slane %v2297_v8, 4  ;;  %v6088_v19 = vld [vmem:[%s4866_s6 + $0x94] sm:$0xf]  ;;  %v3112_v47 = vor.u32 %v3111_v3, %v3108_v2 }
 0x21f   : > { %v2446_v31 = vpop.f32.mrf.mxu1  ;;  %v2300_v32 = vrot.slane %v6088_v19, 5  ;;  %v3125_v58 = vshll.u32 %v6083_v35, 16  ;;  %v3123_v11 = vrot.slane %v3122_v18, 4  ;;  %v4430_v20 = vrot.slane %v6055_v34, 9 }
 0x220   : > { %3853 = vst.msk [vmem:[%s5999_s5 + $0xc] sm:$0xf] %vm3849_vm9, %v3820_v61  ;;  %v3721_v42 = vadd.f32 %v3647_v38, %v3387_v49  ;;  %v4500_v38 = vld [vmem:[%s4866_s6 + $0x94] sm:$0xff]  ;;  %v2298_v61 = vsel %vm5111_vm8, %v4265_v62, %v2297_v8  ;;  %v3113_v3 = vrot.slane %v3112_v47, 4  ;;  %v3505_v18 = vrot.slane %v3503_v12, 4 }
 0x221   : > { %v2301_v57 = vsel %vm5111_vm8, %v2299_v16, %v2300_v32  ;;  %v2347_v52 = vunpack.c.l.b16 %v2298_v61  ;;  %v3572_v16 = vpack.c.b16 %v3552_v29, %v3551_v5 }
 0x222   : > { %v2741_v10 = vpop.f32.mrf.mxu2  ;;  %4279 = vmatmul.msk.bf16.gmra.mxu1 %vm635_vm4, %v2366_v41  ;;  %v3757_v27 = vadd.f32 %v5966_v24, %v3721_v42  ;;  %v6106_v42 = vrot.slane %v3125_v58, 5  ;;  %v3118_v40 = vsel %vm4890_vm5, %v3113_v3, %v6077_v59  ;;  %v3506_v58 = vrot.slane %v6083_v35, 5 }
 0x223   : > { %v2814_v36 = vadd.f32 %v2741_v10, %v2516_v43  ;;  %v3649_v9 = vpop.f32.mrf.mxu0  ;;  %v2517_v43 = vadd.f32 %v2446_v31, %v5458_v63  ;;  %v2348_v10 = vunpack.c.l.b16 %v2301_v57  ;;  %v3129_v63 = vshrl.u32 %v6083_v35, 16  ;;  %v4640_v57 = vld [vmem:[%s4866_s6 + $0x98] sm:$0xf] }
 0x224   : > { %v3789_v41 = vmax.f32 %v3757_v27, 0.0  ;;  %v3128_v56 = vsel %vm4890_vm5, %v3123_v11, %v6106_v42  ;;  %v3504_v11 = vsel %vm5111_vm8, %v4430_v20, %v3503_v12  ;;  %v4641_v12 = vld [vmem:[%s4866_s6 + $0x9c] sm:$0x1] }
 0x225   : > { %v3315_v45 = vpop.f32.mrf.mxu3  ;;  %v3131_v5 = vrot.slane %v3129_v63, 4  ;;  %v3220_v3 = vunpack.c.l.b16 %v3128_v56 }
 0x226   : > { %v3821_v22 = vpack.c.bf16 %v3789_v41, %v3789_v41  ;;  %v3388_v49 = vadd.f32 %v3315_v45, %v2814_v36  ;;  %v6115_v36 = vld [vmem:[%s4866_s6 + $0xac] sm:$0xf] }
 0x227   : > { %4402 = vmatmul.msk.bf16.gmra.mxu2 %vm635_vm4, %v4500_v38  ;;  %v2448_v2 = vpop.f32.mrf.mxu1  ;;  %v3135_v41 = vshll.u32 %v6115_v36, 16  ;;  %v3139_v45 = vshrl.u32 %v6115_v36, 16  ;;  %v3132_v63 = vor.u32 %v3131_v5, %v6106_v42  ;;  %v6162_v5 = vld [vmem:[%s4866_s6 + $0xb4] sm:$0xf] }
 0x228   : > { %3854 = vst.msk [vmem:[%s5999_s5 + $0x10] sm:$0xf] %vm3849_vm9, %v3821_v22  ;;  %v3722_v8 = vadd.f32 %v3649_v9, %v3388_v49  ;;  %v2367_v9 = vpack.c.b16 %v2348_v10, %v2347_v52  ;;  %v2303_v22 = vrot.slane %v4640_v57, 5  ;;  %v3219_v49 = vunpack.c.l.b16 %v3118_v40 }
 0x229   : > { %v2518_v29 = vadd.f32 %v2448_v2, %v5471_v30  ;;  %v2302_v52 = vrot.slane %v2300_v32, 4  ;;  %v6142_v10 = vrot.slane %v3135_v41, 5  ;;  %v3553_v32 = vunpack.c.l.b16 %v3504_v11 }
 0x22a   : > { %v2744_v4 = vpop.f32.mrf.mxu2  ;;  %v3758_v62 = vadd.f32 %v5966_v24, %v3722_v8  ;;  %4419 = vmatmul.msk.bf16.gmra.mxu3 %vm635_vm4, %v3238_v14 }
 0x22b   : > { %v2815_v27 = vadd.f32 %v2744_v4, %v2517_v43  ;;  %v3652_v38 = vpop.f32.mrf.mxu0  ;;  %v3507_v43 = vsel %vm5111_vm8, %v3505_v18, %v3506_v58  ;;  %v3141_v4 = vrot.slane %v3139_v45, 4 }
 0x22c   : > { %v3790_v31 = vmax.f32 %v3758_v62, 0.0  ;;  %v4501_v62 = vld [vmem:[%s4866_s6 + $0xa0] sm:$0xff]  ;;  %v3554_v56 = vunpack.c.l.b16 %v3507_v43  ;;  %v3509_v43 = vrot.slane %v6115_v36, 5 }
 0x22d   : > { %v3318_v47 = vpop.f32.mrf.mxu3  ;;  %v3142_v20 = vor.u32 %v3141_v4, %v6142_v10 }
 0x22e   : > { %v3822_v59 = vpack.c.bf16 %v3790_v31, %v3790_v31  ;;  %4444 = vmatmul.msk.bf16.gmra.mxu0 %vm635_vm4, %v3572_v16  ;;  %v3389_v14 = vadd.f32 %v3318_v47, %v2815_v27  ;;  %v2305_v16 = vrot.slane %v2303_v22, 4  ;;  %v2306_v27 = vrot.slane %v4641_v12, 5 }
 0x22f   : > { %v2451_v61 = vpop.f32.mrf.mxu1  ;;  %v3143_v4 = vrot.slane %v3142_v20, 4 }
 0x230   : > { %3855 = vst.msk [vmem:[%s5999_s5 + $0x14] sm:$0xf] %vm3849_vm9, %v3822_v59  ;;  %v3723_v34 = vadd.f32 %v3652_v38, %v3389_v14  ;;  %v6148_v38 = vld [vmem:[%s4866_s6 + $0xb0] sm:$0x1]  ;;  %v2304_v59 = vsel %vm5111_vm8, %v2302_v52, %v2303_v22  ;;  %v2307_v42 = vsel %vm5111_vm8, %v2305_v16, %v2306_v27  ;;  %v3133_v14 = vrot.slane %v3132_v63, 4 }
 0x231   : > { %v3145_v47 = vshll.u32 %v6148_v38, 16  ;;  %v2349_v11 = vunpack.c.l.b16 %v2304_v59  ;;  %v3508_v63 = vrot.slane %v3506_v58, 4 }
 0x232   : > { %v2746_v8 = vpop.f32.mrf.mxu2  ;;  %4280 = vmatmul.msk.bf16.gmra.mxu1 %vm635_vm4, %v2367_v9  ;;  %v3759_v30 = vadd.f32 %v5966_v24, %v3723_v34  ;;  %v3239_v9 = vpack.c.b16 %v3220_v3, %v3219_v49  ;;  %v2519_v49 = vadd.f32 %v2451_v61, %v5483_v21  ;;  %v6165_v34 = vld [vmem:[%s4866_s6 + $0xb8] sm:$0xf]  ;;  %v3150_v21 = vshrl.u32 %v6162_v5, 16 }
 0x233   : > { %v2816_v2 = vadd.f32 %v2746_v8, %v2518_v29  ;;  %v3654_v40 = vpop.f32.mrf.mxu0  ;;  %v3573_v29 = vpack.c.b16 %v3554_v56, %v3553_v32  ;;  %v2350_v8 = vunpack.c.l.b16 %v2307_v42  ;;  %v3153_v61 = vshll.u32 %v6162_v5, 16 }
 0x234   : > { %v3791_v31 = vmax.f32 %v3759_v30, 0.0  ;;  %v3147_v30 = vrot.slane %v3145_v47, 5  ;;  %v3163_v16 = vshrl.u32 %v6165_v34, 16  ;;  %v3138_v36 = vsel %vm4890_vm5, %v3133_v14, %v6142_v10  ;;  %v4642_v47 = vld [vmem:[%s4866_s6 + $0xa4] sm:$0xf] }
 0x235   : > { %v3320_v19 = vpop.f32.mrf.mxu3  ;;  %v2310_v10 = vrot.slane %v4642_v47, 5  ;;  %v3221_v42 = vunpack.c.l.b16 %v3138_v36  ;;  %v6190_v14 = vld [vmem:[%s4866_s6 + $0xbc] sm:$0xf] }
 0x236   : > { %v3823_v18 = vpack.c.bf16 %v3791_v31, %v3791_v31  ;;  %v3390_v41 = vadd.f32 %v3320_v19, %v2816_v2  ;;  %v3511_v31 = vrot.slane %v3509_v43, 4  ;;  %v3148_v20 = vsel %vm4890_vm5, %v3143_v4, %v3147_v30  ;;  %v4502_v4 = vld [vmem:[%s4866_s6 + $0xa8] sm:$0xff] }
 0x237   : > { %4403 = vmatmul.msk.bf16.gmra.mxu2 %vm635_vm4, %v4501_v62  ;;  %v2453_v45 = vpop.f32.mrf.mxu1  ;;  %v3159_v62 = vshll.u32 %v6165_v34, 16  ;;  %v3165_v35 = vrot.slane %v3163_v16, 4 }
 0x238   : > { %3856 = vst.msk [vmem:[%s5999_s5 + $0x18] sm:$0xf] %vm3849_vm9, %v3823_v18  ;;  %v3724_v57 = vadd.f32 %v3654_v40, %v3390_v41  ;;  %v2368_v40 = vpack.c.b16 %v2350_v8, %v2349_v11  ;;  %v3152_v18 = vrot.slane %v3150_v21, 4  ;;  %v3155_v41 = vrot.slane %v3153_v61, 5  ;;  %v4643_v11 = vld [vmem:[%s4866_s6 + $0xa0] sm:$0xf] }
 0x239   : > { %v6184_v59 = vrot.slane %v3159_v62, 5  ;;  %v4266_v8 = vrot.slane %v4643_v11, 9  ;;  %v3169_v62 = vshll.u32 %v6190_v14, 16 }
 0x23a   : > { %v2749_v3 = vpop.f32.mrf.mxu2  ;;  %v3760_v22 = vadd.f32 %v5966_v24, %v3724_v57  ;;  %4420 = vmatmul.msk.bf16.gmra.mxu3 %vm635_vm4, %v3239_v9  ;;  %v3512_v9 = vrot.slane %v6148_v38, 5  ;;  %v2520_v38 = vadd.f32 %v2453_v45, %v5497_v50  ;;  %v2312_v50 = vrot.slane %v2310_v10, 4  ;;  %v4644_v45 = vld [vmem:[%s4866_s6 + $0xa8] sm:$0xf] }
 0x23b   : > { %v2817_v52 = vadd.f32 %v2749_v3, %v2519_v49  ;;  %v3657_v2 = vpop.f32.mrf.mxu0  ;;  %v3222_v49 = vunpack.c.l.b16 %v3148_v20  ;;  %v2313_v30 = vrot.slane %v4644_v45, 5  ;;  %v3156_v21 = vor.u32 %v3155_v41, %v3152_v18  ;;  %v6420_v41 = vld [vmem:[#allocation5_spill] sm:$0xff] }
 0x23c   : > { %v3792_v12 = vmax.f32 %v3760_v22, 0.0  ;;  %v3513_v3 = vsel %vm5111_vm8, %v3511_v31, %v3512_v9  ;;  %v3166_v61 = vor.u32 %v3165_v35, %v6184_v59  ;;  %v2311_v9 = vsel %vm5111_vm8, %v4266_v8, %v2310_v10 }
 0x23d   : > { %v3323_v27 = vpop.f32.mrf.mxu3  ;;  %v6208_v47 = vrot.slane %v3169_v62, 5 }
 0x23e   : > { %v3824_v19 = vpack.c.bf16 %v3792_v12, %v3792_v12  ;;  %4445 = vmatmul.msk.bf16.gmra.mxu0 %vm635_vm4, %v3573_v29  ;;  %v3391_v32 = vadd.f32 %v3323_v27, %v2817_v52  ;;  %v3510_v29 = vsel %vm5111_vm8, %v3508_v63, %v3509_v43  ;;  %v3240_v12 = vpack.c.b16 %v3222_v49, %v3221_v42 }
 0x23f   : > { %v2456_v56 = vpop.f32.mrf.mxu1  ;;  %v3555_v36 = vunpack.c.l.b16 %v3510_v29  ;;  %v3556_v27 = vunpack.c.l.b16 %v3513_v3  ;;  %v3167_v20 = vrot.slane %v3166_v61, 4  ;;  %v2351_v42 = vunpack.c.l.b16 %v2311_v9  ;;  %v6217_v3 = vld [vmem:[%s4866_s6 + $0xc0] sm:$0xf] }
 0x240   : > { %3857 = vst.msk [vmem:[%s5999_s5 + $0x1c] sm:$0xf] %vm3849_vm9, %v3824_v19  ;;  %v3725_v58 = vadd.f32 %v3657_v2, %v3391_v32  ;;  %v2314_v19 = vsel %vm5111_vm8, %v2312_v50, %v2313_v30  ;;  %v3157_v32 = vrot.slane %v3156_v21, 4  ;;  %v2521_v35 = vadd.f32 %v2456_v56, %v6420_v41 }
 0x241   : > { %v3574_v49 = vpack.c.b16 %v3556_v27, %v3555_v36  ;;  %v3179_v21 = vshll.u32 %v6217_v3, 16  ;;  %v3183_v61 = vshrl.u32 %v6217_v3, 16 }
 0x242   : > { %v2751_v57 = vpop.f32.mrf.mxu2  ;;  %4281 = vmatmul.msk.bf16.gmra.mxu1 %vm635_vm4, %v2368_v40  ;;  %v3761_v22 = vadd.f32 %v5966_v24, %v3725_v58  ;;  %v3516_v58 = vrot.slane %v6165_v34, 5  ;;  %v3162_v8 = vsel %vm4890_vm5, %v3157_v32, %v6184_v59  ;;  %v3172_v34 = vsel %vm4890_vm5, %v3167_v20, %v6208_v47 }
 0x243   : > { %v2818_v52 = vadd.f32 %v2751_v57, %v2520_v38  ;;  %v3659_v2 = vpop.f32.mrf.mxu0  ;;  %v2352_v57 = vunpack.c.l.b16 %v2314_v19  ;;  %v3224_v36 = vunpack.c.l.b16 %v3172_v34  ;;  %v2315_v20 = vrot.slane %v2313_v30, 4 }
 0x244   : > { %v3793_v43 = vmax.f32 %v3761_v22, 0.0  ;;  %v4431_v22 = vrot.slane %v6162_v5, 9  ;;  %v3223_v5 = vunpack.c.l.b16 %v3162_v8  ;;  %v3181_v41 = vrot.slane %v3179_v21, 5 }
 0x245   : > { %v3325_v16 = vpop.f32.mrf.mxu3  ;;  %v2369_v45 = vpack.c.b16 %v2352_v57, %v2351_v42  ;;  %v4503_v57 = vld [vmem:[%s4866_s6 + $0xb4] sm:$0xff] }
 0x246   : > { %v3825_v40 = vpack.c.bf16 %v3793_v43, %v3793_v43  ;;  %v3392_v63 = vadd.f32 %v3325_v16, %v2818_v52  ;;  %v3518_v52 = vrot.slane %v3516_v58, 4  ;;  %v4645_v16 = vld [vmem:[%s4866_s6 + $0xac] sm:$0xf]  ;;  %v3517_v9 = vsel %vm5111_vm8, %v4431_v22, %v3516_v58  ;;  %v4325_v58 = vld [vmem:[%s4866_s6 + $0xc4] sm:$0x1] }
 0x247   : > { %4404 = vmatmul.msk.bf16.gmra.mxu2 %vm635_vm4, %v4502_v4  ;;  %v2458_v31 = vpop.f32.mrf.mxu1  ;;  %v3519_v4 = vrot.slane %v6190_v14, 5  ;;  %v3241_v8 = vpack.c.b16 %v3224_v36, %v3223_v5  ;;  %v3557_v34 = vunpack.c.l.b16 %v3517_v9 }
 0x248   : > { %3858 = vst.msk [vmem:[%s5999_s5 + $0x20] sm:$0xf] %vm3849_vm9, %v3825_v40  ;;  %v3726_v18 = vadd.f32 %v3659_v2, %v3392_v63  ;;  %v3173_v2 = vshrl.u32 %v6190_v14, 16  ;;  %v6421_v40 = vld [vmem:[#allocation6_spill] sm:$0xff] }
 0x249   : > { %v2522_v63 = vadd.f32 %v2458_v31, %v6421_v40  ;;  %v3520_v19 = vsel %vm5111_vm8, %v3518_v52, %v3519_v4 }
 0x24a   : > { %v2754_v38 = vpop.f32.mrf.mxu2  ;;  %v3762_v10 = vadd.f32 %v5966_v24, %v3726_v18  ;;  %4421 = vmatmul.msk.bf16.gmra.mxu3 %vm635_vm4, %v3240_v12  ;;  %v2316_v12 = vrot.slane %v4645_v16, 5  ;;  %v3175_v18 = vrot.slane %v3173_v2, 4  ;;  %v3558_v22 = vunpack.c.l.b16 %v3520_v19 }
 0x24b   : > { %v2819_v29 = vadd.f32 %v2754_v38, %v2521_v35  ;;  %v3662_v11 = vpop.f32.mrf.mxu0  ;;  %v3185_v35 = vrot.slane %v3183_v61, 4 }
 0x24c   : > { %v3794_v56 = vmax.f32 %v3762_v10, 0.0  ;;  %v2318_v31 = vrot.slane %v2316_v12, 4  ;;  %v4646_v10 = vld [vmem:[%s4866_s6 + $0xb0] sm:$0x1]  ;;  %v3176_v30 = vor.u32 %v3175_v18, %v6208_v47  ;;  %v2317_v61 = vsel %vm5111_vm8, %v2315_v20, %v2316_v12 }
 0x24d   : > { %v3328_v50 = vpop.f32.mrf.mxu3  ;;  %v3186_v52 = vor.u32 %v3185_v35, %v3181_v41  ;;  %v3575_v5 = vpack.c.b16 %v3558_v22, %v3557_v34  ;;  %v2353_v36 = vunpack.c.l.b16 %v2317_v61  ;;  %v3522_v20 = vrot.slane %v6217_v3, 5  ;;  %v4504_v22 = vld [vmem:[%s4866_s6 + $0xbc] sm:$0xff] }
 0x24e   : > { %v3826_v59 = vpack.c.bf16 %v3794_v56, %v3794_v56  ;;  %4446 = vmatmul.msk.bf16.gmra.mxu0 %vm635_vm4, %v3574_v49  ;;  %v3393_v62 = vadd.f32 %v3328_v50, %v2819_v29  ;;  %v2319_v49 = vrot.slane %v4646_v10, 5  ;;  %v3189_v50 = vshll.u32 %v4325_v58, 16 }
 0x24f   : > { %v2461_v43 = vpop.f32.mrf.mxu1  ;;  %v3177_v40 = vrot.slane %v3176_v30, 4  ;;  %v3187_v19 = vrot.slane %v3186_v52, 4  ;;  %v3521_v10 = vrot.slane %v3519_v4, 4  ;;  %v3525_v3 = vrot.slane %v4325_v58, 5 }
 0x250   : > { %3859 = vst.msk [vmem:[%s5999_s5 + $0x24] sm:$0xf] %vm3849_vm9, %v3826_v59  ;;  %v3727_v27 = vadd.f32 %v3662_v11, %v3393_v62  ;;  %v2320_v59 = vsel %vm5111_vm8, %v2318_v31, %v2319_v49  ;;  %v2523_v16 = vadd.f32 %v2461_v43, %v5562_v26  ;;  %v3191_v12 = vrot.slane %v3189_v50, 5 }
 0x251   : > { %v3524_v49 = vrot.slane %v3522_v20, 4  ;;  %v3523_v14 = vsel %vm5111_vm8, %v3521_v10, %v3522_v20 }
 0x252   : > { %v2756_v32 = vpop.f32.mrf.mxu2  ;;  %4282 = vmatmul.msk.bf16.gmra.mxu1 %vm635_vm4, %v2369_v45  ;;  %v3763_v38 = vadd.f32 %v5966_v24, %v3727_v27  ;;  %v2354_v27 = vunpack.c.l.b16 %v2320_v59  ;;  %v3192_v31 = vsel %vm4890_vm5, %v3187_v19, %v3191_v12 }
 0x253   : > { %v2820_v42 = vadd.f32 %v2756_v32, %v2522_v63  ;;  %v3664_v29 = vpop.f32.mrf.mxu0  ;;  %v3526_v4 = vsel %vm5111_vm8, %v3524_v49, %v3525_v3 }
 0x254   : > { %v3795_v11 = vmax.f32 %v3763_v38, 0.0  ;;  %v2370_v38 = vpack.c.b16 %v2354_v27, %v2353_v36 }
 0x255   : > { %v3330_v56 = vpop.f32.mrf.mxu3 }
 0x256   : > { %v3827_v45 = vpack.c.bf16 %v3795_v11, %v3795_v11  ;;  %v3394_v2 = vadd.f32 %v3330_v56, %v2820_v42  ;;  %v3226_v56 = vunpack.c.l.b16 %v3192_v31 }
 0x257   : > { %4405 = vmatmul.msk.bf16.gmra.mxu2 %vm635_vm4, %v4503_v57  ;;  %v2463_v21 = vpop.f32.mrf.mxu1  ;;  %v3182_v57 = vsel %vm4890_vm5, %v3177_v40, %v3181_v41 }
 0x258   : > { %3860 = vst.msk [vmem:[%s5999_s5 + $0x28] sm:$0xf] %vm3849_vm9, %v3827_v45  ;;  %v3728_v62 = vadd.f32 %v3664_v29, %v3394_v2  ;;  %v2524_v11 = vadd.f32 %v2463_v21, %v5589_v28  ;;  %v3225_v34 = vunpack.c.l.b16 %v3182_v57  ;;  %v3559_v2 = vunpack.c.l.b16 %v3523_v14 }
 0x259   : > { %v3560_v21 = vunpack.c.l.b16 %v3526_v4 }
 0x25a   : > { %v2759_v47 = vpop.f32.mrf.mxu2  ;;  %v3764_v63 = vadd.f32 %v5966_v24, %v3728_v62  ;;  %4422 = vmatmul.msk.bf16.gmra.mxu3 %vm635_vm4, %v3241_v8  ;;  %v3242_v28 = vpack.c.b16 %v3226_v56, %v3225_v34 }
 0x25b   : > { %v2821_v9 = vadd.f32 %v2759_v47, %v2523_v16  ;;  %v3667_v32 = vpop.f32.mrf.mxu0 }
 0x25c   : > { %v3796_v18 = vmax.f32 %v3764_v63, 0.0 }
 0x25d   : > { %v3333_v35 = vpop.f32.mrf.mxu3 }
 0x25e   : > { %v3828_v26 = vpack.c.bf16 %v3796_v18, %v3796_v18  ;;  %4447 = vmatmul.msk.bf16.gmra.mxu0 %vm635_vm4, %v3575_v5  ;;  %v3395_v43 = vadd.f32 %v3333_v35, %v2821_v9  ;;  %v3576_v5 = vpack.c.b16 %v3560_v21, %v3559_v2 }
 0x25f   : > { %v2466_v42 = vpop.f32.mrf.mxu1 }
 0x260   : > { %3861 = vst.msk [vmem:[%s5999_s5 + $0x2c] sm:$0xf] %vm3849_vm9, %v3828_v26  ;;  %v3729_v29 = vadd.f32 %v3667_v32, %v3395_v43  ;;  %v2525_v62 = vadd.f32 %v2466_v42, %v5605_v60 }
 0x262   : > { %v2761_v8 = vpop.f32.mrf.mxu2  ;;  %4283 = vmatmul.msk.bf16.gmra.mxu1 %vm635_vm4, %v2370_v38  ;;  %v3765_v41 = vadd.f32 %v5966_v24, %v3729_v29 }
 0x263   : > { %v2822_v39 = vadd.f32 %v2761_v8, %v2524_v11  ;;  %v3669_v30 = vpop.f32.mrf.mxu0 }
 0x264   : > { %v3797_v58 = vmax.f32 %v3765_v41, 0.0 }
 0x265   : > { %v3335_v52 = vpop.f32.mrf.mxu3 }
 0x266   : > { %v3829_v50 = vpack.c.bf16 %v3797_v58, %v3797_v58  ;;  %v3396_v45 = vadd.f32 %v3335_v52, %v2822_v39 }
 0x267   : > { %4406 = vmatmul.msk.bf16.gmra.mxu2 %vm635_vm4, %v4504_v22  ;;  %v2468_v61 = vpop.f32.mrf.mxu1 }
 0x268   : > { %3862 = vst.msk [vmem:[%s5999_s5 + $0x30] sm:$0xf] %vm3849_vm9, %v3829_v50  ;;  %v3730_v59 = vadd.f32 %v3669_v30, %v3396_v45  ;;  %v2526_v60 = vadd.f32 %v2468_v61, %v5624_v33 }
 0x26a   : > { %v2764_v16 = vpop.f32.mrf.mxu2  ;;  %v3766_v25 = vadd.f32 %v5966_v24, %v3730_v59  ;;  %4423 = vmatmul.msk.bf16.gmra.mxu3 %vm635_vm4, %v3242_v28 }
 0x26b   : > { %v2823_v47 = vadd.f32 %v2764_v16, %v2525_v62  ;;  %v3672_v36 = vpop.f32.mrf.mxu0 }
 0x26c   : > { %v3798_v27 = vmax.f32 %v3766_v25, 0.0 }
 0x26d   : > { %v3338_v40 = vpop.f32.mrf.mxu3 }
 0x26e   : > { %v3830_v63 = vpack.c.bf16 %v3798_v27, %v3798_v27  ;;  %4448 = vmatmul.msk.bf16.gmra.mxu0 %vm635_vm4, %v3576_v5  ;;  %v3397_v9 = vadd.f32 %v3338_v40, %v2823_v47 }
 0x26f   : > { %v2471_v19 = vpop.f32.mrf.mxu1 }
 0x270   : > { %3863 = vst.msk [vmem:[%s5999_s5 + $0x34] sm:$0xf] %vm3849_vm9, %v3830_v63  ;;  %v3731_v12 = vadd.f32 %v3672_v36, %v3397_v9  ;;  %v2527_v10 = vadd.f32 %v2471_v19, %v5638_v1 }
 0x272   : > { %v2766_v32 = vpop.f32.mrf.mxu2  ;;  %v3767_v20 = vadd.f32 %v5966_v24, %v3731_v12 }
 0x273   : > { %v2824_v18 = vadd.f32 %v2766_v32, %v2526_v60  ;;  %v3674_v35 = vpop.f32.mrf.mxu0 }
 0x274   : > { %v3799_v38 = vmax.f32 %v3767_v20, 0.0 }
 0x275   : > { %v3340_v26 = vpop.f32.mrf.mxu3 }
 0x276   : > { %v3831_v43 = vpack.c.bf16 %v3799_v38, %v3799_v38  ;;  %v3398_v42 = vadd.f32 %v3340_v26, %v2824_v18 }
 0x277   : > { %v2473_v57 = vpop.f32.mrf.mxu1 }
 0x278   : > { %3864 = vst.msk [vmem:[%s5999_s5 + $0x38] sm:$0xf] %vm3849_vm9, %v3831_v43  ;;  %v3732_v31 = vadd.f32 %v3674_v35, %v3398_v42  ;;  %v2528_v22 = vadd.f32 %v2473_v57, %v5666_v23 }
 0x27a   : > { %v2769_v49 = vpop.f32.mrf.mxu2  ;;  %v3768_v3 = vadd.f32 %v5966_v24, %v3732_v31 }
 0x27b   : > { %v2825_v33 = vadd.f32 %v2769_v49, %v2527_v10  ;;  %v3677_v29 = vpop.f32.mrf.mxu0 }
 0x27c   : > { %v3800_v11 = vmax.f32 %v3768_v3, 0.0 }
 0x27d   : > { %v3343_v8 = vpop.f32.mrf.mxu3 }
 0x27e   : > { %v3832_v34 = vpack.c.bf16 %v3800_v11, %v3800_v11  ;;  %v3399_v56 = vadd.f32 %v3343_v8, %v2825_v33 }
 0x27f   : > { %v2476_v41 = vpop.f32.mrf.mxu1 }
 0x280   : > { %3865 = vst.msk [vmem:[%s5999_s5 + $0x3c] sm:$0xf] %vm3849_vm9, %v3832_v34  ;;  %v3733_v39 = vadd.f32 %v3677_v29, %v3399_v56  ;;  %v2529_v21 = vadd.f32 %v2476_v41, %v5682_v7 }
 0x282   : > { %v2771_v30 = vpop.f32.mrf.mxu2  ;;  %v3769_v14 = vadd.f32 %v5966_v24, %v3733_v39 }
 0x283   : > { %v2826_v1 = vadd.f32 %v2771_v30, %v2528_v22  ;;  %v3679_v4 = vpop.f32.mrf.mxu0 }
 0x284   : > { %v3801_v58 = vmax.f32 %v3769_v14, 0.0 }
 0x285   : > { %v3345_v52 = vpop.f32.mrf.mxu3 }
 0x286   : > { %v3833_v28 = vpack.c.bf16 %v3801_v58, %v3801_v58  ;;  %v3400_v50 = vadd.f32 %v3345_v52, %v2826_v1 }
 0x287   : > { %v2478_v45 = vpop.f32.mrf.mxu1 }
 0x288   : > { %3866 = vst.msk [vmem:[%s5999_s5 + $0x40] sm:$0xf] %vm3849_vm9, %v3833_v28  ;;  %v3734_v2 = vadd.f32 %v3679_v4, %v3400_v50  ;;  %v2530_v40 = vadd.f32 %v2478_v45, %v5708_v46 }
 0x28a   : > { %v2774_v61 = vpop.f32.mrf.mxu2  ;;  %v3770_v59 = vadd.f32 %v5966_v24, %v3734_v2 }
 0x28b   : > { %v2827_v23 = vadd.f32 %v2774_v61, %v2529_v21  ;;  %v3682_v62 = vpop.f32.mrf.mxu0 }
 0x28c   : > { %v3802_v16 = vmax.f32 %v3770_v59, 0.0 }
 0x28d   : > { %v3348_v25 = vpop.f32.mrf.mxu3 }
 0x28e   : > { %v3834_v5 = vpack.c.bf16 %v3802_v16, %v3802_v16  ;;  %v3401_v47 = vadd.f32 %v3348_v25, %v2827_v23 }
 0x28f   : > { %v2481_v36 = vpop.f32.mrf.mxu1 }
 0x290   : > { %3867 = vst.msk [vmem:[%s5999_s5 + $0x44] sm:$0xf] %vm3849_vm9, %v3834_v5  ;;  %v3735_v27 = vadd.f32 %v3682_v62, %v3401_v47  ;;  %v2531_v38 = vadd.f32 %v2481_v36, %v5723_v17  ;;  %v6312_v17 = vld [vmem:[%s6408_s2] ss:$0 sm:$0xff] }
 0x292   : > { %v2776_v63 = vpop.f32.mrf.mxu2  ;;  %v3771_v9 = vadd.f32 %v5966_v24, %v3735_v27 }
 0x293   : > { %v2828_v7 = vadd.f32 %v2776_v63, %v2530_v40  ;;  %v3684_v19 = vpop.f32.mrf.mxu0 }
 0x294   : > { %v3803_v12 = vmax.f32 %v3771_v9, 0.0 }
 0x295   : > { %v3350_v60 = vpop.f32.mrf.mxu3 }
 0x296   : > { %v3835_v32 = vpack.c.bf16 %v3803_v12, %v3803_v12  ;;  %v3402_v20 = vadd.f32 %v3350_v60, %v2828_v7 }
 0x297   : > { %v2483_v18 = vpop.f32.mrf.mxu1 }
 0x298   : > { %3868 = vst.msk [vmem:[%s5999_s5 + $0x48] sm:$0xf] %vm3849_vm9, %v3835_v32  ;;  %v3736_v35 = vadd.f32 %v3684_v19, %v3402_v20  ;;  %v2532_v29 = vadd.f32 %v2483_v18, %v5750_v37 }
 0x29a   : > { %v2779_v26 = vpop.f32.mrf.mxu2  ;;  %v3772_v43 = vadd.f32 %v5966_v24, %v3736_v35 }
 0x29b   : > { %v2829_v46 = vadd.f32 %v2779_v26, %v2531_v38  ;;  %v3687_v42 = vpop.f32.mrf.mxu0 }
 0x29c   : > { %v3804_v57 = vmax.f32 %v3772_v43, 0.0 }
 0x29d   : > { %v3353_v31 = vpop.f32.mrf.mxu3 }
 0x29e   : > { %v3836_v10 = vpack.c.bf16 %v3804_v57, %v3804_v57  ;;  %v3403_v49 = vadd.f32 %v3353_v31, %v2829_v46 }
 0x29f   : > { %v2486_v3 = vpop.f32.mrf.mxu1 }
 0x2a0   : > { %3869 = vst.msk [vmem:[%s5999_s5 + $0x4c] sm:$0xf] %vm3849_vm9, %v3836_v10  ;;  %v3737_v33 = vadd.f32 %v3687_v42, %v3403_v49  ;;  %v2533_v37 = vadd.f32 %v2486_v3, %v5766_v13 }
 0x2a2   : > { %v2781_v11 = vpop.f32.mrf.mxu2  ;;  %v3773_v24 = vadd.f32 %v6312_v17, %v3737_v33 }
 0x2a3   : > { %v2830_v8 = vadd.f32 %v2781_v11, %v2532_v29  ;;  %v3689_v34 = vpop.f32.mrf.mxu0 }
 0x2a4   : > { %v3805_v56 = vmax.f32 %v3773_v24, 0.0 }
 0x2a5   : > { %v3355_v41 = vpop.f32.mrf.mxu3 }
 0x2a6   : > { %v3837_v39 = vpack.c.bf16 %v3805_v56, %v3805_v56  ;;  %v3404_v22 = vadd.f32 %v3355_v41, %v2830_v8 }
 0x2a7   : > { %v2488_v30 = vpop.f32.mrf.mxu1 }
 0x2a8   : > { %3870 = vst.msk [vmem:[%s5999_s5 + $0x50] sm:$0xf] %vm3849_vm9, %v3837_v39  ;;  %v3738_v14 = vadd.f32 %v3689_v34, %v3404_v22  ;;  %v2534_v59 = vadd.f32 %v2488_v30, %v5792_v48 }
 0x2aa   : > { %v2784_v1 = vpop.f32.mrf.mxu2  ;;  %v3774_v4 = vadd.f32 %v6312_v17, %v3738_v14 }
 0x2ab   : > { %v2831_v58 = vadd.f32 %v2784_v1, %v2533_v37  ;;  %v3692_v52 = vpop.f32.mrf.mxu0 }
 0x2ac   : > { %v3806_v28 = vmax.f32 %v3774_v4, 0.0 }
 0x2ad   : > { %v3358_v50 = vpop.f32.mrf.mxu3 }
 0x2ae   : > { %v3838_v45 = vpack.c.bf16 %v3806_v28, %v3806_v28  ;;  %v3405_v2 = vadd.f32 %v3358_v50, %v2831_v58 }
 0x2af   : > { %v2491_v21 = vpop.f32.mrf.mxu1 }
 0x2b0   : > { %3871 = vst.msk [vmem:[%s5999_s5 + $0x54] sm:$0xf] %vm3849_vm9, %v3838_v45  ;;  %v3739_v61 = vadd.f32 %v3692_v52, %v3405_v2  ;;  %v2535_v63 = vadd.f32 %v2491_v21, %v5807_v0 }
 0x2b2   : > { %v2786_v23 = vpop.f32.mrf.mxu2  ;;  %v3775_v62 = vadd.f32 %v6312_v17, %v3739_v61 }
 0x2b3   : > { %v2832_v13 = vadd.f32 %v2786_v23, %v2534_v59  ;;  %v3694_v16 = vpop.f32.mrf.mxu0 }
 0x2b4   : > { %v3807_v25 = vmax.f32 %v3775_v62, 0.0 }
 0x2b5   : > { %v3360_v5 = vpop.f32.mrf.mxu3 }
 0x2b6   : > { %v3839_v47 = vpack.c.bf16 %v3807_v25, %v3807_v25  ;;  %v3406_v36 = vadd.f32 %v3360_v5, %v2832_v13 }
 0x2b7   : > { %v2493_v27 = vpop.f32.mrf.mxu1 }
 0x2b8   : > { %3872 = vst.msk [vmem:[%s5999_s5 + $0x58] sm:$0xf] %vm3849_vm9, %v3839_v47  ;;  %v3740_v40 = vadd.f32 %v3694_v16, %v3406_v36  ;;  %v2536_v38 = vadd.f32 %v2493_v27, %v5834_v15 }
 0x2ba   : > { %v2789_v9 = vpop.f32.mrf.mxu2  ;;  %v3776_v7 = vadd.f32 %v6312_v17, %v3740_v40 }
 0x2bb   : > { %v2833_v48 = vadd.f32 %v2789_v9, %v2535_v63  ;;  %v3697_v19 = vpop.f32.mrf.mxu0 }
 0x2bc   : > { %v3808_v12 = vmax.f32 %v3776_v7, 0.0 }
 0x2bd   : > { %v3363_v60 = vpop.f32.mrf.mxu3 }
 0x2be   : > { %v3840_v32 = vpack.c.bf16 %v3808_v12, %v3808_v12  ;;  %v3407_v20 = vadd.f32 %v3363_v60, %v2833_v48 }
 0x2bf   : > { %v2496_v18 = vpop.f32.mrf.mxu1 }
 0x2c0   : > { %3873 = vst.msk [vmem:[%s5999_s5 + $0x5c] sm:$0xf] %vm3849_vm9, %v3840_v32  ;;  %v3741_v35 = vadd.f32 %v3697_v19, %v3407_v20  ;;  %v2537_v33 = vadd.f32 %v2496_v18, %v5850_v55 }
 0x2c2   : > { %v2791_v26 = vpop.f32.mrf.mxu2  ;;  %v3777_v43 = vadd.f32 %v6312_v17, %v3741_v35 }
 0x2c3   : > { %v2834_v0 = vadd.f32 %v2791_v26, %v2536_v38  ;;  %v3699_v46 = vpop.f32.mrf.mxu0 }
 0x2c4   : > { %v3809_v42 = vmax.f32 %v3777_v43, 0.0 }
 0x2c5   : > { %v3365_v57 = vpop.f32.mrf.mxu3 }
 0x2c6   : > { %v3841_v31 = vpack.c.bf16 %v3809_v42, %v3809_v42  ;;  %v3408_v10 = vadd.f32 %v3365_v57, %v2834_v0 }
 0x2c7   : > { %v2498_v49 = vpop.f32.mrf.mxu1 }
 0x2c8   : > { %3874 = vst.msk [vmem:[%s5999_s5 + $0x60] sm:$0xf] %vm3849_vm9, %v3841_v31  ;;  %v3742_v3 = vadd.f32 %v3699_v46, %v3408_v10  ;;  %v2538_v30 = vadd.f32 %v2498_v49, %v5876_v51 }
 0x2ca   : > { %v2794_v29 = vpop.f32.mrf.mxu2  ;;  %v3778_v11 = vadd.f32 %v6312_v17, %v3742_v3 }
 0x2cb   : > { %v2835_v15 = vadd.f32 %v2794_v29, %v2537_v33  ;;  %v3702_v24 = vpop.f32.mrf.mxu0 }
 0x2cc   : > { %v3810_v8 = vmax.f32 %v3778_v11, 0.0 }
 0x2cd   : > { %v3368_v34 = vpop.f32.mrf.mxu3 }
 0x2ce   : > { %v3842_v56 = vpack.c.bf16 %v3810_v8, %v3810_v8  ;;  %v3409_v41 = vadd.f32 %v3368_v34, %v2835_v15 }
 0x2cf   : > { %v2501_v39 = vpop.f32.mrf.mxu1 }
 0x2d0   : > { %3875 = vst.msk [vmem:[%s5999_s5 + $0x64] sm:$0xf] %vm3849_vm9, %v3842_v56  ;;  %v3743_v22 = vadd.f32 %v3702_v24, %v3409_v41  ;;  %v2539_v45 = vadd.f32 %v2501_v39, %v5891_v54 }
 0x2d2   : > { %v2796_v14 = vpop.f32.mrf.mxu2  ;;  %v3779_v37 = vadd.f32 %v6312_v17, %v3743_v22 }
 0x2d3   : > { %v2836_v55 = vadd.f32 %v2796_v14, %v2538_v30  ;;  %v3704_v1 = vpop.f32.mrf.mxu0 }
 0x2d4   : > { %v3811_v4 = vmax.f32 %v3779_v37, 0.0 }
 0x2d5   : > { %v3370_v58 = vpop.f32.mrf.mxu3 }
 0x2d6   : > { %v3843_v52 = vpack.c.bf16 %v3811_v4, %v3811_v4  ;;  %v3410_v28 = vadd.f32 %v3370_v58, %v2836_v55 }
 0x2d7   : > { %v2503_v2 = vpop.f32.mrf.mxu1 }
 0x2d8   : > { %3876 = vst.msk [vmem:[%s5999_s5 + $0x68] sm:$0xf] %vm3849_vm9, %v3843_v52  ;;  %v3744_v50 = vadd.f32 %v3704_v1, %v3410_v28  ;;  %v2540_v5 = vadd.f32 %v2503_v2, %v5916_v6 }
 0x2da   : > { %v2799_v21 = vpop.f32.mrf.mxu2  ;;  %v3780_v61 = vadd.f32 %v6312_v17, %v3744_v50 }
 0x2db   : > { %v2837_v51 = vadd.f32 %v2799_v21, %v2539_v45  ;;  %v3707_v59 = vpop.f32.mrf.mxu0 }
 0x2dc   : > { %v3812_v23 = vmax.f32 %v3780_v61, 0.0 }
 0x2dd   : > { %v3373_v62 = vpop.f32.mrf.mxu3 }
 0x2de   : > { %v3844_v13 = vpack.c.bf16 %v3812_v23, %v3812_v23  ;;  %v3411_v16 = vadd.f32 %v3373_v62, %v2837_v51 }
 0x2df   : > { %v2506_v27 = vpop.f32.mrf.mxu1 }
 0x2e0   : > { %3877 = vst.msk [vmem:[%s5999_s5 + $0x6c] sm:$0xf] %vm3849_vm9, %v3844_v13  ;;  %v3745_v25 = vadd.f32 %v3707_v59, %v3411_v16  ;;  %v2541_v12 = vadd.f32 %v2506_v27, %v5930_v44 }
 0x2e2   : > { %v2801_v47 = vpop.f32.mrf.mxu2  ;;  %v3781_v36 = vadd.f32 %v6312_v17, %v3745_v25 }
 0x2e3   : > { %v2838_v54 = vadd.f32 %v2801_v47, %v2540_v5  ;;  %v3709_v40 = vpop.f32.mrf.mxu0 }
 0x2e4   : > { %v3813_v63 = vmax.f32 %v3781_v36, 0.0 }
 0x2e5   : > { %v3375_v9 = vpop.f32.mrf.mxu3 }
 0x2e6   : > { %v3845_v7 = vpack.c.bf16 %v3813_v63, %v3813_v63  ;;  %v3412_v48 = vadd.f32 %v3375_v9, %v2838_v54 }
 0x2e7   : > { %v2508_v18 = vpop.f32.mrf.mxu1 }
 0x2e8   : > { %3878 = vst.msk [vmem:[%s5999_s5 + $0x70] sm:$0xf] %vm3849_vm9, %v3845_v7  ;;  %v3746_v19 = vadd.f32 %v3709_v40, %v3412_v48  ;;  %v2542_v46 = vadd.f32 %v2508_v18, %v5954_v53 }
 0x2ea   : > { %v2804_v60 = vpop.f32.mrf.mxu2  ;;  %v3782_v6 = vadd.f32 %v6312_v17, %v3746_v19 }
 0x2eb   : > { %v2839_v32 = vadd.f32 %v2804_v60, %v2541_v12  ;;  %v3712_v35 = vpop.f32.mrf.mxu0 }
 0x2ec   : > { %v3814_v20 = vmax.f32 %v3782_v6, 0.0 }
 0x2ed   : > { %v3378_v38 = vpop.f32.mrf.mxu3 }
 0x2ee   : > { %v3846_v26 = vpack.c.bf16 %v3814_v20, %v3814_v20  ;;  %v3413_v43 = vadd.f32 %v3378_v38, %v2839_v32 }
 0x2f0   : > { %3879 = vst.msk [vmem:[%s5999_s5 + $0x74] sm:$0xf] %vm3849_vm9, %v3846_v26  ;;  %v3747_v0 = vadd.f32 %v3712_v35, %v3413_v43 }
 0x2f2   : > { %v2806_v44 = vpop.f32.mrf.mxu2  ;;  %v3783_v42 = vadd.f32 %v6312_v17, %v3747_v0 }
 0x2f3   : > { %v2840_v57 = vadd.f32 %v2806_v44, %v2542_v46  ;;  %v3714_v33 = vpop.f32.mrf.mxu0 }
 0x2f4   : > { %v3815_v31 = vmax.f32 %v3783_v42, 0.0 }
 0x2f5   : > { %v3380_v10 = vpop.f32.mrf.mxu3 }
 0x2f6   : > { %v3847_v49 = vpack.c.bf16 %v3815_v31, %v3815_v31  ;;  %v3414_v3 = vadd.f32 %v3380_v10, %v2840_v57 }
 0x2f8   : > { %3880 = vst.msk [vmem:[%s5999_s5 + $0x78] sm:$0xf] %vm3849_vm9, %v3847_v49  ;;  %v3748_v29 = vadd.f32 %v3714_v33, %v3414_v3 }
 0x2fa   : > { %v3784_v53 = vadd.f32 %v6312_v17, %v3748_v29 }
 0x2fc   : > { %v3816_v11 = vmax.f32 %v3784_v53, 0.0 }
 0x2fe   : > { %v3848_v15 = vpack.c.bf16 %v3816_v11, %v3816_v11 }
 0x300   : > { %3881 = vst.msk [vmem:[%s5999_s5 + $0x7c] sm:$0xf] %vm3849_vm9, %v3848_v15 }
 0x301   : > { %4675 = shalt.err (!%p4672_p6)
}
 0x302   : > { %s4745_s29 = smov 64   ;;  %s4746_s5 = smov 4  }
 0x303   : > { %4510 = dma.vmem_to_hbm [thread:$0]  (%p4818_p3), %s3899_s21, 2048, %s3901_s24, %s3883_s27, %s4745_s29, %s4745_s29, %s4746_s5  }
 0x304 PF: > { %p4516_p7 = scmp.ge.s32.totalorder %s4742_s19, 2  ;;  %s3915_s11 = sand.u32 1, %s4714_s12  }
 0x305   : > { %s3916_s15 = scalar_lea.sflag [#allocation3], %s3915_s11 }
 0x306   : > { %p4513_p9 = pnand %p4516_p7, %p4827_p8 }
 0x308   : > { %p4514_p10 = pneg %p4513_p9 }
 0x30a   : > { %4709 = dma.done.wait (%p4514_p10), %s3916_s15, 2048  }
 0x30b   : > { %4711 = vsyncadd (%p4514_p10), %s3916_s15, 4294965248  ;;  %s16_s19 = sadd.s32 1, %s4742_s19   ;;  %s6422_s12 = smov %s4718_s13 }
 0x30c   : > { %p13_p11 = scmp.ge.s32.totalorder %s16_s19, 10   ;;  %s6423_s13 = smov %s4722_s14 }
 0x30d   : > { %s6424_s14 = smov %s4836_s30  ;;  %s6425_s15 = smov %s4734_s17 }
 0x30e   : > { %s6426_s16 = smov %s4738_s18  ;;  %s6427_s17 = smov %s6430_s22 }
 0x30f   : > { %s6428_s18 = smov %s6434_s23  ;;  %15 = sbr.rel (!%p13_p11) target bundleno = 5 (0x5), region = 78 }
 0x314   :  { %3922 = vsyncpa [#allocation3], 1 }
 0x315   :  { %3924 = vsyncpa [#allocation3 + $0x1], 1 }

</bundles_post_ra>
